<compile_context>
chip_gen: v7x
topology: tpu7x:2x2x1
jax: 0.10.0
libtpu: 0.0.40
codegen_flags: <defaults>
</compile_context>

<pallas_src>
import functools

import jax
import jax.numpy as jnp
from jax.experimental import pallas as pl
from jax.experimental.pallas import tpu as pltpu


# ----------------------------------------------------------------------------
# Pallas kernel: 2-layer GRU recurrence over a block of TT timesteps per grid
# step.  Layer-0 input projections (gi0) arrive precomputed; hidden states are
# carried across grid steps in VMEM (h1 in scratch, h2 in the resident output
# block).
# ----------------------------------------------------------------------------
def _gru2_recurrence_kernel(gi0_ref,                       # (TT, B, 3Hp) f32
                            whh0_ref,                      # (Hp, 3Hp) compute dtype
                            bhh0n_ref,                     # (1, Hp)   f32
                            wih1_ref,                      # (Hp, 3Hp) compute dtype
                            bi1_ref,                       # (1, 3Hp)  f32
                            whh1_ref,                      # (Hp, 3Hp) compute dtype
                            bhh1n_ref,                     # (1, Hp)   f32
                            h2_ref,                        # out: (B, Hp) f32
                            h1_scratch,                    # VMEM (B, Hp) f32
                            *, tt, hp, compute_dtype):
    tb = pl.program_id(0)

    @pl.when(tb == 0)
    def _():
        h1_scratch[...] = jnp.zeros_like(h1_scratch)
        h2_ref[...] = jnp.zeros_like(h2_ref)

    # Small biases: load once per grid step (hoisted out of the time loop).
    bhh0n = bhh0n_ref[...]
    bhh1n = bhh1n_ref[...]
    bi1 = bi1_ref[...]

    def cell(gi, h_prev, whh_ref, bhhn):
        # gi already contains the input projection + folded biases.
        gh = jnp.dot(h_prev.astype(compute_dtype), whh_ref[...],
                     preferred_element_type=jnp.float32)
        # Fused sigmoid over the contiguous (B, 2*Hp) r/z slab; slices are
        # lane-aligned because each gate occupies exactly Hp (multiple of 128).
        rz = jax.nn.sigmoid(gi[:, :2 * hp] + gh[:, :2 * hp])
        r = rz[:, :hp]
        z = rz[:, hp:]
        n = jnp.tanh(gi[:, 2 * hp:] + r * (gh[:, 2 * hp:] + bhhn))
        return (1.0 - z) * n + z * h_prev

    def step(t, carry):
        h1, h2 = carry
        gi0 = gi0_ref[t]                                   # (B, 3Hp), dynamic first-axis index
        h1 = cell(gi0, h1, whh0_ref, bhh0n)
        gi1 = jnp.dot(h1.astype(compute_dtype), wih1_ref[...],
                      preferred_element_type=jnp.float32) + bi1
        h2 = cell(gi1, h2, whh1_ref, bhh1n)
        return h1, h2

    h1, h2 = jax.lax.fori_loop(0, tt, step,
                               (h1_scratch[...], h2_ref[...]),
                               unroll=min(tt, 8))
    h1_scratch[...] = h1
    h2_ref[...] = h2


# ----------------------------------------------------------------------------
# Wrapper: hoisted layer-0 projection  ->  Pallas recurrence  ->  final Linear.
# ----------------------------------------------------------------------------
def speaker_rnn_forward(x, params, *, time_block=None):
    """x: (B, T, D) float32, batch_first like the PyTorch module."""
    B, T, D = x.shape
    Hp, G3 = params["whh0"].shape            # Hp, 3*Hp
    compute_dtype = params["whh0"].dtype

    # (1) Layer-0 input projection for ALL timesteps as one big matmul, emitted
    # directly in time-major layout (no standalone transpose of x).  Bias
    # already includes the folded b_hh_{r,z} terms.
    gi0 = jnp.einsum("btd,dg->tbg", x.astype(compute_dtype), params["wih0"],
                     preferred_element_type=jnp.float32) + params["bi0"]

    # (2) Time blocking: whole sequence per grid step by default.
    TT = T if time_block is None else time_block
    assert T % TT == 0, "time_block must divide T"
    n_blocks = T // TT

    full2d = lambda shape: pl.BlockSpec(shape, lambda tb: (0, 0))

    grid_spec = pltpu.PrefetchScalarGridSpec(
        num_scalar_prefetch=0,
        grid=(n_blocks,),
        in_specs=[
            pl.BlockSpec((TT, B, G3), lambda tb: (tb, 0, 0)),   # gi0 time block
            full2d((Hp, G3)),                                   # whh0
            full2d((1, Hp)),                                    # bhh0_n
            full2d((Hp, G3)),                                   # wih1
            full2d((1, G3)),                                    # bi1 (folded)
            full2d((Hp, G3)),                                   # whh1
            full2d((1, Hp)),                                    # bhh1_n
        ],
        out_specs=pl.BlockSpec((B, Hp), lambda tb: (0, 0)),     # resident h2
        scratch_shapes=[pltpu.VMEM((B, Hp), jnp.float32)],      # h1 carry
    )

    # (3) VMEM budget sized from the actual resident set, capped for v7x.
    nbytes = lambda a: a.size * a.dtype.itemsize
    resident = (2 * TT * B * G3 * 4
                + 2 * sum(nbytes(params[k]) for k in
                          ("whh0", "bhh0n", "wih1", "bi1", "whh1", "bhh1n"))
                + 2 * B * Hp * 4                                 # output block
                + B * Hp * 4)                                    # h1 scratch
    vmem_limit = int(min(max(2 * resident, 32 << 20), 64 << 20))

    kernel = functools.partial(_gru2_recurrence_kernel,
                               tt=TT, hp=Hp, compute_dtype=compute_dtype)

    h2 = pl.pallas_call(
        kernel,
        out_shape=jax.ShapeDtypeStruct((B, Hp), jnp.float32),
        grid_spec=grid_spec,
        compiler_params=pltpu.CompilerParams(
            dimension_semantics=("arbitrary",),    # time recurrence is sequential
            vmem_limit_bytes=vmem_limit),
    )(gi0, params["whh0"], params["bhh0n"], params["wih1"],
      params["bi1"], params["whh1"], params["bhh1n"])

    # (4) Final Linear on the last timestep's hidden state (tiny; kept in XLA
    # so wfc/bfc never occupy VMEM during the recurrence).  Padded rows of wfc
    # are zero, matching the zero padded lanes of h2.
    return h2 @ params["wfc"] + params["bfc"]


# ----------------------------------------------------------------------------
# Parameter construction / packing.
# ----------------------------------------------------------------------------
def make_raw_params(key, input_dim, hidden_dim, output_dim):
    """PyTorch-layout GRU/Linear weights with the default uniform init."""
    H = hidden_dim
    bound = 1.0 / (H ** 0.5)
    ks = jax.random.split(key, 10)
    u = lambda k, shape: jax.random.uniform(k, shape, jnp.float32, -bound, bound)
    return {
        "w_ih_l0": u(ks[0], (3 * H, input_dim)),
        "w_hh_l0": u(ks[1], (3 * H, H)),
        "b_ih_l0": u(ks[2], (3 * H,)),
        "b_hh_l0": u(ks[3], (3 * H,)),
        "w_ih_l1": u(ks[4], (3 * H, H)),
        "w_hh_l1": u(ks[5], (3 * H, H)),
        "b_ih_l1": u(ks[6], (3 * H,)),
        "b_hh_l1": u(ks[7], (3 * H,)),
        "fc_w":   u(ks[8], (output_dim, H)),
        "fc_b":   u(ks[9], (output_dim,)),
    }


def pack_params(raw, *, lane=128, compute_dtype=jnp.float32):
    """Transpose to x@W layout, pad each gate to a 128-lane boundary, fold the
    r/z hidden biases into the input-side bias.  `compute_dtype` controls the
    matmul-weight dtype (f32 by default for portability; bf16 is a hardware-
    only option)."""
    H = raw["w_hh_l0"].shape[1]
    Hp = ((H + lane - 1) // lane) * lane
    O = raw["fc_w"].shape[0]
    f32 = jnp.float32

    def gate_pad_cols(w_t):                                  # (in, 3H) -> (in, 3Hp)
        parts = [w_t[:, g * H:(g + 1) * H] for g in range(3)]
        return jnp.concatenate(
            [jnp.pad(p, ((0, 0), (0, Hp - H))) for p in parts], axis=1)

    def gate_pad_vec(b):                                     # (3H,) -> (1, 3Hp)
        parts = [b[g * H:(g + 1) * H] for g in range(3)]
        return jnp.concatenate(
            [jnp.pad(p, (0, Hp - H)) for p in parts]).reshape(1, 3 * Hp)

    pad_rows = lambda w: jnp.pad(w, ((0, Hp - H), (0, 0)))   # (H, X) -> (Hp, X)
    pad_vec = lambda b: jnp.pad(b, (0, Hp - H)).reshape(1, Hp)

    zeros_n = jnp.zeros((H,), f32)

    wih0 = gate_pad_cols(raw["w_ih_l0"].T).astype(compute_dtype)
    whh0 = pad_rows(gate_pad_cols(raw["w_hh_l0"].T)).astype(compute_dtype)
    bi0 = gate_pad_vec(raw["b_ih_l0"]
                       + jnp.concatenate([raw["b_hh_l0"][:2 * H], zeros_n]))
    bhh0n = pad_vec(raw["b_hh_l0"][2 * H:])

    wih1 = pad_rows(gate_pad_cols(raw["w_ih_l1"].T)).astype(compute_dtype)
    whh1 = pad_rows(gate_pad_cols(raw["w_hh_l1"].T)).astype(compute_dtype)
    bi1 = gate_pad_vec(raw["b_ih_l1"]
                       + jnp.concatenate([raw["b_hh_l1"][:2 * H], zeros_n]))
    bhh1n = pad_vec(raw["b_hh_l1"][2 * H:])

    wfc = pad_rows(raw["fc_w"].T).astype(f32)                # (Hp, O)
    bfc = raw["fc_b"].reshape(1, O).astype(f32)

    return dict(
        wih0=wih0, bi0=bi0.astype(f32),
        whh0=whh0, bhh0n=bhh0n.astype(f32),
        wih1=wih1, bi1=bi1.astype(f32),
        whh1=whh1, bhh1n=bhh1n.astype(f32),
        wfc=wfc, bfc=bfc,
    )


# ----------------------------------------------------------------------------
# Pure-JAX reference of the PyTorch semantics for validation.
# ----------------------------------------------------------------------------
def reference_forward(x, raw):
    H = raw["w_hh_l0"].shape[1]

    def cell(x_t, h, w_ih, w_hh, b_ih, b_hh):
        gi = x_t @ w_ih.T + b_ih
        gh = h @ w_hh.T + b_hh
        r = jax.nn.sigmoid(gi[:, :H] + gh[:, :H])
        z = jax.nn.sigmoid(gi[:, H:2 * H] + gh[:, H:2 * H])
        n = jnp.tanh(gi[:, 2 * H:] + r * gh[:, 2 * H:])
        return (1.0 - z) * n + z * h

    B, T, _ = x.shape
    h1 = jnp.zeros((B, H), jnp.float32)
    h2 = jnp.zeros((B, H), jnp.float32)
    for t in range(T):
        x_t = x[:, t, :]
        h1 = cell(x_t, h1, raw["w_ih_l0"], raw["w_hh_l0"],
                  raw["b_ih_l0"], raw["b_hh_l0"])
        h2 = cell(h1, h2, raw["w_ih_l1"], raw["w_hh_l1"],
                  raw["b_ih_l1"], raw["b_hh_l1"])
    return h2 @ raw["fc_w"].T + raw["fc_b"]


if __name__ == "__main__":
    B, T, D, H, O = 2, 8, 16, 32, 8

    key = jax.random.PRNGKey(0)
    kx, kp = jax.random.split(key)
    x = jax.random.normal(kx, (B, T, D), jnp.float32)
    raw = make_raw_params(kp, D, H, O)

    fwd = jax.jit(speaker_rnn_forward)

    # f32 pipeline end to end: exact semantic check against the pure-JAX
    # reference of the PyTorch module.
    params = pack_params(raw, compute_dtype=jnp.float32)
    out = jax.block_until_ready(fwd(x, params))
    ref = reference_forward(x, raw)
    assert out.shape == (B, O)
    assert jnp.allclose(out, ref, atol=1e-4, rtol=1e-4)

    print("KERNEL_OK")
</pallas_src>

<mosaic_0001>
module attributes {stable_mosaic.version = 11 : i64} {
  func.func @_gru2_recurrence_kernel(%arg0: i32, %arg1: memref<8x2x384xf32, #tpu.memory_space<vmem>>, %arg2: memref<128x384xf32, #tpu.memory_space<vmem>>, %arg3: memref<1x128xf32, #tpu.memory_space<vmem>>, %arg4: memref<128x384xf32, #tpu.memory_space<vmem>>, %arg5: memref<1x384xf32, #tpu.memory_space<vmem>>, %arg6: memref<128x384xf32, #tpu.memory_space<vmem>>, %arg7: memref<1x128xf32, #tpu.memory_space<vmem>>, %arg8: memref<2x128xf32, #tpu.memory_space<vmem>>, %arg9: memref<2x128xf32, #tpu.memory_space<vmem>>) attributes {dimension_semantics = [#tpu.dimension_semantics<arbitrary>], iteration_bounds = array<i64: 1>, scalar_prefetch = 0 : i64, scratch_operands = 1 : i64, tpu.core_type = #tpu.core_type<tc>, window_params = [{transform_indices = @transform_0, window_bounds = array<i64: 8, 2, 384>}, {pipeline_mode = #tpu.pipeline_mode<synchronous>, transform_indices = @transform_1, window_bounds = array<i64: 128, 384>}, {pipeline_mode = #tpu.pipeline_mode<synchronous>, transform_indices = @transform_2, window_bounds = array<i64: 1, 128>}, {pipeline_mode = #tpu.pipeline_mode<synchronous>, transform_indices = @transform_3, window_bounds = array<i64: 128, 384>}, {pipeline_mode = #tpu.pipeline_mode<synchronous>, transform_indices = @transform_4, window_bounds = array<i64: 1, 384>}, {pipeline_mode = #tpu.pipeline_mode<synchronous>, transform_indices = @transform_5, window_bounds = array<i64: 128, 384>}, {pipeline_mode = #tpu.pipeline_mode<synchronous>, transform_indices = @transform_6, window_bounds = array<i64: 1, 128>}, {pipeline_mode = #tpu.pipeline_mode<synchronous>, transform_indices = @transform_7, window_bounds = array<i64: 2, 128>}]} {
    %c0_i32 = arith.constant 0 : i32
    %0 = arith.cmpi eq, %arg0, %c0_i32 : i32
    %1 = arith.extui %0 : i1 to i32
    %c0_i32_0 = arith.constant 0 : i32
    %2 = arith.cmpi ne, %1, %c0_i32_0 : i32
    scf.if %2 {
      %cst_134 = arith.constant 0.000000e+00 : f32
      %450 = vector.broadcast %cst_134 : f32 to vector<2x128xf32>
      %c0_135 = arith.constant 0 : index
      %c0_136 = arith.constant 0 : index
      %451 = vector.load %arg9[%c0_135, %c0_136] : memref<2x128xf32, #tpu.memory_space<vmem>>, vector<2x128xf32>
      tpu.vector_store %arg9[%c0_135, %c0_136], %450 {strides = array<i32>} : memref<2x128xf32, #tpu.memory_space<vmem>>, vector<2x128xf32>,
      %cst_137 = arith.constant 0.000000e+00 : f32
      %452 = vector.broadcast %cst_137 : f32 to vector<2x128xf32>
      %c0_138 = arith.constant 0 : index
      %c0_139 = arith.constant 0 : index
      %453 = vector.load %arg8[%c0_138, %c0_139] : memref<2x128xf32, #tpu.memory_space<vmem>>, vector<2x128xf32>
      tpu.vector_store %arg8[%c0_138, %c0_139], %452 {strides = array<i32>} : memref<2x128xf32, #tpu.memory_space<vmem>>, vector<2x128xf32>,
    } else {
    }
    %c0 = arith.constant 0 : index
    %c0_1 = arith.constant 0 : index
    %3 = vector.load %arg3[%c0, %c0_1] : memref<1x128xf32, #tpu.memory_space<vmem>>, vector<1x128xf32>
    %c0_2 = arith.constant 0 : index
    %c0_3 = arith.constant 0 : index
    %4 = vector.load %arg7[%c0_2, %c0_3] : memref<1x128xf32, #tpu.memory_space<vmem>>, vector<1x128xf32>
    %c0_4 = arith.constant 0 : index
    %c0_5 = arith.constant 0 : index
    %5 = vector.load %arg5[%c0_4, %c0_5] : memref<1x384xf32, #tpu.memory_space<vmem>>, vector<1x384xf32>
    %c0_6 = arith.constant 0 : index
    %c0_7 = arith.constant 0 : index
    %6 = vector.load %arg9[%c0_6, %c0_7] : memref<2x128xf32, #tpu.memory_space<vmem>>, vector<2x128xf32>
    %c0_8 = arith.constant 0 : index
    %c0_9 = arith.constant 0 : index
    %7 = vector.load %arg8[%c0_8, %c0_9] : memref<2x128xf32, #tpu.memory_space<vmem>>, vector<2x128xf32>
    %c0_i32_10 = arith.constant 0 : i32
    %8 = arith.index_cast %c0_i32_10 : i32 to index
    %c0_11 = arith.constant 0 : index
    %c0_12 = arith.constant 0 : index
    %9 = vector.load %arg1[%8, %c0_11, %c0_12] : memref<8x2x384xf32, #tpu.memory_space<vmem>>, vector<1x2x384xf32>
    %10 = vector.shape_cast %9 : vector<1x2x384xf32> to vector<2x384xf32>
    %c0_13 = arith.constant 0 : index
    %c0_14 = arith.constant 0 : index
    %11 = vector.load %arg2[%c0_13, %c0_14] : memref<128x384xf32, #tpu.memory_space<vmem>>, vector<128x384xf32>
    %cst = arith.constant dense<0.000000e+00> : vector<2x384xf32>
    %12 = tpu.matmul %6, %11, %cst {dimension_numbers = #tpu.dot_dimension_numbers<[1], [0], [0], [1], [0, 0, 1, 1], [], []>} : vector<2x128xf32>, vector<128x384xf32>, vector<2x384xf32> -> vector<2x384xf32>
    %13 = vector.extract_strided_slice %10 {offsets = [0, 0], sizes = [2, 256], strides = [1, 1]} : vector<2x384xf32> to vector<2x256xf32>
    %14 = vector.extract_strided_slice %12 {offsets = [0, 0], sizes = [2, 256], strides = [1, 1]} : vector<2x384xf32> to vector<2x256xf32>
    %15 = arith.addf %13, %14 : vector<2x256xf32>
    %16 = arith.negf %15 : vector<2x256xf32>
    %17 = math.exp %16 : vector<2x256xf32>
    %cst_15 = arith.constant 1.000000e+00 : f32
    %18 = vector.broadcast %cst_15 : f32 to vector<2x256xf32>
    %19 = arith.addf %18, %17 : vector<2x256xf32>
    %20 = arith.divf %18, %19 : vector<2x256xf32>
    %21 = vector.extract_strided_slice %20 {offsets = [0, 0], sizes = [2, 128], strides = [1, 1]} : vector<2x256xf32> to vector<2x128xf32>
    %22 = vector.extract_strided_slice %20 {offsets = [0, 128], sizes = [2, 128], strides = [1, 1]} : vector<2x256xf32> to vector<2x128xf32>
    %23 = vector.extract_strided_slice %10 {offsets = [0, 256], sizes = [2, 128], strides = [1, 1]} : vector<2x384xf32> to vector<2x128xf32>
    %24 = vector.extract_strided_slice %12 {offsets = [0, 256], sizes = [2, 128], strides = [1, 1]} : vector<2x384xf32> to vector<2x128xf32>
    %25 = vector.broadcast %3 : vector<1x128xf32> to vector<2x128xf32>
    %26 = arith.addf %24, %25 : vector<2x128xf32>
    %27 = arith.mulf %21, %26 : vector<2x128xf32>
    %28 = arith.addf %23, %27 : vector<2x128xf32>
    %29 = math.tanh %28 : vector<2x128xf32>
    %cst_16 = arith.constant 1.000000e+00 : f32
    %30 = vector.broadcast %cst_16 : f32 to vector<2x128xf32>
    %31 = arith.subf %30, %22 : vector<2x128xf32>
    %32 = arith.mulf %31, %29 : vector<2x128xf32>
    %33 = arith.mulf %22, %6 : vector<2x128xf32>
    %34 = arith.addf %32, %33 : vector<2x128xf32>
    %c0_17 = arith.constant 0 : index
    %c0_18 = arith.constant 0 : index
    %35 = vector.load %arg4[%c0_17, %c0_18] : memref<128x384xf32, #tpu.memory_space<vmem>>, vector<128x384xf32>
    %cst_19 = arith.constant dense<0.000000e+00> : vector<2x384xf32>
    %36 = tpu.matmul %34, %35, %cst_19 {dimension_numbers = #tpu.dot_dimension_numbers<[1], [0], [0], [1], [0, 0, 1, 1], [], []>} : vector<2x128xf32>, vector<128x384xf32>, vector<2x384xf32> -> vector<2x384xf32>
    %37 = vector.broadcast %5 : vector<1x384xf32> to vector<2x384xf32>
    %38 = arith.addf %36, %37 : vector<2x384xf32>
    %c0_20 = arith.constant 0 : index
    %c0_21 = arith.constant 0 : index
    %39 = vector.load %arg6[%c0_20, %c0_21] : memref<128x384xf32, #tpu.memory_space<vmem>>, vector<128x384xf32>
    %cst_22 = arith.constant dense<0.000000e+00> : vector<2x384xf32>
    %40 = tpu.matmul %7, %39, %cst_22 {dimension_numbers = #tpu.dot_dimension_numbers<[1], [0], [0], [1], [0, 0, 1, 1], [], []>} : vector<2x128xf32>, vector<128x384xf32>, vector<2x384xf32> -> vector<2x384xf32>
    %41 = vector.extract_strided_slice %38 {offsets = [0, 0], sizes = [2, 256], strides = [1, 1]} : vector<2x384xf32> to vector<2x256xf32>
    %42 = vector.extract_strided_slice %40 {offsets = [0, 0], sizes = [2, 256], strides = [1, 1]} : vector<2x384xf32> to vector<2x256xf32>
    %43 = arith.addf %41, %42 : vector<2x256xf32>
    %44 = arith.negf %43 : vector<2x256xf32>
    %45 = math.exp %44 : vector<2x256xf32>
    %cst_23 = arith.constant 1.000000e+00 : f32
    %46 = vector.broadcast %cst_23 : f32 to vector<2x256xf32>
    %47 = arith.addf %46, %45 : vector<2x256xf32>
    %48 = arith.divf %46, %47 : vector<2x256xf32>
    %49 = vector.extract_strided_slice %48 {offsets = [0, 0], sizes = [2, 128], strides = [1, 1]} : vector<2x256xf32> to vector<2x128xf32>
    %50 = vector.extract_strided_slice %48 {offsets = [0, 128], sizes = [2, 128], strides = [1, 1]} : vector<2x256xf32> to vector<2x128xf32>
    %51 = vector.extract_strided_slice %38 {offsets = [0, 256], sizes = [2, 128], strides = [1, 1]} : vector<2x384xf32> to vector<2x128xf32>
    %52 = vector.extract_strided_slice %40 {offsets = [0, 256], sizes = [2, 128], strides = [1, 1]} : vector<2x384xf32> to vector<2x128xf32>
    %53 = vector.broadcast %4 : vector<1x128xf32> to vector<2x128xf32>
    %54 = arith.addf %52, %53 : vector<2x128xf32>
    %55 = arith.mulf %49, %54 : vector<2x128xf32>
    %56 = arith.addf %51, %55 : vector<2x128xf32>
    %57 = math.tanh %56 : vector<2x128xf32>
    %cst_24 = arith.constant 1.000000e+00 : f32
    %58 = vector.broadcast %cst_24 : f32 to vector<2x128xf32>
    %59 = arith.subf %58, %50 : vector<2x128xf32>
    %60 = arith.mulf %59, %57 : vector<2x128xf32>
    %61 = arith.mulf %50, %7 : vector<2x128xf32>
    %62 = arith.addf %60, %61 : vector<2x128xf32>
    %c1_i32 = arith.constant 1 : i32
    %63 = arith.index_cast %c1_i32 : i32 to index
    %c0_25 = arith.constant 0 : index
    %c0_26 = arith.constant 0 : index
    %64 = vector.load %arg1[%63, %c0_25, %c0_26] : memref<8x2x384xf32, #tpu.memory_space<vmem>>, vector<1x2x384xf32>
    %65 = vector.shape_cast %64 : vector<1x2x384xf32> to vector<2x384xf32>
    %c0_27 = arith.constant 0 : index
    %c0_28 = arith.constant 0 : index
    %66 = vector.load %arg2[%c0_27, %c0_28] : memref<128x384xf32, #tpu.memory_space<vmem>>, vector<128x384xf32>
    %cst_29 = arith.constant dense<0.000000e+00> : vector<2x384xf32>
    %67 = tpu.matmul %34, %66, %cst_29 {dimension_numbers = #tpu.dot_dimension_numbers<[1], [0], [0], [1], [0, 0, 1, 1], [], []>} : vector<2x128xf32>, vector<128x384xf32>, vector<2x384xf32> -> vector<2x384xf32>
    %68 = vector.extract_strided_slice %65 {offsets = [0, 0], sizes = [2, 256], strides = [1, 1]} : vector<2x384xf32> to vector<2x256xf32>
    %69 = vector.extract_strided_slice %67 {offsets = [0, 0], sizes = [2, 256], strides = [1, 1]} : vector<2x384xf32> to vector<2x256xf32>
    %70 = arith.addf %68, %69 : vector<2x256xf32>
    %71 = arith.negf %70 : vector<2x256xf32>
    %72 = math.exp %71 : vector<2x256xf32>
    %cst_30 = arith.constant 1.000000e+00 : f32
    %73 = vector.broadcast %cst_30 : f32 to vector<2x256xf32>
    %74 = arith.addf %73, %72 : vector<2x256xf32>
    %75 = arith.divf %73, %74 : vector<2x256xf32>
    %76 = vector.extract_strided_slice %75 {offsets = [0, 0], sizes = [2, 128], strides = [1, 1]} : vector<2x256xf32> to vector<2x128xf32>
    %77 = vector.extract_strided_slice %75 {offsets = [0, 128], sizes = [2, 128], strides = [1, 1]} : vector<2x256xf32> to vector<2x128xf32>
    %78 = vector.extract_strided_slice %65 {offsets = [0, 256], sizes = [2, 128], strides = [1, 1]} : vector<2x384xf32> to vector<2x128xf32>
    %79 = vector.extract_strided_slice %67 {offsets = [0, 256], sizes = [2, 128], strides = [1, 1]} : vector<2x384xf32> to vector<2x128xf32>
    %80 = vector.broadcast %3 : vector<1x128xf32> to vector<2x128xf32>
    %81 = arith.addf %79, %80 : vector<2x128xf32>
    %82 = arith.mulf %76, %81 : vector<2x128xf32>
    %83 = arith.addf %78, %82 : vector<2x128xf32>
    %84 = math.tanh %83 : vector<2x128xf32>
    %cst_31 = arith.constant 1.000000e+00 : f32
    %85 = vector.broadcast %cst_31 : f32 to vector<2x128xf32>
    %86 = arith.subf %85, %77 : vector<2x128xf32>
    %87 = arith.mulf %86, %84 : vector<2x128xf32>
    %88 = arith.mulf %77, %34 : vector<2x128xf32>
    %89 = arith.addf %87, %88 : vector<2x128xf32>
    %c0_32 = arith.constant 0 : index
    %c0_33 = arith.constant 0 : index
    %90 = vector.load %arg4[%c0_32, %c0_33] : memref<128x384xf32, #tpu.memory_space<vmem>>, vector<128x384xf32>
    %cst_34 = arith.constant dense<0.000000e+00> : vector<2x384xf32>
    %91 = tpu.matmul %89, %90, %cst_34 {dimension_numbers = #tpu.dot_dimension_numbers<[1], [0], [0], [1], [0, 0, 1, 1], [], []>} : vector<2x128xf32>, vector<128x384xf32>, vector<2x384xf32> -> vector<2x384xf32>
    %92 = vector.broadcast %5 : vector<1x384xf32> to vector<2x384xf32>
    %93 = arith.addf %91, %92 : vector<2x384xf32>
    %c0_35 = arith.constant 0 : index
    %c0_36 = arith.constant 0 : index
    %94 = vector.load %arg6[%c0_35, %c0_36] : memref<128x384xf32, #tpu.memory_space<vmem>>, vector<128x384xf32>
    %cst_37 = arith.constant dense<0.000000e+00> : vector<2x384xf32>
    %95 = tpu.matmul %62, %94, %cst_37 {dimension_numbers = #tpu.dot_dimension_numbers<[1], [0], [0], [1], [0, 0, 1, 1], [], []>} : vector<2x128xf32>, vector<128x384xf32>, vector<2x384xf32> -> vector<2x384xf32>
    %96 = vector.extract_strided_slice %93 {offsets = [0, 0], sizes = [2, 256], strides = [1, 1]} : vector<2x384xf32> to vector<2x256xf32>
    %97 = vector.extract_strided_slice %95 {offsets = [0, 0], sizes = [2, 256], strides = [1, 1]} : vector<2x384xf32> to vector<2x256xf32>
    %98 = arith.addf %96, %97 : vector<2x256xf32>
    %99 = arith.negf %98 : vector<2x256xf32>
    %100 = math.exp %99 : vector<2x256xf32>
    %cst_38 = arith.constant 1.000000e+00 : f32
    %101 = vector.broadcast %cst_38 : f32 to vector<2x256xf32>
    %102 = arith.addf %101, %100 : vector<2x256xf32>
    %103 = arith.divf %101, %102 : vector<2x256xf32>
    %104 = vector.extract_strided_slice %103 {offsets = [0, 0], sizes = [2, 128], strides = [1, 1]} : vector<2x256xf32> to vector<2x128xf32>
    %105 = vector.extract_strided_slice %103 {offsets = [0, 128], sizes = [2, 128], strides = [1, 1]} : vector<2x256xf32> to vector<2x128xf32>
    %106 = vector.extract_strided_slice %93 {offsets = [0, 256], sizes = [2, 128], strides = [1, 1]} : vector<2x384xf32> to vector<2x128xf32>
    %107 = vector.extract_strided_slice %95 {offsets = [0, 256], sizes = [2, 128], strides = [1, 1]} : vector<2x384xf32> to vector<2x128xf32>
    %108 = vector.broadcast %4 : vector<1x128xf32> to vector<2x128xf32>
    %109 = arith.addf %107, %108 : vector<2x128xf32>
    %110 = arith.mulf %104, %109 : vector<2x128xf32>
    %111 = arith.addf %106, %110 : vector<2x128xf32>
    %112 = math.tanh %111 : vector<2x128xf32>
    %cst_39 = arith.constant 1.000000e+00 : f32
    %113 = vector.broadcast %cst_39 : f32 to vector<2x128xf32>
    %114 = arith.subf %113, %105 : vector<2x128xf32>
    %115 = arith.mulf %114, %112 : vector<2x128xf32>
    %116 = arith.mulf %105, %62 : vector<2x128xf32>
    %117 = arith.addf %115, %116 : vector<2x128xf32>
    %c2_i32 = arith.constant 2 : i32
    %118 = arith.index_cast %c2_i32 : i32 to index
    %c0_40 = arith.constant 0 : index
    %c0_41 = arith.constant 0 : index
    %119 = vector.load %arg1[%118, %c0_40, %c0_41] : memref<8x2x384xf32, #tpu.memory_space<vmem>>, vector<1x2x384xf32>
    %120 = vector.shape_cast %119 : vector<1x2x384xf32> to vector<2x384xf32>
    %c0_42 = arith.constant 0 : index
    %c0_43 = arith.constant 0 : index
    %121 = vector.load %arg2[%c0_42, %c0_43] : memref<128x384xf32, #tpu.memory_space<vmem>>, vector<128x384xf32>
    %cst_44 = arith.constant dense<0.000000e+00> : vector<2x384xf32>
    %122 = tpu.matmul %89, %121, %cst_44 {dimension_numbers = #tpu.dot_dimension_numbers<[1], [0], [0], [1], [0, 0, 1, 1], [], []>} : vector<2x128xf32>, vector<128x384xf32>, vector<2x384xf32> -> vector<2x384xf32>
    %123 = vector.extract_strided_slice %120 {offsets = [0, 0], sizes = [2, 256], strides = [1, 1]} : vector<2x384xf32> to vector<2x256xf32>
    %124 = vector.extract_strided_slice %122 {offsets = [0, 0], sizes = [2, 256], strides = [1, 1]} : vector<2x384xf32> to vector<2x256xf32>
    %125 = arith.addf %123, %124 : vector<2x256xf32>
    %126 = arith.negf %125 : vector<2x256xf32>
    %127 = math.exp %126 : vector<2x256xf32>
    %cst_45 = arith.constant 1.000000e+00 : f32
    %128 = vector.broadcast %cst_45 : f32 to vector<2x256xf32>
    %129 = arith.addf %128, %127 : vector<2x256xf32>
    %130 = arith.divf %128, %129 : vector<2x256xf32>
    %131 = vector.extract_strided_slice %130 {offsets = [0, 0], sizes = [2, 128], strides = [1, 1]} : vector<2x256xf32> to vector<2x128xf32>
    %132 = vector.extract_strided_slice %130 {offsets = [0, 128], sizes = [2, 128], strides = [1, 1]} : vector<2x256xf32> to vector<2x128xf32>
    %133 = vector.extract_strided_slice %120 {offsets = [0, 256], sizes = [2, 128], strides = [1, 1]} : vector<2x384xf32> to vector<2x128xf32>
    %134 = vector.extract_strided_slice %122 {offsets = [0, 256], sizes = [2, 128], strides = [1, 1]} : vector<2x384xf32> to vector<2x128xf32>
    %135 = vector.broadcast %3 : vector<1x128xf32> to vector<2x128xf32>
    %136 = arith.addf %134, %135 : vector<2x128xf32>
    %137 = arith.mulf %131, %136 : vector<2x128xf32>
    %138 = arith.addf %133, %137 : vector<2x128xf32>
    %139 = math.tanh %138 : vector<2x128xf32>
    %cst_46 = arith.constant 1.000000e+00 : f32
    %140 = vector.broadcast %cst_46 : f32 to vector<2x128xf32>
    %141 = arith.subf %140, %132 : vector<2x128xf32>
    %142 = arith.mulf %141, %139 : vector<2x128xf32>
    %143 = arith.mulf %132, %89 : vector<2x128xf32>
    %144 = arith.addf %142, %143 : vector<2x128xf32>
    %c0_47 = arith.constant 0 : index
    %c0_48 = arith.constant 0 : index
    %145 = vector.load %arg4[%c0_47, %c0_48] : memref<128x384xf32, #tpu.memory_space<vmem>>, vector<128x384xf32>
    %cst_49 = arith.constant dense<0.000000e+00> : vector<2x384xf32>
    %146 = tpu.matmul %144, %145, %cst_49 {dimension_numbers = #tpu.dot_dimension_numbers<[1], [0], [0], [1], [0, 0, 1, 1], [], []>} : vector<2x128xf32>, vector<128x384xf32>, vector<2x384xf32> -> vector<2x384xf32>
    %147 = vector.broadcast %5 : vector<1x384xf32> to vector<2x384xf32>
    %148 = arith.addf %146, %147 : vector<2x384xf32>
    %c0_50 = arith.constant 0 : index
    %c0_51 = arith.constant 0 : index
    %149 = vector.load %arg6[%c0_50, %c0_51] : memref<128x384xf32, #tpu.memory_space<vmem>>, vector<128x384xf32>
    %cst_52 = arith.constant dense<0.000000e+00> : vector<2x384xf32>
    %150 = tpu.matmul %117, %149, %cst_52 {dimension_numbers = #tpu.dot_dimension_numbers<[1], [0], [0], [1], [0, 0, 1, 1], [], []>} : vector<2x128xf32>, vector<128x384xf32>, vector<2x384xf32> -> vector<2x384xf32>
    %151 = vector.extract_strided_slice %148 {offsets = [0, 0], sizes = [2, 256], strides = [1, 1]} : vector<2x384xf32> to vector<2x256xf32>
    %152 = vector.extract_strided_slice %150 {offsets = [0, 0], sizes = [2, 256], strides = [1, 1]} : vector<2x384xf32> to vector<2x256xf32>
    %153 = arith.addf %151, %152 : vector<2x256xf32>
    %154 = arith.negf %153 : vector<2x256xf32>
    %155 = math.exp %154 : vector<2x256xf32>
    %cst_53 = arith.constant 1.000000e+00 : f32
    %156 = vector.broadcast %cst_53 : f32 to vector<2x256xf32>
    %157 = arith.addf %156, %155 : vector<2x256xf32>
    %158 = arith.divf %156, %157 : vector<2x256xf32>
    %159 = vector.extract_strided_slice %158 {offsets = [0, 0], sizes = [2, 128], strides = [1, 1]} : vector<2x256xf32> to vector<2x128xf32>
    %160 = vector.extract_strided_slice %158 {offsets = [0, 128], sizes = [2, 128], strides = [1, 1]} : vector<2x256xf32> to vector<2x128xf32>
    %161 = vector.extract_strided_slice %148 {offsets = [0, 256], sizes = [2, 128], strides = [1, 1]} : vector<2x384xf32> to vector<2x128xf32>
    %162 = vector.extract_strided_slice %150 {offsets = [0, 256], sizes = [2, 128], strides = [1, 1]} : vector<2x384xf32> to vector<2x128xf32>
    %163 = vector.broadcast %4 : vector<1x128xf32> to vector<2x128xf32>
    %164 = arith.addf %162, %163 : vector<2x128xf32>
    %165 = arith.mulf %159, %164 : vector<2x128xf32>
    %166 = arith.addf %161, %165 : vector<2x128xf32>
    %167 = math.tanh %166 : vector<2x128xf32>
    %cst_54 = arith.constant 1.000000e+00 : f32
    %168 = vector.broadcast %cst_54 : f32 to vector<2x128xf32>
    %169 = arith.subf %168, %160 : vector<2x128xf32>
    %170 = arith.mulf %169, %167 : vector<2x128xf32>
    %171 = arith.mulf %160, %117 : vector<2x128xf32>
    %172 = arith.addf %170, %171 : vector<2x128xf32>
    %c3_i32 = arith.constant 3 : i32
    %173 = arith.index_cast %c3_i32 : i32 to index
    %c0_55 = arith.constant 0 : index
    %c0_56 = arith.constant 0 : index
    %174 = vector.load %arg1[%173, %c0_55, %c0_56] : memref<8x2x384xf32, #tpu.memory_space<vmem>>, vector<1x2x384xf32>
    %175 = vector.shape_cast %174 : vector<1x2x384xf32> to vector<2x384xf32>
    %c0_57 = arith.constant 0 : index
    %c0_58 = arith.constant 0 : index
    %176 = vector.load %arg2[%c0_57, %c0_58] : memref<128x384xf32, #tpu.memory_space<vmem>>, vector<128x384xf32>
    %cst_59 = arith.constant dense<0.000000e+00> : vector<2x384xf32>
    %177 = tpu.matmul %144, %176, %cst_59 {dimension_numbers = #tpu.dot_dimension_numbers<[1], [0], [0], [1], [0, 0, 1, 1], [], []>} : vector<2x128xf32>, vector<128x384xf32>, vector<2x384xf32> -> vector<2x384xf32>
    %178 = vector.extract_strided_slice %175 {offsets = [0, 0], sizes = [2, 256], strides = [1, 1]} : vector<2x384xf32> to vector<2x256xf32>
    %179 = vector.extract_strided_slice %177 {offsets = [0, 0], sizes = [2, 256], strides = [1, 1]} : vector<2x384xf32> to vector<2x256xf32>
    %180 = arith.addf %178, %179 : vector<2x256xf32>
    %181 = arith.negf %180 : vector<2x256xf32>
    %182 = math.exp %181 : vector<2x256xf32>
    %cst_60 = arith.constant 1.000000e+00 : f32
    %183 = vector.broadcast %cst_60 : f32 to vector<2x256xf32>
    %184 = arith.addf %183, %182 : vector<2x256xf32>
    %185 = arith.divf %183, %184 : vector<2x256xf32>
    %186 = vector.extract_strided_slice %185 {offsets = [0, 0], sizes = [2, 128], strides = [1, 1]} : vector<2x256xf32> to vector<2x128xf32>
    %187 = vector.extract_strided_slice %185 {offsets = [0, 128], sizes = [2, 128], strides = [1, 1]} : vector<2x256xf32> to vector<2x128xf32>
    %188 = vector.extract_strided_slice %175 {offsets = [0, 256], sizes = [2, 128], strides = [1, 1]} : vector<2x384xf32> to vector<2x128xf32>
    %189 = vector.extract_strided_slice %177 {offsets = [0, 256], sizes = [2, 128], strides = [1, 1]} : vector<2x384xf32> to vector<2x128xf32>
    %190 = vector.broadcast %3 : vector<1x128xf32> to vector<2x128xf32>
    %191 = arith.addf %189, %190 : vector<2x128xf32>
    %192 = arith.mulf %186, %191 : vector<2x128xf32>
    %193 = arith.addf %188, %192 : vector<2x128xf32>
    %194 = math.tanh %193 : vector<2x128xf32>
    %cst_61 = arith.constant 1.000000e+00 : f32
    %195 = vector.broadcast %cst_61 : f32 to vector<2x128xf32>
    %196 = arith.subf %195, %187 : vector<2x128xf32>
    %197 = arith.mulf %196, %194 : vector<2x128xf32>
    %198 = arith.mulf %187, %144 : vector<2x128xf32>
    %199 = arith.addf %197, %198 : vector<2x128xf32>
    %c0_62 = arith.constant 0 : index
    %c0_63 = arith.constant 0 : index
    %200 = vector.load %arg4[%c0_62, %c0_63] : memref<128x384xf32, #tpu.memory_space<vmem>>, vector<128x384xf32>
    %cst_64 = arith.constant dense<0.000000e+00> : vector<2x384xf32>
    %201 = tpu.matmul %199, %200, %cst_64 {dimension_numbers = #tpu.dot_dimension_numbers<[1], [0], [0], [1], [0, 0, 1, 1], [], []>} : vector<2x128xf32>, vector<128x384xf32>, vector<2x384xf32> -> vector<2x384xf32>
    %202 = vector.broadcast %5 : vector<1x384xf32> to vector<2x384xf32>
    %203 = arith.addf %201, %202 : vector<2x384xf32>
    %c0_65 = arith.constant 0 : index
    %c0_66 = arith.constant 0 : index
    %204 = vector.load %arg6[%c0_65, %c0_66] : memref<128x384xf32, #tpu.memory_space<vmem>>, vector<128x384xf32>
    %cst_67 = arith.constant dense<0.000000e+00> : vector<2x384xf32>
    %205 = tpu.matmul %172, %204, %cst_67 {dimension_numbers = #tpu.dot_dimension_numbers<[1], [0], [0], [1], [0, 0, 1, 1], [], []>} : vector<2x128xf32>, vector<128x384xf32>, vector<2x384xf32> -> vector<2x384xf32>
    %206 = vector.extract_strided_slice %203 {offsets = [0, 0], sizes = [2, 256], strides = [1, 1]} : vector<2x384xf32> to vector<2x256xf32>
    %207 = vector.extract_strided_slice %205 {offsets = [0, 0], sizes = [2, 256], strides = [1, 1]} : vector<2x384xf32> to vector<2x256xf32>
    %208 = arith.addf %206, %207 : vector<2x256xf32>
    %209 = arith.negf %208 : vector<2x256xf32>
    %210 = math.exp %209 : vector<2x256xf32>
    %cst_68 = arith.constant 1.000000e+00 : f32
    %211 = vector.broadcast %cst_68 : f32 to vector<2x256xf32>
    %212 = arith.addf %211, %210 : vector<2x256xf32>
    %213 = arith.divf %211, %212 : vector<2x256xf32>
    %214 = vector.extract_strided_slice %213 {offsets = [0, 0], sizes = [2, 128], strides = [1, 1]} : vector<2x256xf32> to vector<2x128xf32>
    %215 = vector.extract_strided_slice %213 {offsets = [0, 128], sizes = [2, 128], strides = [1, 1]} : vector<2x256xf32> to vector<2x128xf32>
    %216 = vector.extract_strided_slice %203 {offsets = [0, 256], sizes = [2, 128], strides = [1, 1]} : vector<2x384xf32> to vector<2x128xf32>
    %217 = vector.extract_strided_slice %205 {offsets = [0, 256], sizes = [2, 128], strides = [1, 1]} : vector<2x384xf32> to vector<2x128xf32>
    %218 = vector.broadcast %4 : vector<1x128xf32> to vector<2x128xf32>
    %219 = arith.addf %217, %218 : vector<2x128xf32>
    %220 = arith.mulf %214, %219 : vector<2x128xf32>
    %221 = arith.addf %216, %220 : vector<2x128xf32>
    %222 = math.tanh %221 : vector<2x128xf32>
    %cst_69 = arith.constant 1.000000e+00 : f32
    %223 = vector.broadcast %cst_69 : f32 to vector<2x128xf32>
    %224 = arith.subf %223, %215 : vector<2x128xf32>
    %225 = arith.mulf %224, %222 : vector<2x128xf32>
    %226 = arith.mulf %215, %172 : vector<2x128xf32>
    %227 = arith.addf %225, %226 : vector<2x128xf32>
    %c4_i32 = arith.constant 4 : i32
    %228 = arith.index_cast %c4_i32 : i32 to index
    %c0_70 = arith.constant 0 : index
    %c0_71 = arith.constant 0 : index
    %229 = vector.load %arg1[%228, %c0_70, %c0_71] : memref<8x2x384xf32, #tpu.memory_space<vmem>>, vector<1x2x384xf32>
    %230 = vector.shape_cast %229 : vector<1x2x384xf32> to vector<2x384xf32>
    %c0_72 = arith.constant 0 : index
    %c0_73 = arith.constant 0 : index
    %231 = vector.load %arg2[%c0_72, %c0_73] : memref<128x384xf32, #tpu.memory_space<vmem>>, vector<128x384xf32>
    %cst_74 = arith.constant dense<0.000000e+00> : vector<2x384xf32>
    %232 = tpu.matmul %199, %231, %cst_74 {dimension_numbers = #tpu.dot_dimension_numbers<[1], [0], [0], [1], [0, 0, 1, 1], [], []>} : vector<2x128xf32>, vector<128x384xf32>, vector<2x384xf32> -> vector<2x384xf32>
    %233 = vector.extract_strided_slice %230 {offsets = [0, 0], sizes = [2, 256], strides = [1, 1]} : vector<2x384xf32> to vector<2x256xf32>
    %234 = vector.extract_strided_slice %232 {offsets = [0, 0], sizes = [2, 256], strides = [1, 1]} : vector<2x384xf32> to vector<2x256xf32>
    %235 = arith.addf %233, %234 : vector<2x256xf32>
    %236 = arith.negf %235 : vector<2x256xf32>
    %237 = math.exp %236 : vector<2x256xf32>
    %cst_75 = arith.constant 1.000000e+00 : f32
    %238 = vector.broadcast %cst_75 : f32 to vector<2x256xf32>
    %239 = arith.addf %238, %237 : vector<2x256xf32>
    %240 = arith.divf %238, %239 : vector<2x256xf32>
    %241 = vector.extract_strided_slice %240 {offsets = [0, 0], sizes = [2, 128], strides = [1, 1]} : vector<2x256xf32> to vector<2x128xf32>
    %242 = vector.extract_strided_slice %240 {offsets = [0, 128], sizes = [2, 128], strides = [1, 1]} : vector<2x256xf32> to vector<2x128xf32>
    %243 = vector.extract_strided_slice %230 {offsets = [0, 256], sizes = [2, 128], strides = [1, 1]} : vector<2x384xf32> to vector<2x128xf32>
    %244 = vector.extract_strided_slice %232 {offsets = [0, 256], sizes = [2, 128], strides = [1, 1]} : vector<2x384xf32> to vector<2x128xf32>
    %245 = vector.broadcast %3 : vector<1x128xf32> to vector<2x128xf32>
    %246 = arith.addf %244, %245 : vector<2x128xf32>
    %247 = arith.mulf %241, %246 : vector<2x128xf32>
    %248 = arith.addf %243, %247 : vector<2x128xf32>
    %249 = math.tanh %248 : vector<2x128xf32>
    %cst_76 = arith.constant 1.000000e+00 : f32
    %250 = vector.broadcast %cst_76 : f32 to vector<2x128xf32>
    %251 = arith.subf %250, %242 : vector<2x128xf32>
    %252 = arith.mulf %251, %249 : vector<2x128xf32>
    %253 = arith.mulf %242, %199 : vector<2x128xf32>
    %254 = arith.addf %252, %253 : vector<2x128xf32>
    %c0_77 = arith.constant 0 : index
    %c0_78 = arith.constant 0 : index
    %255 = vector.load %arg4[%c0_77, %c0_78] : memref<128x384xf32, #tpu.memory_space<vmem>>, vector<128x384xf32>
    %cst_79 = arith.constant dense<0.000000e+00> : vector<2x384xf32>
    %256 = tpu.matmul %254, %255, %cst_79 {dimension_numbers = #tpu.dot_dimension_numbers<[1], [0], [0], [1], [0, 0, 1, 1], [], []>} : vector<2x128xf32>, vector<128x384xf32>, vector<2x384xf32> -> vector<2x384xf32>
    %257 = vector.broadcast %5 : vector<1x384xf32> to vector<2x384xf32>
    %258 = arith.addf %256, %257 : vector<2x384xf32>
    %c0_80 = arith.constant 0 : index
    %c0_81 = arith.constant 0 : index
    %259 = vector.load %arg6[%c0_80, %c0_81] : memref<128x384xf32, #tpu.memory_space<vmem>>, vector<128x384xf32>
    %cst_82 = arith.constant dense<0.000000e+00> : vector<2x384xf32>
    %260 = tpu.matmul %227, %259, %cst_82 {dimension_numbers = #tpu.dot_dimension_numbers<[1], [0], [0], [1], [0, 0, 1, 1], [], []>} : vector<2x128xf32>, vector<128x384xf32>, vector<2x384xf32> -> vector<2x384xf32>
    %261 = vector.extract_strided_slice %258 {offsets = [0, 0], sizes = [2, 256], strides = [1, 1]} : vector<2x384xf32> to vector<2x256xf32>
    %262 = vector.extract_strided_slice %260 {offsets = [0, 0], sizes = [2, 256], strides = [1, 1]} : vector<2x384xf32> to vector<2x256xf32>
    %263 = arith.addf %261, %262 : vector<2x256xf32>
    %264 = arith.negf %263 : vector<2x256xf32>
    %265 = math.exp %264 : vector<2x256xf32>
    %cst_83 = arith.constant 1.000000e+00 : f32
    %266 = vector.broadcast %cst_83 : f32 to vector<2x256xf32>
    %267 = arith.addf %266, %265 : vector<2x256xf32>
    %268 = arith.divf %266, %267 : vector<2x256xf32>
    %269 = vector.extract_strided_slice %268 {offsets = [0, 0], sizes = [2, 128], strides = [1, 1]} : vector<2x256xf32> to vector<2x128xf32>
    %270 = vector.extract_strided_slice %268 {offsets = [0, 128], sizes = [2, 128], strides = [1, 1]} : vector<2x256xf32> to vector<2x128xf32>
    %271 = vector.extract_strided_slice %258 {offsets = [0, 256], sizes = [2, 128], strides = [1, 1]} : vector<2x384xf32> to vector<2x128xf32>
    %272 = vector.extract_strided_slice %260 {offsets = [0, 256], sizes = [2, 128], strides = [1, 1]} : vector<2x384xf32> to vector<2x128xf32>
    %273 = vector.broadcast %4 : vector<1x128xf32> to vector<2x128xf32>
    %274 = arith.addf %272, %273 : vector<2x128xf32>
    %275 = arith.mulf %269, %274 : vector<2x128xf32>
    %276 = arith.addf %271, %275 : vector<2x128xf32>
    %277 = math.tanh %276 : vector<2x128xf32>
    %cst_84 = arith.constant 1.000000e+00 : f32
    %278 = vector.broadcast %cst_84 : f32 to vector<2x128xf32>
    %279 = arith.subf %278, %270 : vector<2x128xf32>
    %280 = arith.mulf %279, %277 : vector<2x128xf32>
    %281 = arith.mulf %270, %227 : vector<2x128xf32>
    %282 = arith.addf %280, %281 : vector<2x128xf32>
    %c5_i32 = arith.constant 5 : i32
    %283 = arith.index_cast %c5_i32 : i32 to index
    %c0_85 = arith.constant 0 : index
    %c0_86 = arith.constant 0 : index
    %284 = vector.load %arg1[%283, %c0_85, %c0_86] : memref<8x2x384xf32, #tpu.memory_space<vmem>>, vector<1x2x384xf32>
    %285 = vector.shape_cast %284 : vector<1x2x384xf32> to vector<2x384xf32>
    %c0_87 = arith.constant 0 : index
    %c0_88 = arith.constant 0 : index
    %286 = vector.load %arg2[%c0_87, %c0_88] : memref<128x384xf32, #tpu.memory_space<vmem>>, vector<128x384xf32>
    %cst_89 = arith.constant dense<0.000000e+00> : vector<2x384xf32>
    %287 = tpu.matmul %254, %286, %cst_89 {dimension_numbers = #tpu.dot_dimension_numbers<[1], [0], [0], [1], [0, 0, 1, 1], [], []>} : vector<2x128xf32>, vector<128x384xf32>, vector<2x384xf32> -> vector<2x384xf32>
    %288 = vector.extract_strided_slice %285 {offsets = [0, 0], sizes = [2, 256], strides = [1, 1]} : vector<2x384xf32> to vector<2x256xf32>
    %289 = vector.extract_strided_slice %287 {offsets = [0, 0], sizes = [2, 256], strides = [1, 1]} : vector<2x384xf32> to vector<2x256xf32>
    %290 = arith.addf %288, %289 : vector<2x256xf32>
    %291 = arith.negf %290 : vector<2x256xf32>
    %292 = math.exp %291 : vector<2x256xf32>
    %cst_90 = arith.constant 1.000000e+00 : f32
    %293 = vector.broadcast %cst_90 : f32 to vector<2x256xf32>
    %294 = arith.addf %293, %292 : vector<2x256xf32>
    %295 = arith.divf %293, %294 : vector<2x256xf32>
    %296 = vector.extract_strided_slice %295 {offsets = [0, 0], sizes = [2, 128], strides = [1, 1]} : vector<2x256xf32> to vector<2x128xf32>
    %297 = vector.extract_strided_slice %295 {offsets = [0, 128], sizes = [2, 128], strides = [1, 1]} : vector<2x256xf32> to vector<2x128xf32>
    %298 = vector.extract_strided_slice %285 {offsets = [0, 256], sizes = [2, 128], strides = [1, 1]} : vector<2x384xf32> to vector<2x128xf32>
    %299 = vector.extract_strided_slice %287 {offsets = [0, 256], sizes = [2, 128], strides = [1, 1]} : vector<2x384xf32> to vector<2x128xf32>
    %300 = vector.broadcast %3 : vector<1x128xf32> to vector<2x128xf32>
    %301 = arith.addf %299, %300 : vector<2x128xf32>
    %302 = arith.mulf %296, %301 : vector<2x128xf32>
    %303 = arith.addf %298, %302 : vector<2x128xf32>
    %304 = math.tanh %303 : vector<2x128xf32>
    %cst_91 = arith.constant 1.000000e+00 : f32
    %305 = vector.broadcast %cst_91 : f32 to vector<2x128xf32>
    %306 = arith.subf %305, %297 : vector<2x128xf32>
    %307 = arith.mulf %306, %304 : vector<2x128xf32>
    %308 = arith.mulf %297, %254 : vector<2x128xf32>
    %309 = arith.addf %307, %308 : vector<2x128xf32>
    %c0_92 = arith.constant 0 : index
    %c0_93 = arith.constant 0 : index
    %310 = vector.load %arg4[%c0_92, %c0_93] : memref<128x384xf32, #tpu.memory_space<vmem>>, vector<128x384xf32>
    %cst_94 = arith.constant dense<0.000000e+00> : vector<2x384xf32>
    %311 = tpu.matmul %309, %310, %cst_94 {dimension_numbers = #tpu.dot_dimension_numbers<[1], [0], [0], [1], [0, 0, 1, 1], [], []>} : vector<2x128xf32>, vector<128x384xf32>, vector<2x384xf32> -> vector<2x384xf32>
    %312 = vector.broadcast %5 : vector<1x384xf32> to vector<2x384xf32>
    %313 = arith.addf %311, %312 : vector<2x384xf32>
    %c0_95 = arith.constant 0 : index
    %c0_96 = arith.constant 0 : index
    %314 = vector.load %arg6[%c0_95, %c0_96] : memref<128x384xf32, #tpu.memory_space<vmem>>, vector<128x384xf32>
    %cst_97 = arith.constant dense<0.000000e+00> : vector<2x384xf32>
    %315 = tpu.matmul %282, %314, %cst_97 {dimension_numbers = #tpu.dot_dimension_numbers<[1], [0], [0], [1], [0, 0, 1, 1], [], []>} : vector<2x128xf32>, vector<128x384xf32>, vector<2x384xf32> -> vector<2x384xf32>
    %316 = vector.extract_strided_slice %313 {offsets = [0, 0], sizes = [2, 256], strides = [1, 1]} : vector<2x384xf32> to vector<2x256xf32>
    %317 = vector.extract_strided_slice %315 {offsets = [0, 0], sizes = [2, 256], strides = [1, 1]} : vector<2x384xf32> to vector<2x256xf32>
    %318 = arith.addf %316, %317 : vector<2x256xf32>
    %319 = arith.negf %318 : vector<2x256xf32>
    %320 = math.exp %319 : vector<2x256xf32>
    %cst_98 = arith.constant 1.000000e+00 : f32
    %321 = vector.broadcast %cst_98 : f32 to vector<2x256xf32>
    %322 = arith.addf %321, %320 : vector<2x256xf32>
    %323 = arith.divf %321, %322 : vector<2x256xf32>
    %324 = vector.extract_strided_slice %323 {offsets = [0, 0], sizes = [2, 128], strides = [1, 1]} : vector<2x256xf32> to vector<2x128xf32>
    %325 = vector.extract_strided_slice %323 {offsets = [0, 128], sizes = [2, 128], strides = [1, 1]} : vector<2x256xf32> to vector<2x128xf32>
    %326 = vector.extract_strided_slice %313 {offsets = [0, 256], sizes = [2, 128], strides = [1, 1]} : vector<2x384xf32> to vector<2x128xf32>
    %327 = vector.extract_strided_slice %315 {offsets = [0, 256], sizes = [2, 128], strides = [1, 1]} : vector<2x384xf32> to vector<2x128xf32>
    %328 = vector.broadcast %4 : vector<1x128xf32> to vector<2x128xf32>
    %329 = arith.addf %327, %328 : vector<2x128xf32>
    %330 = arith.mulf %324, %329 : vector<2x128xf32>
    %331 = arith.addf %326, %330 : vector<2x128xf32>
    %332 = math.tanh %331 : vector<2x128xf32>
    %cst_99 = arith.constant 1.000000e+00 : f32
    %333 = vector.broadcast %cst_99 : f32 to vector<2x128xf32>
    %334 = arith.subf %333, %325 : vector<2x128xf32>
    %335 = arith.mulf %334, %332 : vector<2x128xf32>
    %336 = arith.mulf %325, %282 : vector<2x128xf32>
    %337 = arith.addf %335, %336 : vector<2x128xf32>
    %c6_i32 = arith.constant 6 : i32
    %338 = arith.index_cast %c6_i32 : i32 to index
    %c0_100 = arith.constant 0 : index
    %c0_101 = arith.constant 0 : index
    %339 = vector.load %arg1[%338, %c0_100, %c0_101] : memref<8x2x384xf32, #tpu.memory_space<vmem>>, vector<1x2x384xf32>
    %340 = vector.shape_cast %339 : vector<1x2x384xf32> to vector<2x384xf32>
    %c0_102 = arith.constant 0 : index
    %c0_103 = arith.constant 0 : index
    %341 = vector.load %arg2[%c0_102, %c0_103] : memref<128x384xf32, #tpu.memory_space<vmem>>, vector<128x384xf32>
    %cst_104 = arith.constant dense<0.000000e+00> : vector<2x384xf32>
    %342 = tpu.matmul %309, %341, %cst_104 {dimension_numbers = #tpu.dot_dimension_numbers<[1], [0], [0], [1], [0, 0, 1, 1], [], []>} : vector<2x128xf32>, vector<128x384xf32>, vector<2x384xf32> -> vector<2x384xf32>
    %343 = vector.extract_strided_slice %340 {offsets = [0, 0], sizes = [2, 256], strides = [1, 1]} : vector<2x384xf32> to vector<2x256xf32>
    %344 = vector.extract_strided_slice %342 {offsets = [0, 0], sizes = [2, 256], strides = [1, 1]} : vector<2x384xf32> to vector<2x256xf32>
    %345 = arith.addf %343, %344 : vector<2x256xf32>
    %346 = arith.negf %345 : vector<2x256xf32>
    %347 = math.exp %346 : vector<2x256xf32>
    %cst_105 = arith.constant 1.000000e+00 : f32
    %348 = vector.broadcast %cst_105 : f32 to vector<2x256xf32>
    %349 = arith.addf %348, %347 : vector<2x256xf32>
    %350 = arith.divf %348, %349 : vector<2x256xf32>
    %351 = vector.extract_strided_slice %350 {offsets = [0, 0], sizes = [2, 128], strides = [1, 1]} : vector<2x256xf32> to vector<2x128xf32>
    %352 = vector.extract_strided_slice %350 {offsets = [0, 128], sizes = [2, 128], strides = [1, 1]} : vector<2x256xf32> to vector<2x128xf32>
    %353 = vector.extract_strided_slice %340 {offsets = [0, 256], sizes = [2, 128], strides = [1, 1]} : vector<2x384xf32> to vector<2x128xf32>
    %354 = vector.extract_strided_slice %342 {offsets = [0, 256], sizes = [2, 128], strides = [1, 1]} : vector<2x384xf32> to vector<2x128xf32>
    %355 = vector.broadcast %3 : vector<1x128xf32> to vector<2x128xf32>
    %356 = arith.addf %354, %355 : vector<2x128xf32>
    %357 = arith.mulf %351, %356 : vector<2x128xf32>
    %358 = arith.addf %353, %357 : vector<2x128xf32>
    %359 = math.tanh %358 : vector<2x128xf32>
    %cst_106 = arith.constant 1.000000e+00 : f32
    %360 = vector.broadcast %cst_106 : f32 to vector<2x128xf32>
    %361 = arith.subf %360, %352 : vector<2x128xf32>
    %362 = arith.mulf %361, %359 : vector<2x128xf32>
    %363 = arith.mulf %352, %309 : vector<2x128xf32>
    %364 = arith.addf %362, %363 : vector<2x128xf32>
    %c0_107 = arith.constant 0 : index
    %c0_108 = arith.constant 0 : index
    %365 = vector.load %arg4[%c0_107, %c0_108] : memref<128x384xf32, #tpu.memory_space<vmem>>, vector<128x384xf32>
    %cst_109 = arith.constant dense<0.000000e+00> : vector<2x384xf32>
    %366 = tpu.matmul %364, %365, %cst_109 {dimension_numbers = #tpu.dot_dimension_numbers<[1], [0], [0], [1], [0, 0, 1, 1], [], []>} : vector<2x128xf32>, vector<128x384xf32>, vector<2x384xf32> -> vector<2x384xf32>
    %367 = vector.broadcast %5 : vector<1x384xf32> to vector<2x384xf32>
    %368 = arith.addf %366, %367 : vector<2x384xf32>
    %c0_110 = arith.constant 0 : index
    %c0_111 = arith.constant 0 : index
    %369 = vector.load %arg6[%c0_110, %c0_111] : memref<128x384xf32, #tpu.memory_space<vmem>>, vector<128x384xf32>
    %cst_112 = arith.constant dense<0.000000e+00> : vector<2x384xf32>
    %370 = tpu.matmul %337, %369, %cst_112 {dimension_numbers = #tpu.dot_dimension_numbers<[1], [0], [0], [1], [0, 0, 1, 1], [], []>} : vector<2x128xf32>, vector<128x384xf32>, vector<2x384xf32> -> vector<2x384xf32>
    %371 = vector.extract_strided_slice %368 {offsets = [0, 0], sizes = [2, 256], strides = [1, 1]} : vector<2x384xf32> to vector<2x256xf32>
    %372 = vector.extract_strided_slice %370 {offsets = [0, 0], sizes = [2, 256], strides = [1, 1]} : vector<2x384xf32> to vector<2x256xf32>
    %373 = arith.addf %371, %372 : vector<2x256xf32>
    %374 = arith.negf %373 : vector<2x256xf32>
    %375 = math.exp %374 : vector<2x256xf32>
    %cst_113 = arith.constant 1.000000e+00 : f32
    %376 = vector.broadcast %cst_113 : f32 to vector<2x256xf32>
    %377 = arith.addf %376, %375 : vector<2x256xf32>
    %378 = arith.divf %376, %377 : vector<2x256xf32>
    %379 = vector.extract_strided_slice %378 {offsets = [0, 0], sizes = [2, 128], strides = [1, 1]} : vector<2x256xf32> to vector<2x128xf32>
    %380 = vector.extract_strided_slice %378 {offsets = [0, 128], sizes = [2, 128], strides = [1, 1]} : vector<2x256xf32> to vector<2x128xf32>
    %381 = vector.extract_strided_slice %368 {offsets = [0, 256], sizes = [2, 128], strides = [1, 1]} : vector<2x384xf32> to vector<2x128xf32>
    %382 = vector.extract_strided_slice %370 {offsets = [0, 256], sizes = [2, 128], strides = [1, 1]} : vector<2x384xf32> to vector<2x128xf32>
    %383 = vector.broadcast %4 : vector<1x128xf32> to vector<2x128xf32>
    %384 = arith.addf %382, %383 : vector<2x128xf32>
    %385 = arith.mulf %379, %384 : vector<2x128xf32>
    %386 = arith.addf %381, %385 : vector<2x128xf32>
    %387 = math.tanh %386 : vector<2x128xf32>
    %cst_114 = arith.constant 1.000000e+00 : f32
    %388 = vector.broadcast %cst_114 : f32 to vector<2x128xf32>
    %389 = arith.subf %388, %380 : vector<2x128xf32>
    %390 = arith.mulf %389, %387 : vector<2x128xf32>
    %391 = arith.mulf %380, %337 : vector<2x128xf32>
    %392 = arith.addf %390, %391 : vector<2x128xf32>
    %c7_i32 = arith.constant 7 : i32
    %393 = arith.index_cast %c7_i32 : i32 to index
    %c0_115 = arith.constant 0 : index
    %c0_116 = arith.constant 0 : index
    %394 = vector.load %arg1[%393, %c0_115, %c0_116] : memref<8x2x384xf32, #tpu.memory_space<vmem>>, vector<1x2x384xf32>
    %395 = vector.shape_cast %394 : vector<1x2x384xf32> to vector<2x384xf32>
    %c0_117 = arith.constant 0 : index
    %c0_118 = arith.constant 0 : index
    %396 = vector.load %arg2[%c0_117, %c0_118] : memref<128x384xf32, #tpu.memory_space<vmem>>, vector<128x384xf32>
    %cst_119 = arith.constant dense<0.000000e+00> : vector<2x384xf32>
    %397 = tpu.matmul %364, %396, %cst_119 {dimension_numbers = #tpu.dot_dimension_numbers<[1], [0], [0], [1], [0, 0, 1, 1], [], []>} : vector<2x128xf32>, vector<128x384xf32>, vector<2x384xf32> -> vector<2x384xf32>
    %398 = vector.extract_strided_slice %395 {offsets = [0, 0], sizes = [2, 256], strides = [1, 1]} : vector<2x384xf32> to vector<2x256xf32>
    %399 = vector.extract_strided_slice %397 {offsets = [0, 0], sizes = [2, 256], strides = [1, 1]} : vector<2x384xf32> to vector<2x256xf32>
    %400 = arith.addf %398, %399 : vector<2x256xf32>
    %401 = arith.negf %400 : vector<2x256xf32>
    %402 = math.exp %401 : vector<2x256xf32>
    %cst_120 = arith.constant 1.000000e+00 : f32
    %403 = vector.broadcast %cst_120 : f32 to vector<2x256xf32>
    %404 = arith.addf %403, %402 : vector<2x256xf32>
    %405 = arith.divf %403, %404 : vector<2x256xf32>
    %406 = vector.extract_strided_slice %405 {offsets = [0, 0], sizes = [2, 128], strides = [1, 1]} : vector<2x256xf32> to vector<2x128xf32>
    %407 = vector.extract_strided_slice %405 {offsets = [0, 128], sizes = [2, 128], strides = [1, 1]} : vector<2x256xf32> to vector<2x128xf32>
    %408 = vector.extract_strided_slice %395 {offsets = [0, 256], sizes = [2, 128], strides = [1, 1]} : vector<2x384xf32> to vector<2x128xf32>
    %409 = vector.extract_strided_slice %397 {offsets = [0, 256], sizes = [2, 128], strides = [1, 1]} : vector<2x384xf32> to vector<2x128xf32>
    %410 = vector.broadcast %3 : vector<1x128xf32> to vector<2x128xf32>
    %411 = arith.addf %409, %410 : vector<2x128xf32>
    %412 = arith.mulf %406, %411 : vector<2x128xf32>
    %413 = arith.addf %408, %412 : vector<2x128xf32>
    %414 = math.tanh %413 : vector<2x128xf32>
    %cst_121 = arith.constant 1.000000e+00 : f32
    %415 = vector.broadcast %cst_121 : f32 to vector<2x128xf32>
    %416 = arith.subf %415, %407 : vector<2x128xf32>
    %417 = arith.mulf %416, %414 : vector<2x128xf32>
    %418 = arith.mulf %407, %364 : vector<2x128xf32>
    %419 = arith.addf %417, %418 : vector<2x128xf32>
    %c0_122 = arith.constant 0 : index
    %c0_123 = arith.constant 0 : index
    %420 = vector.load %arg4[%c0_122, %c0_123] : memref<128x384xf32, #tpu.memory_space<vmem>>, vector<128x384xf32>
    %cst_124 = arith.constant dense<0.000000e+00> : vector<2x384xf32>
    %421 = tpu.matmul %419, %420, %cst_124 {dimension_numbers = #tpu.dot_dimension_numbers<[1], [0], [0], [1], [0, 0, 1, 1], [], []>} : vector<2x128xf32>, vector<128x384xf32>, vector<2x384xf32> -> vector<2x384xf32>
    %422 = vector.broadcast %5 : vector<1x384xf32> to vector<2x384xf32>
    %423 = arith.addf %421, %422 : vector<2x384xf32>
    %c0_125 = arith.constant 0 : index
    %c0_126 = arith.constant 0 : index
    %424 = vector.load %arg6[%c0_125, %c0_126] : memref<128x384xf32, #tpu.memory_space<vmem>>, vector<128x384xf32>
    %cst_127 = arith.constant dense<0.000000e+00> : vector<2x384xf32>
    %425 = tpu.matmul %392, %424, %cst_127 {dimension_numbers = #tpu.dot_dimension_numbers<[1], [0], [0], [1], [0, 0, 1, 1], [], []>} : vector<2x128xf32>, vector<128x384xf32>, vector<2x384xf32> -> vector<2x384xf32>
    %426 = vector.extract_strided_slice %423 {offsets = [0, 0], sizes = [2, 256], strides = [1, 1]} : vector<2x384xf32> to vector<2x256xf32>
    %427 = vector.extract_strided_slice %425 {offsets = [0, 0], sizes = [2, 256], strides = [1, 1]} : vector<2x384xf32> to vector<2x256xf32>
    %428 = arith.addf %426, %427 : vector<2x256xf32>
    %429 = arith.negf %428 : vector<2x256xf32>
    %430 = math.exp %429 : vector<2x256xf32>
    %cst_128 = arith.constant 1.000000e+00 : f32
    %431 = vector.broadcast %cst_128 : f32 to vector<2x256xf32>
    %432 = arith.addf %431, %430 : vector<2x256xf32>
    %433 = arith.divf %431, %432 : vector<2x256xf32>
    %434 = vector.extract_strided_slice %433 {offsets = [0, 0], sizes = [2, 128], strides = [1, 1]} : vector<2x256xf32> to vector<2x128xf32>
    %435 = vector.extract_strided_slice %433 {offsets = [0, 128], sizes = [2, 128], strides = [1, 1]} : vector<2x256xf32> to vector<2x128xf32>
    %436 = vector.extract_strided_slice %423 {offsets = [0, 256], sizes = [2, 128], strides = [1, 1]} : vector<2x384xf32> to vector<2x128xf32>
    %437 = vector.extract_strided_slice %425 {offsets = [0, 256], sizes = [2, 128], strides = [1, 1]} : vector<2x384xf32> to vector<2x128xf32>
    %438 = vector.broadcast %4 : vector<1x128xf32> to vector<2x128xf32>
    %439 = arith.addf %437, %438 : vector<2x128xf32>
    %440 = arith.mulf %434, %439 : vector<2x128xf32>
    %441 = arith.addf %436, %440 : vector<2x128xf32>
    %442 = math.tanh %441 : vector<2x128xf32>
    %cst_129 = arith.constant 1.000000e+00 : f32
    %443 = vector.broadcast %cst_129 : f32 to vector<2x128xf32>
    %444 = arith.subf %443, %435 : vector<2x128xf32>
    %445 = arith.mulf %444, %442 : vector<2x128xf32>
    %446 = arith.mulf %435, %392 : vector<2x128xf32>
    %447 = arith.addf %445, %446 : vector<2x128xf32>
    %c8_i32 = arith.constant 8 : i32
    %c0_130 = arith.constant 0 : index
    %c0_131 = arith.constant 0 : index
    %448 = vector.load %arg9[%c0_130, %c0_131] : memref<2x128xf32, #tpu.memory_space<vmem>>, vector<2x128xf32>
    tpu.vector_store %arg9[%c0_130, %c0_131], %419 {strides = array<i32>} : memref<2x128xf32, #tpu.memory_space<vmem>>, vector<2x128xf32>,
    %c0_132 = arith.constant 0 : index
    %c0_133 = arith.constant 0 : index
    %449 = vector.load %arg8[%c0_132, %c0_133] : memref<2x128xf32, #tpu.memory_space<vmem>>, vector<2x128xf32>
    tpu.vector_store %arg8[%c0_132, %c0_133], %447 {strides = array<i32>} : memref<2x128xf32, #tpu.memory_space<vmem>>, vector<2x128xf32>,
    return
  }
  func.func @transform_0(%arg0: i32) -> (i32, i32, i32) {
    %c0_i32 = arith.constant 0 : i32
    %c0_i32_0 = arith.constant 0 : i32
    %c0_i32_1 = arith.constant 0 : i32
    return %arg0, %c0_i32, %c0_i32_0 : i32, i32, i32
  }
  func.func @transform_1(%arg0: i32) -> (i32, i32) {
    %c0_i32 = arith.constant 0 : i32
    %c0_i32_0 = arith.constant 0 : i32
    %c0_i32_1 = arith.constant 0 : i32
    return %c0_i32, %c0_i32_0 : i32, i32
  }
  func.func @transform_2(%arg0: i32) -> (i32, i32) {
    %c0_i32 = arith.constant 0 : i32
    %c0_i32_0 = arith.constant 0 : i32
    %c0_i32_1 = arith.constant 0 : i32
    return %c0_i32, %c0_i32_0 : i32, i32
  }
  func.func @transform_3(%arg0: i32) -> (i32, i32) {
    %c0_i32 = arith.constant 0 : i32
    %c0_i32_0 = arith.constant 0 : i32
    %c0_i32_1 = arith.constant 0 : i32
    return %c0_i32, %c0_i32_0 : i32, i32
  }
  func.func @transform_4(%arg0: i32) -> (i32, i32) {
    %c0_i32 = arith.constant 0 : i32
    %c0_i32_0 = arith.constant 0 : i32
    %c0_i32_1 = arith.constant 0 : i32
    return %c0_i32, %c0_i32_0 : i32, i32
  }
  func.func @transform_5(%arg0: i32) -> (i32, i32) {
    %c0_i32 = arith.constant 0 : i32
    %c0_i32_0 = arith.constant 0 : i32
    %c0_i32_1 = arith.constant 0 : i32
    return %c0_i32, %c0_i32_0 : i32, i32
  }
  func.func @transform_6(%arg0: i32) -> (i32, i32) {
    %c0_i32 = arith.constant 0 : i32
    %c0_i32_0 = arith.constant 0 : i32
    %c0_i32_1 = arith.constant 0 : i32
    return %c0_i32, %c0_i32_0 : i32, i32
  }
  func.func @transform_7(%arg0: i32) -> (i32, i32) {
    %c0_i32 = arith.constant 0 : i32
    %c0_i32_0 = arith.constant 0 : i32
    %c0_i32_1 = arith.constant 0 : i32
    return %c0_i32, %c0_i32_0 : i32, i32
  }
}

</mosaic_0001>

<bundles_post_ra>
// kernel: speaker_rnn_forward.1
= control target key start
LH: loop header
LB: loop body
LE: loop exit
PB: predicated region body
PF: predicated region fallthrough
CT: control target
= control target key end

     0   :  { %12 = vsyncpa [#allocation4], 0  ;;  %s8257_s0 = inlined_call_operand.vmem [shape: f32[8,2,384], index: 0, kind: input, shape index: {}]   ;;  %s8258_s1 = inlined_call_operand.hbm [shape: f32[128,384], index: 1, kind: input, shape index: {}]   ;;  %s8259_s2 = inlined_call_operand.vmem [shape: f32[1,128], index: 2, kind: input, shape index: {}]   ;;  %s8260_s3 = inlined_call_operand.hbm [shape: f32[128,384], index: 3, kind: input, shape index: {}]   ;;  %s8261_s4 = inlined_call_operand.vmem [shape: f32[1,384], index: 4, kind: input, shape index: {}]   ;;  %s8262_s5 = inlined_call_operand.hbm [shape: f32[128,384], index: 5, kind: input, shape index: {}]   ;;  %s8263_s6 = inlined_call_operand.vmem [shape: f32[1,128], index: 6, kind: input, shape index: {}]   ;;  %s8264_s7 = inlined_call_operand.vmem [shape: f32[2,128], index: 7, kind: output, shape index: {}]  }
   0x1   :  { %13 = vsyncpa [#allocation6], 0  ;;  %s6956_s24 = smov [#allocation5]   ;;  %s6957_s26 = smov [#allocation3]  }
   0x2   :  { %s35_s25 = sshll.u32 %s6956_s24, 4  ;;  %s21_s27 = sshll.u32 %s6957_s26, 4  ;;  %s36_s25 = int_to_ptr.vmem [resolvable:$true] %s35_s25  ;;  %s7005_s27 = int_to_ptr.vmem [resolvable:$true] %s21_s27 }
   0x3   :  { %s6886_s30 = scalar_lea.hbm %s8260_s3, 6144 }
   0x4   :  { %p6887_p0 = scmp.ne.s32.totalorder %s8260_s3, %s6886_s30  ;;  %p6890_p1 = scmp.lt.u32.totalorder %s6886_s30, %s8260_s3 }
   0x6   :  { %p6892_p2 = pnand %p6890_p1, %p6887_p0 }
   0x8   :  { %6895 = shalt.err (!%p6892_p2)
}
   0x9   :  { %s6896_s12 = scalar_lea.vmem %s36_s25, 6144  ;;  %p6901_p4 = scmp.lt.s32.totalorder %s36_s25, %s36_s25 }
   0xa   :  { %p6897_p3 = scmp.ne.s32.totalorder %s36_s25, %s6896_s12  ;;  %p6902_p5 = scmp.lt.s32.totalorder %s6896_s12, %s6896_s12 }
   0xc   :  { %p6903_p6 = por %p6902_p5, %p6901_p4 }
   0xe   :  { %p6904_p7 = pnand %p6903_p6, %p6897_p3 }
  0x10   :  { %6907 = shalt.err (!%p6904_p7)
}
  0x11   :  { %s6958_s13 = smov 384   ;;  %s6959_s14 = smov 24  }
  0x12   :  { %41 = dma.hbm_to_vmem [thread:$0]  %s8260_s3, 6144, %s36_s25, [#allocation6], %s6958_s13, %s6958_s13, %s6959_s14  }
  0x13   :  { %s6908_s19 = scalar_lea.hbm %s8258_s1, 6144 }
  0x14   :  { %p6909_p8 = scmp.ne.s32.totalorder %s8258_s1, %s6908_s19  ;;  %p6912_p9 = scmp.lt.u32.totalorder %s6908_s19, %s8258_s1 }
  0x16   :  { %p6914_p10 = pnand %p6912_p9, %p6909_p8 }
  0x18   :  { %6917 = shalt.err (!%p6914_p10)
}
  0x19   :  { %s6918_s24 = scalar_lea.vmem %s7005_s27, 6144  ;;  %p6923_p12 = scmp.lt.s32.totalorder %s7005_s27, %s7005_s27 }
  0x1a   :  { %p6919_p11 = scmp.ne.s32.totalorder %s7005_s27, %s6918_s24  ;;  %p6924_p13 = scmp.lt.s32.totalorder %s6918_s24, %s6918_s24 }
  0x1c   :  { %p6925_p0 = por %p6924_p13, %p6923_p12 }
  0x1e   :  { %p6926_p1 = pnand %p6925_p0, %p6919_p11 }
  0x20   :  { %6929 = shalt.err (!%p6926_p1)
}
  0x21   :  { %27 = dma.hbm_to_vmem [thread:$0]  %s8258_s1, 6144, %s7005_s27, [#allocation4], %s6958_s13, %s6958_s13, %s6959_s14  }
  0x22   :  { %s6960_s26 = smov [#allocation7]   ;;  %s6930_s8 = scalar_lea.hbm %s8262_s5, 6144 }
  0x23   :  { %s49_s28 = sshll.u32 %s6960_s26, 4  ;;  %p6931_p2 = scmp.ne.s32.totalorder %s8262_s5, %s6930_s8  ;;  %s50_s28 = int_to_ptr.vmem [resolvable:$true] %s49_s28 }
  0x24   :  { %p6934_p3 = scmp.lt.u32.totalorder %s6930_s8, %s8262_s5 }
  0x26   :  { %p6936_p4 = pnand %p6934_p3, %p6931_p2 }
  0x28   :  { %6939 = shalt.err (!%p6936_p4)
}
  0x29   :  { %s6940_s15 = scalar_lea.vmem %s50_s28, 6144  ;;  %p6945_p6 = scmp.lt.s32.totalorder %s50_s28, %s50_s28 }
  0x2a   :  { %p6941_p5 = scmp.ne.s32.totalorder %s50_s28, %s6940_s15  ;;  %p6946_p7 = scmp.lt.s32.totalorder %s6940_s15, %s6940_s15 }
  0x2c   :  { %p6947_p8 = por %p6946_p7, %p6945_p6 }
  0x2e   :  { %p6948_p9 = pnand %p6947_p8, %p6941_p5 }
  0x30   :  { %6951 = shalt.err (!%p6948_p9)
}
  0x31   :  { %55 = dma.hbm_to_vmem [thread:$0]  %s8262_s5, 6144, %s50_s28, [#allocation6], %s6958_s13, %s6958_s13, %s6959_s14  }
  0x32   :  { %6952 = dma.done.wait [#allocation4], 6144  }
  0x33   :  { %6953 = vsyncadd [#allocation4], 4294961152 }
  0x34   :  { %6954 = dma.done.wait [#allocation6], 12288  }
  0x35   :  { %6955 = vsyncadd [#allocation6], 4294955008  ;;  %v8267_v0 = vmov 0.0|0.0   ;;  %v8265_v1 = vmov 0.0   ;;  %vm6963_vm0 = vmmov 0   ;;  %v80_v2 = vld [vmem:[#allocation3 + $0x8] sm:$0xff] }
  0x36   :  { %5402 = vmatprep.subr.bf16.mxu1 %v8267_v0  ;;  %191 = vmatprep.mubr.f32.mxu0 %v8265_v1  ;;  %71 = vst [vmem:[#allocation2] sm:$0x3] %v8265_v1  ;;  %72 = vst [vmem:[%s8264_s7] sm:$0x3] %v8265_v1  ;;  %v83_v3 = vld [vmem:[#allocation3 + $0x20] sm:$0xff]  ;;  %v82_v6 = vld [vmem:[#allocation3 + $0x18] sm:$0xff] }
  0x37   :  { %4562 = vmatprep.mubr.msk.f32.mxu1 %vm6963_vm0, %v8265_v1  ;;  %v79_v4 = vld [vmem:[#allocation3] sm:$0xff]  ;;  %v7066_v5 = vpack.c.bf16 %v83_v3, %v80_v2  ;;  %v86_v7 = vld [vmem:[#allocation3 + $0x38] sm:$0xff]  ;;  %v89_v8 = vld [vmem:[#allocation3 + $0x50] sm:$0xff] }
  0x38   :  { %v7068_v9 = vpack.c.bf16 %v82_v6, %v79_v4  ;;  %v7070_v10 = vpack.c.bf16 %v89_v8, %v86_v7  ;;  %v85_v11 = vld [vmem:[#allocation3 + $0x30] sm:$0xff]  ;;  %v88_v12 = vld [vmem:[#allocation3 + $0x48] sm:$0xff]  ;;  %v95_v14 = vld [vmem:[#allocation3 + $0x80] sm:$0xff] }
  0x39   :  { %v92_v13 = vld [vmem:[#allocation3 + $0x68] sm:$0xff]  ;;  %5371 = vmatprep.subr.bf16.mxu0 %v7066_v5  ;;  %v7074_v15 = vpack.c.bf16 %v88_v12, %v85_v11  ;;  %v91_v17 = vld [vmem:[#allocation3 + $0x60] sm:$0xff]  ;;  %v94_v18 = vld [vmem:[#allocation3 + $0x78] sm:$0xff] }
  0x3a   :  { %5373 = vmatpush1.bf16.msra.mxu0 %v7068_v9  ;;  %v7077_v16 = vpack.c.bf16 %v95_v14, %v92_v13  ;;  %v98_v19 = vld [vmem:[#allocation3 + $0x98] sm:$0xff]  ;;  %v101_v20 = vld [vmem:[#allocation3 + $0xb0] sm:$0xff]  ;;  %v7080_v21 = vpack.c.bf16 %v94_v18, %v91_v17  ;;  %v100_v24 = vld [vmem:[#allocation3 + $0xa8] sm:$0xff] }
  0x3b   :  { %5375 = vmatprep.subr.bf16.mxu0 %v7070_v10  ;;  %v7083_v22 = vpack.c.bf16 %v101_v20, %v98_v19  ;;  %v97_v23 = vld [vmem:[#allocation3 + $0x90] sm:$0xff]  ;;  %v104_v25 = vld [vmem:[#allocation3 + $0xc8] sm:$0xff]  ;;  %v107_v26 = vld [vmem:[#allocation3 + $0xe0] sm:$0xff] }
  0x3c   :  { %v81_v27 = vld [vmem:[#allocation3 + $0x10] sm:$0xff]  ;;  %v84_v28 = vld [vmem:[#allocation3 + $0x28] sm:$0xff]  ;;  %v87_v29 = vld [vmem:[#allocation3 + $0x40] sm:$0xff]  ;;  %v7086_v30 = vpack.c.bf16 %v100_v24, %v97_v23  ;;  %v7091_v33 = vpack.c.bf16 %v107_v26, %v104_v25 }
  0x3d   :  { %v7088_v31 = vpack.c.bf16 %v84_v28, %v81_v27  ;;  %v90_v32 = vld [vmem:[#allocation3 + $0x58] sm:$0xff]  ;;  %v103_v34 = vld [vmem:[#allocation3 + $0xc0] sm:$0xff]  ;;  %v113_v37 = vld [vmem:[#allocation3 + $0x110] sm:$0xff] }
  0x3e   :  { %5377 = vmatpush1.bf16.msra.mxu0 %v7074_v15  ;;  %v106_v35 = vld [vmem:[#allocation3 + $0xd8] sm:$0xff]  ;;  %v7094_v38 = vpack.c.bf16 %v90_v32, %v87_v29  ;;  %v93_v39 = vld [vmem:[#allocation3 + $0x70] sm:$0xff]  ;;  %v96_v40 = vld [vmem:[#allocation3 + $0x88] sm:$0xff] }
  0x3f   :  { %5379 = vmatprep.subr.bf16.mxu0 %v7077_v16  ;;  %v110_v36 = vld [vmem:[#allocation3 + $0xf8] sm:$0xff]  ;;  %5404 = vmatpush3.bf16.msra.mxu1 %v7088_v31  ;;  %v7098_v41 = vpack.c.bf16 %v106_v35, %v103_v34  ;;  %v109_v43 = vld [vmem:[#allocation3 + $0xf0] sm:$0xff]  ;;  %v112_v44 = vld [vmem:[#allocation3 + $0x108] sm:$0xff]  ;;  %v7104_v47 = vpack.c.bf16 %v96_v40, %v93_v39 }
  0x40   :  { %5405 = vmatprep.subr.bf16.mxu1 %v8267_v0  ;;  %v7101_v42 = vpack.c.bf16 %v113_v37, %v110_v36  ;;  %v116_v45 = vld [vmem:[#allocation3 + $0x128] sm:$0xff]  ;;  %v119_v46 = vld [vmem:[#allocation3 + $0x140] sm:$0xff]  ;;  %v102_v49 = vld [vmem:[#allocation3 + $0xb8] sm:$0xff]  ;;  %v7108_v50 = vpack.c.bf16 %v112_v44, %v109_v43 }
  0x41   :  { %v99_v48 = vld [vmem:[#allocation3 + $0xa0] sm:$0xff]  ;;  %v7111_v51 = vpack.c.bf16 %v119_v46, %v116_v45  ;;  %v118_v53 = vld [vmem:[#allocation3 + $0x138] sm:$0xff]  ;;  %v125_v55 = vld [vmem:[#allocation3 + $0x170] sm:$0xff] }
  0x42   :  { %5381 = vmatpush1.bf16.msra.mxu0 %v7080_v21  ;;  %8388 = vst [vmem:[#allocation10_spill] sm:$0xff] %v7101_v42  ;;  %8389 = vst [vmem:[#allocation11_spill] sm:$0xff] %v7108_v50  ;;  %v115_v52 = vld [vmem:[#allocation3 + $0x120] sm:$0xff]  ;;  %v122_v54 = vld [vmem:[#allocation3 + $0x158] sm:$0xff]  ;;  %v7114_v56 = vpack.c.bf16 %v102_v49, %v99_v48 }
  0x43   :  { %5383 = vmatprep.subr.bf16.mxu0 %v7083_v22  ;;  %5407 = vmatpush3.bf16.msra.mxu1 %v7094_v38  ;;  %8390 = vst [vmem:[#allocation12_spill] sm:$0xff] %v7111_v51  ;;  %v105_v57 = vld [vmem:[#allocation3 + $0xd0] sm:$0xff]  ;;  %v108_v58 = vld [vmem:[#allocation3 + $0xe8] sm:$0xff]  ;;  %v7118_v59 = vpack.c.bf16 %v118_v53, %v115_v52  ;;  %v7121_v60 = vpack.c.bf16 %v125_v55, %v122_v54  ;;  %v111_v2 = vld [vmem:[#allocation3 + $0x100] sm:$0xff] }
  0x44   :  { %5408 = vmatprep.subr.bf16.mxu1 %v8267_v0  ;;  %v121_v61 = vld [vmem:[#allocation3 + $0x150] sm:$0xff]  ;;  %v124_v62 = vld [vmem:[#allocation3 + $0x168] sm:$0xff]  ;;  %v7124_v63 = vpack.c.bf16 %v108_v58, %v105_v57  ;;  %v114_v3 = vld [vmem:[#allocation3 + $0x118] sm:$0xff] }
  0x45   :  { %8391 = vst [vmem:[#allocation13_spill] sm:$0xff] %v7118_v59  ;;  %8392 = vst [vmem:[#allocation14_spill] sm:$0xff] %v7121_v60  ;;  %v7128_v4 = vpack.c.bf16 %v124_v62, %v121_v61  ;;  %v7132_v6 = vpack.c.bf16 %v114_v3, %v111_v2  ;;  %v117_v7 = vld [vmem:[#allocation3 + $0x130] sm:$0xff]  ;;  %v120_v8 = vld [vmem:[#allocation3 + $0x148] sm:$0xff] }
  0x46   :  { %5385 = vmatpush1.bf16.msra.mxu0 %v7086_v30  ;;  %8393 = vst [vmem:[#allocation15_spill] sm:$0xff] %v7124_v63  ;;  %v7136_v11 = vld [vmem:[#allocation2] sm:$0x3]  ;;  %v7139_v12 = vpack.c.bf16 %v120_v8, %v117_v7  ;;  %v123_v13 = vld [vmem:[#allocation3 + $0x160] sm:$0xff]  ;;  %v307_v18 = vld [vmem:[#allocation5 + $0x8] sm:$0xff] }
  0x47   :  { %5387 = vmatprep.subr.bf16.mxu0 %v7091_v33  ;;  %5410 = vmatpush3.bf16.msra.mxu1 %v7104_v47  ;;  %8394 = vst [vmem:[#allocation16_spill] sm:$0xff] %v7128_v4  ;;  %8395 = vst [vmem:[#allocation17_spill] sm:$0xff] %v7132_v6  ;;  %v126_v14 = vld [vmem:[#allocation3 + $0x178] sm:$0xff]  ;;  %v310_v19 = vld [vmem:[#allocation5 + $0x20] sm:$0xff] }
  0x48   :  { %5411 = vmatprep.subr.bf16.mxu1 %v8267_v0  ;;  %8396 = vst [vmem:[#allocation18_spill] sm:$0xff] %v7139_v12  ;;  %v7145_v17 = vpack.c.bf16 %v126_v14, %v123_v13  ;;  %v7153_v20 = vpack.c.bf16 %v310_v19, %v307_v18  ;;  %v306_v23 = vld [vmem:[#allocation5] sm:$0xff]  ;;  %v309_v24 = vld [vmem:[#allocation5 + $0x18] sm:$0xff]  ;;  %v308_v25 = vld [vmem:[#allocation5 + $0x10] sm:$0xff] }
  0x49   :  { %v7155_v26 = vpack.c.bf16 %v309_v24, %v306_v23  ;;  %v311_v27 = vld [vmem:[#allocation5 + $0x28] sm:$0xff]  ;;  %v313_v29 = vld [vmem:[#allocation5 + $0x38] sm:$0xff]  ;;  %v316_v32 = vld [vmem:[#allocation5 + $0x50] sm:$0xff] }
  0x4a   :  { %5389 = vmatpush1.bf16.msra.mxu0 %v7098_v41  ;;  %8397 = vst [vmem:[#allocation19_spill] sm:$0xff] %v7145_v17  ;;  %8398 = vst [vmem:[#allocation20_spill] sm:$0xff] %v7153_v20  ;;  %v7158_v28 = vpack.c.bf16 %v311_v27, %v308_v25  ;;  %v7162_v34 = vpack.c.bf16 %v316_v32, %v313_v29  ;;  %v312_v35 = vld [vmem:[#allocation5 + $0x30] sm:$0xff]  ;;  %v315_v36 = vld [vmem:[#allocation5 + $0x48] sm:$0xff] }
  0x4b   :  { %5391 = vmatprep.subr.bf16.mxu0 %v7101_v42  ;;  %5413 = vmatpush3.bf16.msra.mxu1 %v7114_v56  ;;  %8399 = vst [vmem:[#allocation21_spill] sm:$0xff] %v7155_v26  ;;  %v314_v37 = vld [vmem:[#allocation5 + $0x40] sm:$0xff]  ;;  %v7165_v39 = vpack.c.bf16 %v315_v36, %v312_v35  ;;  %v317_v40 = vld [vmem:[#allocation5 + $0x58] sm:$0xff]  ;;  %v319_v43 = vld [vmem:[#allocation5 + $0x68] sm:$0xff] }
  0x4c   :  { %5414 = vmatprep.subr.bf16.mxu1 %v8267_v0  ;;  %8400 = vst [vmem:[#allocation22_spill] sm:$0xff] %v7158_v28  ;;  %8401 = vst [vmem:[#allocation23_spill] sm:$0xff] %v7162_v34  ;;  %v322_v44 = vld [vmem:[#allocation5 + $0x80] sm:$0xff]  ;;  %v7168_v45 = vpack.c.bf16 %v317_v40, %v314_v37  ;;  %v321_v49 = vld [vmem:[#allocation5 + $0x78] sm:$0xff] }
  0x4d   :  { %8402 = vst [vmem:[#allocation24_spill] sm:$0xff] %v7165_v39  ;;  %v7170_v46 = vpack.c.bf16 %v322_v44, %v319_v43  ;;  %v318_v48 = vld [vmem:[#allocation5 + $0x60] sm:$0xff]  ;;  %v320_v52 = vld [vmem:[#allocation5 + $0x70] sm:$0xff]  ;;  %v323_v54 = vld [vmem:[#allocation5 + $0x88] sm:$0xff] }
  0x4e   :  { %5393 = vmatpush1.bf16.msra.mxu0 %v7108_v50  ;;  %8403 = vst [vmem:[#allocation25_spill] sm:$0xff] %v7168_v45  ;;  %v7173_v53 = vpack.c.bf16 %v321_v49, %v318_v48  ;;  %v7177_v55 = vpack.c.bf16 %v323_v54, %v320_v52  ;;  %v325_v57 = vld [vmem:[#allocation5 + $0x98] sm:$0xff]  ;;  %v328_v58 = vld [vmem:[#allocation5 + $0xb0] sm:$0xff]  ;;  %v327_v2 = vld [vmem:[#allocation5 + $0xa8] sm:$0xff] }
  0x4f   :  { %5395 = vmatprep.subr.bf16.mxu0 %v7111_v51  ;;  %5416 = vmatpush3.bf16.msra.mxu1 %v7124_v63  ;;  %8404 = vst [vmem:[#allocation26_spill] sm:$0xff] %v7170_v46  ;;  %v7182_v61 = vpack.c.bf16 %v328_v58, %v325_v57  ;;  %v324_v62 = vld [vmem:[#allocation5 + $0x90] sm:$0xff]  ;;  %v326_v3 = vld [vmem:[#allocation5 + $0xa0] sm:$0xff]  ;;  %v329_v8 = vld [vmem:[#allocation5 + $0xb8] sm:$0xff] }
  0x50   :  { %5417 = vmatprep.subr.bf16.mxu1 %v8267_v0  ;;  %8405 = vst [vmem:[#allocation27_spill] sm:$0xff] %v7173_v53  ;;  %8406 = vst [vmem:[#allocation28_spill] sm:$0xff] %v7177_v55  ;;  %v7185_v7 = vpack.c.bf16 %v327_v2, %v324_v62  ;;  %v7188_v13 = vpack.c.bf16 %v329_v8, %v326_v3  ;;  %v331_v14 = vld [vmem:[#allocation5 + $0xc8] sm:$0xff]  ;;  %v334_v18 = vld [vmem:[#allocation5 + $0xe0] sm:$0xff] }
  0x51   :  { %8407 = vst [vmem:[#allocation29_spill] sm:$0xff] %v7182_v61  ;;  %v7192_v19 = vpack.c.bf16 %v334_v18, %v331_v14  ;;  %v330_v23 = vld [vmem:[#allocation5 + $0xc0] sm:$0xff]  ;;  %v333_v24 = vld [vmem:[#allocation5 + $0xd8] sm:$0xff]  ;;  %v332_v25 = vld [vmem:[#allocation5 + $0xd0] sm:$0xff] }
  0x52   :  { %5397 = vmatpush1.bf16.msra.mxu0 %v7118_v59  ;;  %8408 = vst [vmem:[#allocation30_spill] sm:$0xff] %v7185_v7  ;;  %8409 = vst [vmem:[#allocation31_spill] sm:$0xff] %v7188_v13  ;;  %v7195_v27 = vpack.c.bf16 %v333_v24, %v330_v23  ;;  %v335_v29 = vld [vmem:[#allocation5 + $0xe8] sm:$0xff]  ;;  %v337_v35 = vld [vmem:[#allocation5 + $0xf8] sm:$0xff] }
  0x53   :  { %5399 = vmatprep.subr.bf16.mxu0 %v7121_v60  ;;  %5419 = vmatpush3.bf16.msra.mxu1 %v7132_v6  ;;  %8410 = vst [vmem:[#allocation32_spill] sm:$0xff] %v7192_v19  ;;  %v7198_v32 = vpack.c.bf16 %v335_v29, %v332_v25  ;;  %v340_v36 = vld [vmem:[#allocation5 + $0x110] sm:$0xff]  ;;  %v339_v43 = vld [vmem:[#allocation5 + $0x108] sm:$0xff]  ;;  %v338_v44 = vld [vmem:[#allocation5 + $0x100] sm:$0xff] }
  0x54   :  { %5420 = vmatprep.subr.bf16.mxu1 %v8267_v0  ;;  %8411 = vst [vmem:[#allocation33_spill] sm:$0xff] %v7195_v27  ;;  %v7202_v37 = vpack.c.bf16 %v340_v36, %v337_v35  ;;  %v336_v40 = vld [vmem:[#allocation5 + $0xf0] sm:$0xff]  ;;  %v341_v49 = vld [vmem:[#allocation5 + $0x118] sm:$0xff]  ;;  %v343_v52 = vld [vmem:[#allocation5 + $0x128] sm:$0xff] }
  0x55   :  { %8412 = vst [vmem:[#allocation34_spill] sm:$0xff] %v7198_v32  ;;  %v7205_v48 = vpack.c.bf16 %v339_v43, %v336_v40  ;;  %v346_v54 = vld [vmem:[#allocation5 + $0x140] sm:$0xff]  ;;  %v7208_v57 = vpack.c.bf16 %v341_v49, %v338_v44  ;;  %v345_v2 = vld [vmem:[#allocation5 + $0x138] sm:$0xff]  ;;  %v344_v3 = vld [vmem:[#allocation5 + $0x130] sm:$0xff] }
  0x56   :  { %5401 = vmatpush1.bf16.msra.mxu0 %v7128_v4  ;;  %8413 = vst [vmem:[#allocation35_spill] sm:$0xff] %v7202_v37  ;;  %v7210_v58 = vpack.c.bf16 %v346_v54, %v343_v52  ;;  %v342_v62 = vld [vmem:[#allocation5 + $0x120] sm:$0xff]  ;;  %v347_v14 = vld [vmem:[#allocation5 + $0x148] sm:$0xff]  ;;  %v349_v18 = vld [vmem:[#allocation5 + $0x158] sm:$0xff] }
  0x57   :  { %5422 = vmatpush3.bf16.msra.mxu1 %v7139_v12  ;;  %5427 = vmatprep.subr.bf16.mxu0 %v7153_v20  ;;  %8414 = vst [vmem:[#allocation36_spill] sm:$0xff] %v7205_v48  ;;  %8415 = vst [vmem:[#allocation37_spill] sm:$0xff] %v7208_v57  ;;  %v7213_v8 = vpack.c.bf16 %v345_v2, %v342_v62  ;;  %v352_v23 = vld [vmem:[#allocation5 + $0x170] sm:$0xff]  ;;  %v7217_v24 = vpack.c.bf16 %v347_v14, %v344_v3  ;;  %v351_v35 = vld [vmem:[#allocation5 + $0x168] sm:$0xff]  ;;  %v6964_v62 = vmov 1983009808   ;;  %v274_v3 = vlaneseq }
  0x58   :  { %5423 = vmatprep.subr.bf16.mxu1 %v8267_v0  ;;  %8416 = vst [vmem:[#allocation38_spill] sm:$0xff] %v7210_v58  ;;  %v7219_v25 = vpack.c.bf16 %v352_v23, %v349_v18  ;;  %v348_v29 = vld [vmem:[#allocation5 + $0x150] sm:$0xff]  ;;  %v350_v36 = vld [vmem:[#allocation5 + $0x160] sm:$0xff]  ;;  %v353_v40 = vld [vmem:[#allocation5 + $0x178] sm:$0xff]  ;;  %v272_v2 = vunpack.c.l.s4 %v6964_v62 }
  0x59   :  { %192 = vmatmul.mubr.f32.vlgmr.msra.gmra.mrb[0].mxu0 %v7136_v11  ;;  %8417 = vst [vmem:[#allocation39_spill] sm:$0xff] %v7213_v8  ;;  %8418 = vst [vmem:[#allocation40_spill] sm:$0xff] %v7217_v24  ;;  %v512_v43 = vld [vmem:[#allocation7 + $0x8] sm:$0xff]  ;;  %v515_v44 = vld [vmem:[#allocation7 + $0x20] sm:$0xff]  ;;  %v7223_v49 = vpack.c.bf16 %v351_v35, %v348_v29  ;;  %v7227_v52 = vpack.c.bf16 %v353_v40, %v350_v36  ;;  %v7236_v18 = vshrl.u32 %v274_v3, 7 }
  0x5a   :  { %434 = vmatprep.mubr.f32.mxu0 %v8265_v1  ;;  %5429 = vmatpush1.bf16.msra.mxu0 %v7155_v26  ;;  %8419 = vst [vmem:[#allocation41_spill] sm:$0xff] %v7219_v25  ;;  %v7229_v54 = vpack.c.bf16 %v515_v44, %v512_v43  ;;  %v273_v14 = vunpack.c.0.s8 %v272_v2  ;;  %v78_v40 = vld [vmem:[%s8257_s0] sm:$0x3f] }
  0x5b   :  { %5425 = vmatpush3.bf16.msra.mxu1 %v7145_v17  ;;  %5431 = vmatprep.subr.bf16.mxu0 %v7162_v34  ;;  %8420 = vst [vmem:[#allocation42_spill] sm:$0xff] %v7223_v49  ;;  %8421 = vst [vmem:[#allocation43_spill] sm:$0xff] %v7227_v52 }
  0x5c   :  { %5458 = vmatprep.subr.bf16.mxu1 %v8267_v0  ;;  %8422 = vst [vmem:[#allocation44_spill] sm:$0xff] %v7229_v54  ;;  %8423 = vst [vmem:[#allocation45_spill] sm:$0xff] %v7236_v18  ;;  %v7239_v29 = vsub.s32 %v273_v14, %v7236_v18  ;;  %v7248_v14 = vld [vmem:[%s8259_s2] ss:$0 sm:$0xff] }
  0x5d   :  { %8425 = vst [vmem:[#allocation47_spill] sm:$0xff] %v7248_v14 }
  0x5e   :  { %4563 = vmatmul.mubr.f32.vlgmr.msra.gmra.mrb[0].mxu1 %v7136_v11  ;;  %5433 = vmatpush1.bf16.msra.mxu0 %v7165_v39  ;;  %8424 = vst [vmem:[#allocation46_spill] sm:$0xff] %v7239_v29 }
  0x5f   :  { %4597 = vmatprep.mubr.msk.f32.mxu1 %vm6963_vm0, %v8265_v1  ;;  %5460 = vmatpush3.bf16.msra.mxu1 %v7158_v28 }
  0x60   :  { %5461 = vmatprep.subr.bf16.mxu1 %v8267_v0  ;;  %5435 = vmatprep.subr.bf16.mxu0 %v7170_v46 }
  0x62   :  { %5437 = vmatpush1.bf16.msra.mxu0 %v7173_v53 }
  0x63   :  { %5463 = vmatpush3.bf16.msra.mxu1 %v7168_v45  ;;  %5439 = vmatprep.subr.bf16.mxu0 %v7182_v61 }
  0x64   :  { %5464 = vmatprep.subr.bf16.mxu1 %v8267_v0 }
  0x66   :  { %5441 = vmatpush1.bf16.msra.mxu0 %v7185_v7 }
  0x67   :  { %5466 = vmatpush3.bf16.msra.mxu1 %v7177_v55  ;;  %5443 = vmatprep.subr.bf16.mxu0 %v7192_v19 }
  0x68   :  { %5467 = vmatprep.subr.bf16.mxu1 %v8267_v0 }
  0x6a   :  { %5445 = vmatpush1.bf16.msra.mxu0 %v7195_v27 }
  0x6b   :  { %5469 = vmatpush3.bf16.msra.mxu1 %v7188_v13  ;;  %5447 = vmatprep.subr.bf16.mxu0 %v7202_v37 }
  0x6c   :  { %5470 = vmatprep.subr.bf16.mxu1 %v8267_v0 }
  0x6e   :  { %5449 = vmatpush1.bf16.msra.mxu0 %v7205_v48 }
  0x6f   :  { %5472 = vmatpush3.bf16.msra.mxu1 %v7198_v32  ;;  %5451 = vmatprep.subr.bf16.mxu0 %v7210_v58  ;;  %v527_v58 = vld [vmem:[#allocation7 + $0x80] sm:$0xff] }
  0x70   :  { %5473 = vmatprep.subr.bf16.mxu1 %v8267_v0 }
  0x72   :  { %5453 = vmatpush1.bf16.msra.mxu0 %v7213_v8 }
  0x73   :  { %5475 = vmatpush3.bf16.msra.mxu1 %v7208_v57  ;;  %5455 = vmatprep.subr.bf16.mxu0 %v7219_v25 }
  0x74   :  { %5476 = vmatprep.subr.bf16.mxu1 %v8267_v0 }
  0x76   :  { %5457 = vmatpush1.bf16.msra.mxu0 %v7223_v49  ;;  %v521_v49 = vld [vmem:[#allocation7 + $0x50] sm:$0xff] }
  0x77   :  { %5478 = vmatpush3.bf16.msra.mxu1 %v7217_v24  ;;  %5483 = vmatprep.subr.bf16.mxu0 %v7229_v54 }
  0x78   :  { %5479 = vmatprep.subr.bf16.mxu1 %v8267_v0 }
  0x7b   :  { %5481 = vmatpush3.bf16.msra.mxu1 %v7227_v52 }
  0x7c   :  { %5514 = vmatprep.subr.bf16.mxu1 %v8267_v0 }
 0x12c   :  { %v193_v23 = vpop.f32.mrb[0].mxu0 }
 0x12d   :  { %v195_v35 = vpop.f32.mrb[1].mxu0 }
 0x12e   :  { %v270_v36 = vcombine.low %v193_v23, %v195_v35  ;;  %v295_v35 = vrot.slane %v78_v40, 4 }
 0x130   :  { %v277_v43 = vrot.slane %v270_v36, %v7239_v29  ;;  %v516_v29 = vld [vmem:[#allocation7 + $0x28] sm:$0xff] }
 0x131   :  { %v264_v62 = vpop.f32.mrb[0].mxu1 }
 0x132   :  { %v279_v44 = vadd.f32 %v277_v43, %v78_v40  ;;  %v4564_v0 = vpop.f32.mrb[1].mxu1  ;;  %v292_v23 = vadd.f32 %v7248_v14, %v264_v62  ;;  %v511_v43 = vld [vmem:[#allocation7] sm:$0xff]  ;;  %v517_v40 = vld [vmem:[#allocation7 + $0x30] sm:$0xff]  ;;  %v524_v14 = vld [vmem:[#allocation7 + $0x68] sm:$0xff] }
 0x133   :  { %v513_v0 = vld [vmem:[#allocation7 + $0x10] sm:$0xff] }
 0x134   :  { %v4089_v1 = vmul.f32 -1.442695, %v279_v44  ;;  %v514_v44 = vld [vmem:[#allocation7 + $0x18] sm:$0xff]  ;;  %v7254_v62 = vpack.c.bf16 %v516_v29, %v513_v0  ;;  %v533_v0 = vld [vmem:[#allocation7 + $0xb0] sm:$0xff] }
 0x135   :  { %v7252_v8 = vpack.c.bf16 %v514_v44, %v511_v43  ;;  %v525_v43 = vld [vmem:[#allocation7 + $0x70] sm:$0xff]  ;;  %v530_v44 = vld [vmem:[#allocation7 + $0x98] sm:$0xff] }
 0x136   :  { %6755 = vpow2.f32 %v4089_v1  ;;  %8426 = vst [vmem:[#allocation48_spill] sm:$0xff] %v7254_v62 }
 0x140   :  { %v6756_v2 = vpop.eup %6755 }
 0x141   :  { %v283_v3 = vadd.f32 1.0, %v6756_v2 }
 0x143   :  { %6757 = vrcp.f32 %v283_v3  ;;  %v518_v3 = vld [vmem:[#allocation7 + $0x38] sm:$0xff] }
 0x14d   :  { %v6758_v18 = vpop.eup %6757 }
 0x14e   :  { %v293_v54 = vmul.f32 %v6758_v18, %v292_v23  ;;  %v300_v36 = vrot.slane %v6758_v18, 2  ;;  %v519_v18 = vld [vmem:[#allocation7 + $0x40] sm:$0xff] }
 0x150   :  { %v297_v52 = vadd.f32 %v295_v35, %v293_v54  ;;  %v302_v1 = vsub.f32 1.0, %v300_v36  ;;  %v304_v24 = vmul.f32 %v300_v36, %v7136_v11  ;;  %v520_v54 = vld [vmem:[#allocation7 + $0x48] sm:$0xff]  ;;  %v522_v35 = vld [vmem:[#allocation7 + $0x58] sm:$0xff] }
 0x151   :  { %v7264_v11 = vpack.c.bf16 %v520_v54, %v517_v40  ;;  %v7266_v29 = vpack.c.bf16 %v522_v35, %v519_v18  ;;  %v526_v36 = vld [vmem:[#allocation7 + $0x78] sm:$0xff]  ;;  %v532_v54 = vld [vmem:[#allocation7 + $0xa8] sm:$0xff]  ;;  %v531_v18 = vld [vmem:[#allocation7 + $0xa0] sm:$0xff] }
 0x152   :  { %6759 = vtanh.f32 %v297_v52  ;;  %v7258_v52 = vpack.c.bf16 %v521_v49, %v518_v3  ;;  %v7270_v49 = vpack.c.bf16 %v527_v58, %v524_v14  ;;  %v529_v58 = vld [vmem:[#allocation7 + $0x90] sm:$0xff]  ;;  %v7283_v14 = vpack.c.bf16 %v533_v0, %v530_v44  ;;  %v534_v35 = vld [vmem:[#allocation7 + $0xb8] sm:$0xff] }
 0x153   :  { %8428 = vst [vmem:[#allocation50_spill] sm:$0xff] %v7264_v11  ;;  %8429 = vst [vmem:[#allocation51_spill] sm:$0xff] %v7266_v29  ;;  %v538_v44 = vld [vmem:[#allocation7 + $0xd8] sm:$0xff]  ;;  %v537_v0 = vld [vmem:[#allocation7 + $0xd0] sm:$0xff] }
 0x154   :  { %8427 = vst [vmem:[#allocation49_spill] sm:$0xff] %v7258_v52  ;;  %8431 = vst [vmem:[#allocation52_spill] sm:$0xff] %v7270_v49 }
 0x155   :  { %8435 = vst [vmem:[#allocation55_spill] sm:$0xff] %v7283_v14 }
 0x15c   :  { %v6760_v2 = vpop.eup %6759 }
 0x15d   :  { %v303_v25 = vmul.f32 %v6760_v2, %v302_v1  ;;  %v528_v1 = vld [vmem:[#allocation7 + $0x88] sm:$0xff]  ;;  %v8432_v2 = vmov 0.0  }
 0x15e   :  { %v7279_v40 = vpack.c.bf16 %v528_v1, %v525_v43  ;;  %v535_v43 = vld [vmem:[#allocation7 + $0xc0] sm:$0xff] }
 0x15f   :  { %v7256_v23 = vadd.f32 %v304_v24, %v303_v25  ;;  %v523_v24 = vld [vmem:[#allocation7 + $0x60] sm:$0xff]  ;;  %v8430_v25 = vmov 0.0|0.0  }
 0x160   :  { %v7277_v3 = vpack.c.bf16 %v526_v36, %v523_v24  ;;  %8434 = vst [vmem:[#allocation54_spill] sm:$0xff] %v7279_v40  ;;  %v7287_v24 = vpack.c.bf16 %v532_v54, %v529_v58  ;;  %v7289_v36 = vpack.c.bf16 %v534_v35, %v531_v18  ;;  %v7297_v58 = vpack.c.bf16 %v538_v44, %v535_v43  ;;  %v541_v18 = vld [vmem:[#allocation7 + $0xf0] sm:$0xff]  ;;  %v543_v35 = vld [vmem:[#allocation7 + $0x100] sm:$0xff] }
 0x161   :  { %435 = vmatmul.mubr.f32.vlgmr.msra.gmra.mrb[2].mxu0 %v7256_v23  ;;  %4598 = vmatmul.mubr.f32.vlgmr.msra.gmra.mrb[2].mxu1 %v7256_v23  ;;  %v547_v44 = vld [vmem:[#allocation7 + $0x120] sm:$0xff] }
 0x162   :  { %5485 = vmatpush1.bf16.msra.mxu0 %v7252_v8  ;;  %5516 = vmatpush3.bf16.msra.mxu1 %v7254_v62  ;;  %8433 = vst [vmem:[#allocation53_spill] sm:$0xff] %v7277_v3  ;;  %v539_v62 = vld [vmem:[#allocation7 + $0xe0] sm:$0xff]  ;;  %8436 = vst [vmem:[#allocation56_spill] sm:$0xff] %v7287_v24 }
 0x163   :  { %5487 = vmatprep.subr.bf16.mxu0 %v7258_v52  ;;  %5517 = vmatprep.subr.bf16.mxu1 %v8430_v25  ;;  %v536_v52 = vld [vmem:[#allocation7 + $0xc8] sm:$0xff]  ;;  %8437 = vst [vmem:[#allocation57_spill] sm:$0xff] %v7289_v36 }
 0x164   :  { %623 = vmatprep.mubr.f32.mxu0 %v8432_v2  ;;  %4632 = vmatprep.mubr.msk.f32.mxu1 %vm6963_vm0, %v8432_v2  ;;  %v7293_v1 = vpack.c.bf16 %v539_v62, %v536_v52  ;;  %v544_v52 = vld [vmem:[#allocation7 + $0x108] sm:$0xff] }
 0x165   :  { %v7307_v43 = vpack.c.bf16 %v544_v52, %v541_v18  ;;  %v553_v52 = vld [vmem:[#allocation7 + $0x150] sm:$0xff] }
 0x166   :  { %5489 = vmatpush1.bf16.msra.mxu0 %v7264_v11  ;;  %5519 = vmatpush3.bf16.msra.mxu1 %v7266_v29  ;;  %8438 = vst [vmem:[#allocation58_spill] sm:$0xff] %v7293_v1  ;;  %v542_v29 = vld [vmem:[#allocation7 + $0xf8] sm:$0xff]  ;;  %v545_v11 = vld [vmem:[#allocation7 + $0x110] sm:$0xff] }
 0x167   :  { %5491 = vmatprep.subr.bf16.mxu0 %v7270_v49  ;;  %5520 = vmatprep.subr.bf16.mxu1 %v8430_v25  ;;  %v540_v49 = vld [vmem:[#allocation7 + $0xe8] sm:$0xff]  ;;  %v7303_v62 = vpack.c.bf16 %v545_v11, %v542_v29  ;;  %8440 = vst [vmem:[#allocation60_spill] sm:$0xff] %v7307_v43  ;;  %v550_v29 = vld [vmem:[#allocation7 + $0x138] sm:$0xff] }
 0x168   :  { %v7299_v54 = vpack.c.bf16 %v540_v49, %v537_v0  ;;  %v549_v0 = vld [vmem:[#allocation7 + $0x130] sm:$0xff]  ;;  %v7317_v18 = vpack.c.bf16 %v550_v29, %v547_v44  ;;  %v8444_v29 = vld [vmem:[#allocation41_spill] sm:$0xff] }
 0x169   :  { %8439 = vst [vmem:[#allocation59_spill] sm:$0xff] %v7303_v62 }
 0x16a   :  { %5493 = vmatpush1.bf16.msra.mxu0 %v7277_v3  ;;  %5522 = vmatpush3.bf16.msra.mxu1 %v7279_v40  ;;  %v548_v40 = vld [vmem:[#allocation7 + $0x128] sm:$0xff]  ;;  %v551_v3 = vld [vmem:[#allocation7 + $0x140] sm:$0xff] }
 0x16b   :  { %5495 = vmatprep.subr.bf16.mxu0 %v7283_v14  ;;  %5523 = vmatprep.subr.bf16.mxu1 %v8430_v25  ;;  %v546_v14 = vld [vmem:[#allocation7 + $0x118] sm:$0xff]  ;;  %v7313_v11 = vpack.c.bf16 %v551_v3, %v548_v40  ;;  %v556_v40 = vld [vmem:[#allocation7 + $0x168] sm:$0xff] }
 0x16c   :  { %v7309_v49 = vpack.c.bf16 %v546_v14, %v543_v35  ;;  %v555_v35 = vld [vmem:[#allocation7 + $0x160] sm:$0xff] }
 0x16e   :  { %5497 = vmatpush1.bf16.msra.mxu0 %v7287_v24  ;;  %5525 = vmatpush3.bf16.msra.mxu1 %v7289_v36  ;;  %v554_v36 = vld [vmem:[#allocation7 + $0x158] sm:$0xff]  ;;  %v557_v24 = vld [vmem:[#allocation7 + $0x170] sm:$0xff] }
 0x16f   :  { %5499 = vmatprep.subr.bf16.mxu0 %v7293_v1  ;;  %5526 = vmatprep.subr.bf16.mxu1 %v8430_v25  ;;  %v552_v1 = vld [vmem:[#allocation7 + $0x148] sm:$0xff]  ;;  %v7323_v3 = vpack.c.bf16 %v557_v24, %v554_v36  ;;  %v7338_v24 = vld [vmem:[%s8264_s7] sm:$0x3]  ;;  %v8441_v36 = vld [vmem:[#allocation38_spill] sm:$0xff] }
 0x170   :  { %v7319_v14 = vpack.c.bf16 %v552_v1, %v549_v0  ;;  %v8442_v1 = vld [vmem:[#allocation39_spill] sm:$0xff]  ;;  %v8445_v0 = vld [vmem:[#allocation42_spill] sm:$0xff] }
 0x172   :  { %5501 = vmatpush1.bf16.msra.mxu0 %v7297_v58  ;;  %5528 = vmatpush3.bf16.msra.mxu1 %v7299_v54 }
 0x173   :  { %5503 = vmatprep.subr.bf16.mxu0 %v7303_v62  ;;  %5529 = vmatprep.subr.bf16.mxu1 %v8430_v25  ;;  %v558_v62 = vld [vmem:[#allocation7 + $0x178] sm:$0xff] }
 0x174   :  { %v7329_v44 = vpack.c.bf16 %v558_v62, %v555_v35  ;;  %v8443_v62 = vld [vmem:[#allocation40_spill] sm:$0xff] }
 0x176   :  { %5505 = vmatpush1.bf16.msra.mxu0 %v7307_v43  ;;  %5531 = vmatpush3.bf16.msra.mxu1 %v7309_v49  ;;  %v7327_v43 = vpack.c.bf16 %v556_v40, %v553_v52  ;;  %v8446_v52 = vld [vmem:[#allocation43_spill] sm:$0xff]  ;;  %v8447_v40 = vld [vmem:[#allocation44_spill] sm:$0xff] }
 0x177   :  { %5507 = vmatprep.subr.bf16.mxu0 %v7313_v11  ;;  %5532 = vmatprep.subr.bf16.mxu1 %v8430_v25 }
 0x17a   :  { %5509 = vmatpush1.bf16.msra.mxu0 %v7317_v18  ;;  %5534 = vmatpush3.bf16.msra.mxu1 %v7319_v14 }
 0x17b   :  { %5511 = vmatprep.subr.bf16.mxu0 %v7323_v3  ;;  %5535 = vmatprep.subr.bf16.mxu1 %v8430_v25 }
 0x17e   :  { %5513 = vmatpush1.bf16.msra.mxu0 %v7327_v43  ;;  %5537 = vmatpush3.bf16.msra.mxu1 %v7329_v44 }
 0x17f   :  { %5539 = vmatprep.subr.bf16.mxu0 %v7066_v5  ;;  %5570 = vmatprep.subr.bf16.mxu1 %v8430_v25 }
 0x181   :  { %624 = vmatmul.mubr.f32.vlgmr.msra.gmra.mrb[2].mxu0 %v7338_v24  ;;  %4633 = vmatmul.mubr.f32.vlgmr.msra.gmra.mrb[4].mxu1 %v7338_v24 }
 0x182   :  { %5541 = vmatpush1.bf16.msra.mxu0 %v7068_v9  ;;  %5572 = vmatpush3.bf16.msra.mxu1 %v7088_v31 }
 0x183   :  { %5543 = vmatprep.subr.bf16.mxu0 %v7070_v10  ;;  %5573 = vmatprep.subr.bf16.mxu1 %v8430_v25 }
 0x184   :  { %794 = vmatprep.mubr.f32.mxu0 %v8432_v2  ;;  %4667 = vmatprep.mubr.msk.f32.mxu1 %vm6963_vm0, %v8432_v2 }
 0x186   :  { %5545 = vmatpush1.bf16.msra.mxu0 %v7074_v15  ;;  %5575 = vmatpush3.bf16.msra.mxu1 %v7094_v38 }
 0x187   :  { %5547 = vmatprep.subr.bf16.mxu0 %v7077_v16  ;;  %5576 = vmatprep.subr.bf16.mxu1 %v8430_v25 }
 0x18a   :  { %5549 = vmatpush1.bf16.msra.mxu0 %v7080_v21  ;;  %5578 = vmatpush3.bf16.msra.mxu1 %v7104_v47 }
 0x18b   :  { %5551 = vmatprep.subr.bf16.mxu0 %v7083_v22  ;;  %5579 = vmatprep.subr.bf16.mxu1 %v8430_v25 }
 0x18e   :  { %5553 = vmatpush1.bf16.msra.mxu0 %v7086_v30  ;;  %5581 = vmatpush3.bf16.msra.mxu1 %v7114_v56 }
 0x18f   :  { %5555 = vmatprep.subr.bf16.mxu0 %v7091_v33  ;;  %5582 = vmatprep.subr.bf16.mxu1 %v8430_v25 }
 0x192   :  { %5557 = vmatpush1.bf16.msra.mxu0 %v7098_v41  ;;  %5584 = vmatpush3.bf16.msra.mxu1 %v7124_v63 }
 0x193   :  { %5559 = vmatprep.subr.bf16.mxu0 %v7101_v42  ;;  %5585 = vmatprep.subr.bf16.mxu1 %v8430_v25 }
 0x196   :  { %5561 = vmatpush1.bf16.msra.mxu0 %v7108_v50  ;;  %5587 = vmatpush3.bf16.msra.mxu1 %v7132_v6 }
 0x197   :  { %5563 = vmatprep.subr.bf16.mxu0 %v7111_v51  ;;  %5588 = vmatprep.subr.bf16.mxu1 %v8430_v25 }
 0x19a   :  { %5565 = vmatpush1.bf16.msra.mxu0 %v7118_v59  ;;  %5590 = vmatpush3.bf16.msra.mxu1 %v7139_v12 }
 0x19b   :  { %5567 = vmatprep.subr.bf16.mxu0 %v7121_v60  ;;  %5591 = vmatprep.subr.bf16.mxu1 %v8430_v25 }
 0x19e   :  { %5569 = vmatpush1.bf16.msra.mxu0 %v7128_v4  ;;  %5593 = vmatpush3.bf16.msra.mxu1 %v7145_v17 }
 0x19f   :  { %5595 = vmatprep.subr.bf16.mxu0 %v7153_v20  ;;  %5626 = vmatprep.subr.bf16.mxu1 %v8430_v25 }
 0x1a1   :  { %795 = vmatmul.mubr.f32.vlgmr.msra.gmra.mrb[4].mxu0 %v7256_v23  ;;  %4668 = vmatmul.mubr.f32.vlgmr.msra.gmra.mrb[6].mxu1 %v7256_v23 }
 0x1a2   :  { %5597 = vmatpush1.bf16.msra.mxu0 %v7155_v26  ;;  %5628 = vmatpush3.bf16.msra.mxu1 %v7158_v28 }
 0x1a3   :  { %5599 = vmatprep.subr.bf16.mxu0 %v7162_v34  ;;  %5629 = vmatprep.subr.bf16.mxu1 %v8430_v25 }
 0x1a4   :  { %967 = vmatprep.mubr.f32.mxu0 %v8432_v2  ;;  %4702 = vmatprep.mubr.msk.f32.mxu1 %vm6963_vm0, %v8432_v2 }
 0x1a6   :  { %5601 = vmatpush1.bf16.msra.mxu0 %v7165_v39  ;;  %5631 = vmatpush3.bf16.msra.mxu1 %v7168_v45 }
 0x1a7   :  { %5603 = vmatprep.subr.bf16.mxu0 %v7170_v46  ;;  %5632 = vmatprep.subr.bf16.mxu1 %v8430_v25 }
 0x1aa   :  { %5605 = vmatpush1.bf16.msra.mxu0 %v7173_v53  ;;  %5634 = vmatpush3.bf16.msra.mxu1 %v7177_v55 }
 0x1ab   :  { %5607 = vmatprep.subr.bf16.mxu0 %v7182_v61  ;;  %5635 = vmatprep.subr.bf16.mxu1 %v8430_v25 }
 0x1ae   :  { %5609 = vmatpush1.bf16.msra.mxu0 %v7185_v7  ;;  %5637 = vmatpush3.bf16.msra.mxu1 %v7188_v13 }
 0x1af   :  { %5611 = vmatprep.subr.bf16.mxu0 %v7192_v19  ;;  %5638 = vmatprep.subr.bf16.mxu1 %v8430_v25 }
 0x1b2   :  { %5613 = vmatpush1.bf16.msra.mxu0 %v7195_v27  ;;  %5640 = vmatpush3.bf16.msra.mxu1 %v7198_v32 }
 0x1b3   :  { %5615 = vmatprep.subr.bf16.mxu0 %v7202_v37  ;;  %5641 = vmatprep.subr.bf16.mxu1 %v8430_v25 }
 0x1b6   :  { %5617 = vmatpush1.bf16.msra.mxu0 %v7205_v48  ;;  %5643 = vmatpush3.bf16.msra.mxu1 %v7208_v57  ;;  %v8448_v57 = vld [vmem:[#allocation45_spill] sm:$0xff] }
 0x1b7   :  { %5619 = vmatprep.subr.bf16.mxu0 %v8441_v36  ;;  %5644 = vmatprep.subr.bf16.mxu1 %v8430_v25  ;;  %v357_v48 = vsub.s32 0, %v8448_v57 }
 0x1ba   :  { %5621 = vmatpush1.bf16.msra.mxu0 %v8442_v1  ;;  %5646 = vmatpush3.bf16.msra.mxu1 %v8443_v62  ;;  %v75_v62 = vld [vmem:[%s8261_s4] sm:$0x7] }
 0x1bb   :  { %5623 = vmatprep.subr.bf16.mxu0 %v8444_v29  ;;  %5647 = vmatprep.subr.bf16.mxu1 %v8430_v25  ;;  %v361_v29 = vsub.s32 1, %v8448_v57  ;;  %v7421_v1 = vrot.slane %v75_v62, %v357_v48  ;;  %v365_v48 = vsub.s32 2, %v8448_v57 }
 0x1bd   :  { %8449 = vst [vmem:[#allocation45_spill] sm:$0xff] %v7421_v1 }
 0x1be   :  { %5625 = vmatpush1.bf16.msra.mxu0 %v8445_v0  ;;  %5649 = vmatpush3.bf16.msra.mxu1 %v8446_v52  ;;  %v7423_v0 = vrot.slane %v75_v62, %v361_v29  ;;  %v7431_v29 = vld [vmem:[%s8263_s6] ss:$0 sm:$0xff] }
 0x1bf   :  { %5651 = vmatprep.subr.bf16.mxu0 %v8447_v40  ;;  %5682 = vmatprep.subr.bf16.mxu1 %v8430_v25  ;;  %8451 = vst [vmem:[#allocation62_spill] sm:$0xff] %v7431_v29 }
 0x1c0   :  { %8450 = vst [vmem:[#allocation61_spill] sm:$0xff] %v7423_v0 }
 0x234   :  { %v507_v35 = vpop.f32.mrb[2].mxu1 }
 0x235   :  { %v4599_v36 = vpop.f32.mrb[3].mxu1 }
 0x254   :  { %v625_v37 = vpop.f32.mrb[2].mxu0  ;;  %v696_v52 = vpop.f32.mrb[4].mxu1 }
 0x255   :  { %v6714_v40 = vadd.f32 %v625_v37, %v7421_v1  ;;  %v627_v32 = vpop.f32.mrb[3].mxu0  ;;  %v4634_v27 = vpop.f32.mrb[5].mxu1  ;;  %v7433_v37 = vrot.slane %v75_v62, %v365_v48  ;;  %v4094_v62 = vld [vmem:[%s8257_s0 + $0x6] sm:$0x3f] }
 0x256   :  { %v6715_v36 = vadd.f32 %v627_v32, %v7423_v0  ;;  %v8453_v48 = vld [vmem:[#allocation46_spill] sm:$0xff] }
 0x257   :  { %v4091_v19 = vmul.f32 -1.442695, %v6714_v40  ;;  %8452 = vst [vmem:[#allocation63_spill] sm:$0xff] %v7433_v37  ;;  %v720_v40 = vadd.f32 %v7431_v29, %v696_v52 }
 0x258   :  { %v4092_v13 = vmul.f32 -1.442695, %v6715_v36 }
 0x259   :  { %6761 = vpow2.f32 %v4091_v19  ;;  %v508_v19 = vadd.f32 %v507_v35, %v7433_v37 }
 0x25a   :  { %6763 = vpow2.f32 %v4092_v13 }
 0x263   :  { %v6762_v7 = vpop.eup %6761 }
 0x264   :  { %v708_v61 = vadd.f32 1.0, %v6762_v7  ;;  %v6764_v55 = vpop.eup %6763 }
 0x265   :  { %v709_v27 = vadd.f32 1.0, %v6764_v55 }
 0x266   :  { %6765 = vrcp.f32 %v708_v61 }
 0x267   :  { %6767 = vrcp.f32 %v709_v27 }
 0x270   :  { %v6766_v32 = vpop.eup %6765 }
 0x271   :  { %v721_v13 = vmul.f32 %v6766_v32, %v720_v40  ;;  %v6768_v52 = vpop.eup %6767 }
 0x272   :  { %v724_v35 = vsub.f32 1.0, %v6768_v52  ;;  %v726_v32 = vmul.f32 %v6768_v52, %v7338_v24  ;;  %v8455_v24 = vld [vmem:[#allocation48_spill] sm:$0xff]  ;;  %v8462_v52 = vld [vmem:[#allocation55_spill] sm:$0xff] }
 0x273   :  { %v722_v7 = vadd.f32 %v721_v13, %v508_v19 }
 0x274   :  { %v796_v61 = vpop.f32.mrb[4].mxu0  ;;  %v867_v36 = vpop.f32.mrb[6].mxu1 }
 0x275   :  { %6769 = vtanh.f32 %v722_v7  ;;  %v798_v57 = vpop.f32.mrb[5].mxu0  ;;  %v4669_v0 = vpop.f32.mrb[7].mxu1  ;;  %v8454_v7 = vld [vmem:[#allocation47_spill] sm:$0xff] }
 0x276   :  { %v873_v1 = vcombine.low %v796_v61, %v798_v57  ;;  %v889_v61 = vadd.f32 %v8454_v7, %v867_v36  ;;  %v892_v57 = vrot.slane %v4094_v62, 4  ;;  %v8456_v36 = vld [vmem:[#allocation49_spill] sm:$0xff] }
 0x278   :  { %v880_v55 = vrot.slane %v873_v1, %v8453_v48 }
 0x27a   :  { %v882_v53 = vadd.f32 %v4094_v62, %v880_v55  ;;  %v8460_v62 = vld [vmem:[#allocation53_spill] sm:$0xff] }
 0x27c   :  { %v4095_v29 = vmul.f32 -1.442695, %v882_v53 }
 0x27e   :  { %6771 = vpow2.f32 %v4095_v29 }
 0x27f   :  { %v6770_v27 = vpop.eup %6769 }
 0x280   :  { %v725_v40 = vmul.f32 %v6770_v27, %v724_v35 }
 0x282   :  { %v7442_v19 = vadd.f32 %v726_v32, %v725_v40  ;;  %v8463_v40 = vld [vmem:[#allocation56_spill] sm:$0xff]  ;;  %v8464_v32 = vld [vmem:[#allocation57_spill] sm:$0xff] }
 0x288   :  { %v6772_v13 = vpop.eup %6771 }
 0x289   :  { %v886_v0 = vadd.f32 1.0, %v6772_v13  ;;  %v8465_v13 = vld [vmem:[#allocation58_spill] sm:$0xff] }
 0x28b   :  { %6773 = vrcp.f32 %v886_v0  ;;  %v8466_v0 = vld [vmem:[#allocation59_spill] sm:$0xff] }
 0x295   :  { %v6774_v37 = vpop.eup %6773 }
 0x296   :  { %v890_v46 = vmul.f32 %v6774_v37, %v889_v61  ;;  %v897_v55 = vrot.slane %v6774_v37, 2  ;;  %v8459_v37 = vld [vmem:[#allocation52_spill] sm:$0xff] }
 0x297   :  { %v8467_v61 = vld [vmem:[#allocation60_spill] sm:$0xff] }
 0x298   :  { %v894_v1 = vadd.f32 %v892_v57, %v890_v46  ;;  %v899_v53 = vsub.f32 1.0, %v897_v55  ;;  %v901_v35 = vmul.f32 %v897_v55, %v7256_v23  ;;  %v8457_v46 = vld [vmem:[#allocation50_spill] sm:$0xff]  ;;  %v8458_v23 = vld [vmem:[#allocation51_spill] sm:$0xff]  ;;  %v8470_v55 = vld [vmem:[#allocation28_spill] sm:$0xff] }
 0x299   :  { %v8468_v57 = vld [vmem:[#allocation26_spill] sm:$0xff] }
 0x29a   :  { %6775 = vtanh.f32 %v894_v1  ;;  %v8469_v1 = vld [vmem:[#allocation27_spill] sm:$0xff] }
 0x2a4   :  { %v6776_v29 = vpop.eup %6775 }
 0x2a5   :  { %v900_v48 = vmul.f32 %v6776_v29, %v899_v53  ;;  %v8471_v53 = vld [vmem:[#allocation29_spill] sm:$0xff]  ;;  %v8472_v29 = vld [vmem:[#allocation30_spill] sm:$0xff] }
 0x2a7   :  { %v7446_v27 = vadd.f32 %v901_v35, %v900_v48  ;;  %v8461_v48 = vld [vmem:[#allocation54_spill] sm:$0xff]  ;;  %v8473_v35 = vld [vmem:[#allocation31_spill] sm:$0xff] }
 0x2a9   :  { %968 = vmatmul.mubr.f32.vlgmr.msra.gmra.mrb[6].mxu0 %v7446_v27  ;;  %4703 = vmatmul.mubr.f32.vlgmr.msra.gmra.mrb[8].mxu1 %v7446_v27 }
 0x2aa   :  { %5653 = vmatpush1.bf16.msra.mxu0 %v7252_v8  ;;  %5684 = vmatpush3.bf16.msra.mxu1 %v8455_v24 }
 0x2ab   :  { %5655 = vmatprep.subr.bf16.mxu0 %v8456_v36  ;;  %5685 = vmatprep.subr.bf16.mxu1 %v8430_v25 }
 0x2ac   :  { %1108 = vmatprep.mubr.f32.mxu0 %v8432_v2  ;;  %4737 = vmatprep.mubr.msk.f32.mxu1 %vm6963_vm0, %v8432_v2 }
 0x2ae   :  { %5657 = vmatpush1.bf16.msra.mxu0 %v8457_v46  ;;  %5687 = vmatpush3.bf16.msra.mxu1 %v8458_v23 }
 0x2af   :  { %5659 = vmatprep.subr.bf16.mxu0 %v8459_v37  ;;  %5688 = vmatprep.subr.bf16.mxu1 %v8430_v25 }
 0x2b2   :  { %5661 = vmatpush1.bf16.msra.mxu0 %v8460_v62  ;;  %5690 = vmatpush3.bf16.msra.mxu1 %v8461_v48 }
 0x2b3   :  { %5663 = vmatprep.subr.bf16.mxu0 %v8462_v52  ;;  %5691 = vmatprep.subr.bf16.mxu1 %v8430_v25 }
 0x2b6   :  { %5665 = vmatpush1.bf16.msra.mxu0 %v8463_v40  ;;  %5693 = vmatpush3.bf16.msra.mxu1 %v8464_v32 }
 0x2b7   :  { %5667 = vmatprep.subr.bf16.mxu0 %v8465_v13  ;;  %5694 = vmatprep.subr.bf16.mxu1 %v8430_v25 }
 0x2ba   :  { %5669 = vmatpush1.bf16.msra.mxu0 %v7297_v58  ;;  %5696 = vmatpush3.bf16.msra.mxu1 %v7299_v54 }
 0x2bb   :  { %5671 = vmatprep.subr.bf16.mxu0 %v8466_v0  ;;  %5697 = vmatprep.subr.bf16.mxu1 %v8430_v25 }
 0x2be   :  { %5673 = vmatpush1.bf16.msra.mxu0 %v8467_v61  ;;  %5699 = vmatpush3.bf16.msra.mxu1 %v7309_v49 }
 0x2bf   :  { %5675 = vmatprep.subr.bf16.mxu0 %v7313_v11  ;;  %5700 = vmatprep.subr.bf16.mxu1 %v8430_v25 }
 0x2c2   :  { %5677 = vmatpush1.bf16.msra.mxu0 %v7317_v18  ;;  %5702 = vmatpush3.bf16.msra.mxu1 %v7319_v14 }
 0x2c3   :  { %5679 = vmatprep.subr.bf16.mxu0 %v7323_v3  ;;  %5703 = vmatprep.subr.bf16.mxu1 %v8430_v25 }
 0x2c6   :  { %5681 = vmatpush1.bf16.msra.mxu0 %v7327_v43  ;;  %5705 = vmatpush3.bf16.msra.mxu1 %v7329_v44 }
 0x2c7   :  { %5707 = vmatprep.subr.bf16.mxu0 %v7066_v5  ;;  %5738 = vmatprep.subr.bf16.mxu1 %v8430_v25 }
 0x2c9   :  { %1109 = vmatmul.mubr.f32.vlgmr.msra.gmra.mrb[6].mxu0 %v7442_v19  ;;  %4738 = vmatmul.mubr.f32.vlgmr.msra.gmra.mrb[10].mxu1 %v7442_v19 }
 0x2ca   :  { %5709 = vmatpush1.bf16.msra.mxu0 %v7068_v9  ;;  %5740 = vmatpush3.bf16.msra.mxu1 %v7088_v31 }
 0x2cb   :  { %5711 = vmatprep.subr.bf16.mxu0 %v7070_v10  ;;  %5741 = vmatprep.subr.bf16.mxu1 %v8430_v25 }
 0x2cc   :  { %1273 = vmatprep.mubr.f32.mxu0 %v8432_v2  ;;  %4772 = vmatprep.mubr.msk.f32.mxu1 %vm6963_vm0, %v8432_v2 }
 0x2ce   :  { %5713 = vmatpush1.bf16.msra.mxu0 %v7074_v15  ;;  %5743 = vmatpush3.bf16.msra.mxu1 %v7094_v38 }
 0x2cf   :  { %5715 = vmatprep.subr.bf16.mxu0 %v7077_v16  ;;  %5744 = vmatprep.subr.bf16.mxu1 %v8430_v25 }
 0x2d2   :  { %5717 = vmatpush1.bf16.msra.mxu0 %v7080_v21  ;;  %5746 = vmatpush3.bf16.msra.mxu1 %v7104_v47 }
 0x2d3   :  { %5719 = vmatprep.subr.bf16.mxu0 %v7083_v22  ;;  %5747 = vmatprep.subr.bf16.mxu1 %v8430_v25 }
 0x2d6   :  { %5721 = vmatpush1.bf16.msra.mxu0 %v7086_v30  ;;  %5749 = vmatpush3.bf16.msra.mxu1 %v7114_v56 }
 0x2d7   :  { %5723 = vmatprep.subr.bf16.mxu0 %v7091_v33  ;;  %5750 = vmatprep.subr.bf16.mxu1 %v8430_v25 }
 0x2da   :  { %5725 = vmatpush1.bf16.msra.mxu0 %v7098_v41  ;;  %5752 = vmatpush3.bf16.msra.mxu1 %v7124_v63 }
 0x2db   :  { %5727 = vmatprep.subr.bf16.mxu0 %v7101_v42  ;;  %5753 = vmatprep.subr.bf16.mxu1 %v8430_v25 }
 0x2de   :  { %5729 = vmatpush1.bf16.msra.mxu0 %v7108_v50  ;;  %5755 = vmatpush3.bf16.msra.mxu1 %v7132_v6  ;;  %v8490_v6 = vld [vmem:[#allocation63_spill] sm:$0xff] }
 0x2df   :  { %5731 = vmatprep.subr.bf16.mxu0 %v7111_v51  ;;  %5756 = vmatprep.subr.bf16.mxu1 %v8430_v25 }
 0x2e2   :  { %5733 = vmatpush1.bf16.msra.mxu0 %v7118_v59  ;;  %5758 = vmatpush3.bf16.msra.mxu1 %v7139_v12  ;;  %v8489_v59 = vld [vmem:[#allocation62_spill] sm:$0xff] }
 0x2e3   :  { %5735 = vmatprep.subr.bf16.mxu0 %v7121_v60  ;;  %5759 = vmatprep.subr.bf16.mxu1 %v8430_v25 }
 0x2e6   :  { %5737 = vmatpush1.bf16.msra.mxu0 %v7128_v4  ;;  %5761 = vmatpush3.bf16.msra.mxu1 %v7145_v17 }
 0x2e7   :  { %5763 = vmatprep.subr.bf16.mxu0 %v7153_v20  ;;  %5794 = vmatprep.subr.bf16.mxu1 %v8430_v25 }
 0x2e9   :  { %1274 = vmatmul.mubr.f32.vlgmr.msra.gmra.mrb[8].mxu0 %v7446_v27  ;;  %4773 = vmatmul.mubr.f32.vlgmr.msra.gmra.mrb[12].mxu1 %v7446_v27 }
 0x2ea   :  { %5765 = vmatpush1.bf16.msra.mxu0 %v7155_v26  ;;  %5796 = vmatpush3.bf16.msra.mxu1 %v7158_v28  ;;  %v8487_v26 = vld [vmem:[#allocation45_spill] sm:$0xff] }
 0x2eb   :  { %5767 = vmatprep.subr.bf16.mxu0 %v7162_v34  ;;  %5797 = vmatprep.subr.bf16.mxu1 %v8430_v25  ;;  %v8474_v34 = vld [vmem:[#allocation32_spill] sm:$0xff] }
 0x2ec   :  { %1446 = vmatprep.mubr.f32.mxu0 %v8432_v2  ;;  %4807 = vmatprep.mubr.msk.f32.mxu1 %vm6963_vm0, %v8432_v2 }
 0x2ee   :  { %5769 = vmatpush1.bf16.msra.mxu0 %v7165_v39  ;;  %5799 = vmatpush3.bf16.msra.mxu1 %v7168_v45  ;;  %v8475_v45 = vld [vmem:[#allocation33_spill] sm:$0xff]  ;;  %v8477_v39 = vld [vmem:[#allocation35_spill] sm:$0xff] }
 0x2ef   :  { %5771 = vmatprep.subr.bf16.mxu0 %v8468_v57  ;;  %5800 = vmatprep.subr.bf16.mxu1 %v8430_v25  ;;  %v8476_v57 = vld [vmem:[#allocation34_spill] sm:$0xff] }
 0x2f2   :  { %5773 = vmatpush1.bf16.msra.mxu0 %v8469_v1  ;;  %5802 = vmatpush3.bf16.msra.mxu1 %v8470_v55  ;;  %v8478_v55 = vld [vmem:[#allocation36_spill] sm:$0xff]  ;;  %v8480_v1 = vld [vmem:[#allocation38_spill] sm:$0xff] }
 0x2f3   :  { %5775 = vmatprep.subr.bf16.mxu0 %v8471_v53  ;;  %5803 = vmatprep.subr.bf16.mxu1 %v8430_v25  ;;  %v8479_v53 = vld [vmem:[#allocation37_spill] sm:$0xff] }
 0x2f6   :  { %5777 = vmatpush1.bf16.msra.mxu0 %v8472_v29  ;;  %5805 = vmatpush3.bf16.msra.mxu1 %v8473_v35  ;;  %v8481_v35 = vld [vmem:[#allocation39_spill] sm:$0xff]  ;;  %v8483_v29 = vld [vmem:[#allocation41_spill] sm:$0xff] }
 0x2f7   :  { %5779 = vmatprep.subr.bf16.mxu0 %v8474_v34  ;;  %5806 = vmatprep.subr.bf16.mxu1 %v8430_v25  ;;  %v8482_v34 = vld [vmem:[#allocation40_spill] sm:$0xff] }
 0x2fa   :  { %5781 = vmatpush1.bf16.msra.mxu0 %v8475_v45  ;;  %5808 = vmatpush3.bf16.msra.mxu1 %v8476_v57  ;;  %v8484_v57 = vld [vmem:[#allocation42_spill] sm:$0xff]  ;;  %v8486_v45 = vld [vmem:[#allocation44_spill] sm:$0xff] }
 0x2fb   :  { %5783 = vmatprep.subr.bf16.mxu0 %v8477_v39  ;;  %5809 = vmatprep.subr.bf16.mxu1 %v8430_v25  ;;  %v8485_v39 = vld [vmem:[#allocation43_spill] sm:$0xff] }
 0x2fe   :  { %5785 = vmatpush1.bf16.msra.mxu0 %v8478_v55  ;;  %5811 = vmatpush3.bf16.msra.mxu1 %v8479_v53 }
 0x2ff   :  { %5787 = vmatprep.subr.bf16.mxu0 %v8480_v1  ;;  %5812 = vmatprep.subr.bf16.mxu1 %v8430_v25 }
 0x302   :  { %5789 = vmatpush1.bf16.msra.mxu0 %v8481_v35  ;;  %5814 = vmatpush3.bf16.msra.mxu1 %v8482_v34 }
 0x303   :  { %5791 = vmatprep.subr.bf16.mxu0 %v8483_v29  ;;  %5815 = vmatprep.subr.bf16.mxu1 %v8430_v25  ;;  %v8488_v29 = vld [vmem:[#allocation61_spill] sm:$0xff] }
 0x306   :  { %5793 = vmatpush1.bf16.msra.mxu0 %v8484_v57  ;;  %5817 = vmatpush3.bf16.msra.mxu1 %v8485_v39 }
 0x307   :  { %5819 = vmatprep.subr.bf16.mxu0 %v8486_v45  ;;  %5850 = vmatprep.subr.bf16.mxu1 %v8430_v25 }
 0x37c   :  { %v1040_v53 = vpop.f32.mrb[8].mxu1 }
 0x37d   :  { %v4704_v1 = vpop.f32.mrb[9].mxu1  ;;  %v1041_v50 = vadd.f32 %v1040_v53, %v8490_v6 }
 0x39c   :  { %v1110_v55 = vpop.f32.mrb[6].mxu0  ;;  %v1181_v28 = vpop.f32.mrb[10].mxu1 }
 0x39d   :  { %v6716_v35 = vadd.f32 %v1110_v55, %v8487_v26  ;;  %v1112_v20 = vpop.f32.mrb[7].mxu0  ;;  %v4739_v34 = vpop.f32.mrb[11].mxu1  ;;  %v1199_v51 = vadd.f32 %v8489_v59, %v1181_v28 }
 0x39e   :  { %v6717_v4 = vadd.f32 %v1112_v20, %v8488_v29 }
 0x39f   :  { %v4096_v17 = vmul.f32 -1.442695, %v6716_v35 }
 0x3a0   :  { %v4097_v60 = vmul.f32 -1.442695, %v6717_v4 }
 0x3a1   :  { %6777 = vpow2.f32 %v4096_v17 }
 0x3a2   :  { %6779 = vpow2.f32 %v4097_v60  ;;  %v4098_v60 = vld [vmem:[%s8257_s0 + $0xc] sm:$0x3f] }
 0x3ab   :  { %v6778_v57 = vpop.eup %6777 }
 0x3ac   :  { %v1193_v39 = vadd.f32 1.0, %v6778_v57  ;;  %v6780_v45 = vpop.eup %6779 }
 0x3ad   :  { %v1194_v12 = vadd.f32 1.0, %v6780_v45 }
 0x3ae   :  { %6781 = vrcp.f32 %v1193_v39  ;;  %v8491_v39 = vld [vmem:[#allocation46_spill] sm:$0xff] }
 0x3af   :  { %6783 = vrcp.f32 %v1194_v12 }
 0x3b8   :  { %v6782_v1 = vpop.eup %6781 }
 0x3b9   :  { %v1200_v42 = vmul.f32 %v6782_v1, %v1199_v51  ;;  %v6784_v28 = vpop.eup %6783 }
 0x3ba   :  { %v1203_v53 = vsub.f32 1.0, %v6784_v28 }
 0x3bb   :  { %v1201_v55 = vadd.f32 %v1200_v42, %v1041_v50  ;;  %v1205_v42 = vmul.f32 %v6784_v28, %v7442_v19  ;;  %v8493_v19 = vld [vmem:[#allocation11_spill] sm:$0xff]  ;;  %v8499_v28 = vld [vmem:[#allocation16_spill] sm:$0xff] }
 0x3bc   :  { %v1275_v34 = vpop.f32.mrb[8].mxu0  ;;  %v1346_v35 = vpop.f32.mrb[12].mxu1 }
 0x3bd   :  { %6785 = vtanh.f32 %v1201_v55  ;;  %v1277_v20 = vpop.f32.mrb[9].mxu0  ;;  %v4774_v17 = vpop.f32.mrb[13].mxu1 }
 0x3be   :  { %v1352_v4 = vcombine.low %v1275_v34, %v1277_v20  ;;  %v1368_v34 = vadd.f32 %v8454_v7, %v1346_v35  ;;  %v1371_v20 = vrot.slane %v4098_v60, 4  ;;  %v8494_v7 = vld [vmem:[#allocation17_spill] sm:$0xff] }
 0x3bf   :  { %v8496_v35 = vld [vmem:[#allocation13_spill] sm:$0xff] }
 0x3c0   :  { %v1359_v45 = vrot.slane %v1352_v4, %v8491_v39 }
 0x3c2   :  { %v1361_v57 = vadd.f32 %v4098_v60, %v1359_v45  ;;  %v8497_v60 = vld [vmem:[#allocation18_spill] sm:$0xff] }
 0x3c4   :  { %v4099_v59 = vmul.f32 -1.442695, %v1361_v57 }
 0x3c6   :  { %6787 = vpow2.f32 %v4099_v59 }
 0x3c7   :  { %v6786_v51 = vpop.eup %6785 }
 0x3c8   :  { %v1204_v12 = vmul.f32 %v6786_v51, %v1203_v53 }
 0x3ca   :  { %v7568_v50 = vadd.f32 %v1205_v42, %v1204_v12  ;;  %v8500_v12 = vld [vmem:[#allocation19_spill] sm:$0xff]  ;;  %v8501_v42 = vld [vmem:[#allocation20_spill] sm:$0xff] }
 0x3d0   :  { %v6788_v1 = vpop.eup %6787 }
 0x3d1   :  { %v1365_v55 = vadd.f32 1.0, %v6788_v1  ;;  %v8502_v1 = vld [vmem:[#allocation21_spill] sm:$0xff] }
 0x3d3   :  { %6789 = vrcp.f32 %v1365_v55  ;;  %v8503_v55 = vld [vmem:[#allocation22_spill] sm:$0xff] }
 0x3dd   :  { %v6790_v17 = vpop.eup %6789 }
 0x3de   :  { %v1369_v6 = vmul.f32 %v6790_v17, %v1368_v34  ;;  %v1376_v45 = vrot.slane %v6790_v17, 2  ;;  %v8504_v34 = vld [vmem:[#allocation23_spill] sm:$0xff]  ;;  %v8506_v17 = vld [vmem:[#allocation25_spill] sm:$0xff] }
 0x3e0   :  { %v1373_v4 = vadd.f32 %v1371_v20, %v1369_v6  ;;  %v1378_v57 = vsub.f32 1.0, %v1376_v45  ;;  %v1380_v53 = vmul.f32 %v1376_v45, %v7446_v27  ;;  %v8492_v6 = vld [vmem:[#allocation10_spill] sm:$0xff]  ;;  %v8495_v27 = vld [vmem:[#allocation12_spill] sm:$0xff]  ;;  %v8508_v45 = vld [vmem:[#allocation27_spill] sm:$0xff] }
 0x3e1   :  { %v8505_v20 = vld [vmem:[#allocation24_spill] sm:$0xff] }
 0x3e2   :  { %6791 = vtanh.f32 %v1373_v4  ;;  %v8507_v4 = vld [vmem:[#allocation26_spill] sm:$0xff] }
 0x3ec   :  { %v6792_v59 = vpop.eup %6791 }
 0x3ed   :  { %v1379_v39 = vmul.f32 %v6792_v59, %v1378_v57  ;;  %v8509_v57 = vld [vmem:[#allocation28_spill] sm:$0xff]  ;;  %v8510_v59 = vld [vmem:[#allocation29_spill] sm:$0xff] }
 0x3ef   :  { %v7572_v51 = vadd.f32 %v1380_v53, %v1379_v39  ;;  %v8498_v39 = vld [vmem:[#allocation14_spill] sm:$0xff] }
 0x3f0   :  { %v8511_v53 = vld [vmem:[#allocation30_spill] sm:$0xff] }
 0x3f1   :  { %1447 = vmatmul.mubr.f32.vlgmr.msra.gmra.mrb[10].mxu0 %v7572_v51  ;;  %4808 = vmatmul.mubr.f32.vlgmr.msra.gmra.mrb[14].mxu1 %v7572_v51 }
 0x3f2   :  { %5821 = vmatpush1.bf16.msra.mxu0 %v7252_v8  ;;  %5852 = vmatpush3.bf16.msra.mxu1 %v8455_v24 }
 0x3f3   :  { %5823 = vmatprep.subr.bf16.mxu0 %v8456_v36  ;;  %5853 = vmatprep.subr.bf16.mxu1 %v8430_v25 }
 0x3f4   :  { %1587 = vmatprep.mubr.f32.mxu0 %v8432_v2  ;;  %4842 = vmatprep.mubr.msk.f32.mxu1 %vm6963_vm0, %v8432_v2 }
 0x3f6   :  { %5825 = vmatpush1.bf16.msra.mxu0 %v8457_v46  ;;  %5855 = vmatpush3.bf16.msra.mxu1 %v8458_v23 }
 0x3f7   :  { %5827 = vmatprep.subr.bf16.mxu0 %v8459_v37  ;;  %5856 = vmatprep.subr.bf16.mxu1 %v8430_v25 }
 0x3fa   :  { %5829 = vmatpush1.bf16.msra.mxu0 %v8460_v62  ;;  %5858 = vmatpush3.bf16.msra.mxu1 %v8461_v48 }
 0x3fb   :  { %5831 = vmatprep.subr.bf16.mxu0 %v8462_v52  ;;  %5859 = vmatprep.subr.bf16.mxu1 %v8430_v25 }
 0x3fe   :  { %5833 = vmatpush1.bf16.msra.mxu0 %v8463_v40  ;;  %5861 = vmatpush3.bf16.msra.mxu1 %v8464_v32 }
 0x3ff   :  { %5835 = vmatprep.subr.bf16.mxu0 %v8465_v13  ;;  %5862 = vmatprep.subr.bf16.mxu1 %v8430_v25 }
 0x402   :  { %5837 = vmatpush1.bf16.msra.mxu0 %v7297_v58  ;;  %5864 = vmatpush3.bf16.msra.mxu1 %v7299_v54 }
 0x403   :  { %5839 = vmatprep.subr.bf16.mxu0 %v8466_v0  ;;  %5865 = vmatprep.subr.bf16.mxu1 %v8430_v25 }
 0x406   :  { %5841 = vmatpush1.bf16.msra.mxu0 %v8467_v61  ;;  %5867 = vmatpush3.bf16.msra.mxu1 %v7309_v49 }
 0x407   :  { %5843 = vmatprep.subr.bf16.mxu0 %v7313_v11  ;;  %5868 = vmatprep.subr.bf16.mxu1 %v8430_v25 }
 0x40a   :  { %5845 = vmatpush1.bf16.msra.mxu0 %v7317_v18  ;;  %5870 = vmatpush3.bf16.msra.mxu1 %v7319_v14 }
 0x40b   :  { %5847 = vmatprep.subr.bf16.mxu0 %v7323_v3  ;;  %5871 = vmatprep.subr.bf16.mxu1 %v8430_v25 }
 0x40e   :  { %5849 = vmatpush1.bf16.msra.mxu0 %v7327_v43  ;;  %5873 = vmatpush3.bf16.msra.mxu1 %v7329_v44 }
 0x40f   :  { %5875 = vmatprep.subr.bf16.mxu0 %v7066_v5  ;;  %5906 = vmatprep.subr.bf16.mxu1 %v8430_v25 }
 0x411   :  { %1588 = vmatmul.mubr.f32.vlgmr.msra.gmra.mrb[10].mxu0 %v7568_v50  ;;  %4843 = vmatmul.mubr.f32.vlgmr.msra.gmra.mrb[16].mxu1 %v7568_v50 }
 0x412   :  { %5877 = vmatpush1.bf16.msra.mxu0 %v7068_v9  ;;  %5908 = vmatpush3.bf16.msra.mxu1 %v7088_v31 }
 0x413   :  { %5879 = vmatprep.subr.bf16.mxu0 %v7070_v10  ;;  %5909 = vmatprep.subr.bf16.mxu1 %v8430_v25 }
 0x414   :  { %1752 = vmatprep.mubr.f32.mxu0 %v8432_v2  ;;  %4877 = vmatprep.mubr.msk.f32.mxu1 %vm6963_vm0, %v8432_v2 }
 0x416   :  { %5881 = vmatpush1.bf16.msra.mxu0 %v7074_v15  ;;  %5911 = vmatpush3.bf16.msra.mxu1 %v7094_v38 }
 0x417   :  { %5883 = vmatprep.subr.bf16.mxu0 %v7077_v16  ;;  %5912 = vmatprep.subr.bf16.mxu1 %v8430_v25 }
 0x41a   :  { %5885 = vmatpush1.bf16.msra.mxu0 %v7080_v21  ;;  %5914 = vmatpush3.bf16.msra.mxu1 %v7104_v47 }
 0x41b   :  { %5887 = vmatprep.subr.bf16.mxu0 %v7083_v22  ;;  %5915 = vmatprep.subr.bf16.mxu1 %v8430_v25 }
 0x41e   :  { %5889 = vmatpush1.bf16.msra.mxu0 %v7086_v30  ;;  %5917 = vmatpush3.bf16.msra.mxu1 %v7114_v56 }
 0x41f   :  { %5891 = vmatprep.subr.bf16.mxu0 %v7091_v33  ;;  %5918 = vmatprep.subr.bf16.mxu1 %v8430_v25 }
 0x422   :  { %5893 = vmatpush1.bf16.msra.mxu0 %v7098_v41  ;;  %5920 = vmatpush3.bf16.msra.mxu1 %v7124_v63 }
 0x423   :  { %5895 = vmatprep.subr.bf16.mxu0 %v8492_v6  ;;  %5921 = vmatprep.subr.bf16.mxu1 %v8430_v25 }
 0x426   :  { %5897 = vmatpush1.bf16.msra.mxu0 %v8493_v19  ;;  %5923 = vmatpush3.bf16.msra.mxu1 %v8494_v7 }
 0x427   :  { %5899 = vmatprep.subr.bf16.mxu0 %v8495_v27  ;;  %5924 = vmatprep.subr.bf16.mxu1 %v8430_v25  ;;  %v8527_v27 = vld [vmem:[#allocation63_spill] sm:$0xff] }
 0x42a   :  { %5901 = vmatpush1.bf16.msra.mxu0 %v8496_v35  ;;  %5926 = vmatpush3.bf16.msra.mxu1 %v8497_v60  ;;  %v8526_v60 = vld [vmem:[#allocation62_spill] sm:$0xff] }
 0x42b   :  { %5903 = vmatprep.subr.bf16.mxu0 %v8498_v39  ;;  %5927 = vmatprep.subr.bf16.mxu1 %v8430_v25 }
 0x42e   :  { %5905 = vmatpush1.bf16.msra.mxu0 %v8499_v28  ;;  %5929 = vmatpush3.bf16.msra.mxu1 %v8500_v12 }
 0x42f   :  { %5931 = vmatprep.subr.bf16.mxu0 %v8501_v42  ;;  %5962 = vmatprep.subr.bf16.mxu1 %v8430_v25 }
 0x431   :  { %1753 = vmatmul.mubr.f32.vlgmr.msra.gmra.mrb[12].mxu0 %v7572_v51  ;;  %4878 = vmatmul.mubr.f32.vlgmr.msra.gmra.mrb[18].mxu1 %v7572_v51 }
 0x432   :  { %5933 = vmatpush1.bf16.msra.mxu0 %v8502_v1  ;;  %5964 = vmatpush3.bf16.msra.mxu1 %v8503_v55  ;;  %v8513_v55 = vld [vmem:[#allocation32_spill] sm:$0xff] }
 0x433   :  { %5935 = vmatprep.subr.bf16.mxu0 %v8504_v34  ;;  %5965 = vmatprep.subr.bf16.mxu1 %v8430_v25  ;;  %v8512_v34 = vld [vmem:[#allocation31_spill] sm:$0xff] }
 0x434   :  { %1925 = vmatprep.mubr.f32.mxu0 %v8432_v2  ;;  %4912 = vmatprep.mubr.msk.f32.mxu1 %vm6963_vm0, %v8432_v2 }
 0x436   :  { %5937 = vmatpush1.bf16.msra.mxu0 %v8505_v20  ;;  %5967 = vmatpush3.bf16.msra.mxu1 %v8506_v17  ;;  %v8514_v17 = vld [vmem:[#allocation33_spill] sm:$0xff]  ;;  %v8516_v20 = vld [vmem:[#allocation35_spill] sm:$0xff] }
 0x437   :  { %5939 = vmatprep.subr.bf16.mxu0 %v8507_v4  ;;  %5968 = vmatprep.subr.bf16.mxu1 %v8430_v25  ;;  %v8515_v4 = vld [vmem:[#allocation34_spill] sm:$0xff] }
 0x43a   :  { %5941 = vmatpush1.bf16.msra.mxu0 %v8508_v45  ;;  %5970 = vmatpush3.bf16.msra.mxu1 %v8509_v57  ;;  %v8517_v57 = vld [vmem:[#allocation36_spill] sm:$0xff]  ;;  %v8519_v45 = vld [vmem:[#allocation38_spill] sm:$0xff] }
 0x43b   :  { %5943 = vmatprep.subr.bf16.mxu0 %v8510_v59  ;;  %5971 = vmatprep.subr.bf16.mxu1 %v8430_v25  ;;  %v8518_v59 = vld [vmem:[#allocation37_spill] sm:$0xff] }
 0x43e   :  { %5945 = vmatpush1.bf16.msra.mxu0 %v8511_v53  ;;  %5973 = vmatpush3.bf16.msra.mxu1 %v8512_v34  ;;  %v8520_v34 = vld [vmem:[#allocation39_spill] sm:$0xff]  ;;  %v8522_v53 = vld [vmem:[#allocation41_spill] sm:$0xff] }
 0x43f   :  { %5947 = vmatprep.subr.bf16.mxu0 %v8513_v55  ;;  %5974 = vmatprep.subr.bf16.mxu1 %v8430_v25  ;;  %v8521_v55 = vld [vmem:[#allocation40_spill] sm:$0xff] }
 0x442   :  { %5949 = vmatpush1.bf16.msra.mxu0 %v8514_v17  ;;  %5976 = vmatpush3.bf16.msra.mxu1 %v8515_v4  ;;  %v8523_v4 = vld [vmem:[#allocation42_spill] sm:$0xff]  ;;  %v8525_v17 = vld [vmem:[#allocation44_spill] sm:$0xff] }
 0x443   :  { %5951 = vmatprep.subr.bf16.mxu0 %v8516_v20  ;;  %5977 = vmatprep.subr.bf16.mxu1 %v8430_v25  ;;  %v8524_v20 = vld [vmem:[#allocation43_spill] sm:$0xff] }
 0x446   :  { %5953 = vmatpush1.bf16.msra.mxu0 %v8517_v57  ;;  %5979 = vmatpush3.bf16.msra.mxu1 %v8518_v59 }
 0x447   :  { %5955 = vmatprep.subr.bf16.mxu0 %v8519_v45  ;;  %5980 = vmatprep.subr.bf16.mxu1 %v8430_v25 }
 0x44a   :  { %5957 = vmatpush1.bf16.msra.mxu0 %v8520_v34  ;;  %5982 = vmatpush3.bf16.msra.mxu1 %v8521_v55 }
 0x44b   :  { %5959 = vmatprep.subr.bf16.mxu0 %v8522_v53  ;;  %5983 = vmatprep.subr.bf16.mxu1 %v8430_v25 }
 0x44e   :  { %5961 = vmatpush1.bf16.msra.mxu0 %v8523_v4  ;;  %5985 = vmatpush3.bf16.msra.mxu1 %v8524_v20 }
 0x44f   :  { %5987 = vmatprep.subr.bf16.mxu0 %v8525_v17  ;;  %6018 = vmatprep.subr.bf16.mxu1 %v8430_v25 }
 0x4c4   :  { %v1519_v59 = vpop.f32.mrb[14].mxu1 }
 0x4c5   :  { %v4809_v45 = vpop.f32.mrb[15].mxu1  ;;  %v1520_v7 = vadd.f32 %v1519_v59, %v8527_v27 }
 0x4e4   :  { %v1589_v57 = vpop.f32.mrb[10].mxu0  ;;  %v1660_v1 = vpop.f32.mrb[16].mxu1 }
 0x4e5   :  { %v6718_v34 = vadd.f32 %v1589_v57, %v8487_v26  ;;  %v1591_v42 = vpop.f32.mrb[11].mxu0  ;;  %v4844_v55 = vpop.f32.mrb[17].mxu1  ;;  %v1678_v35 = vadd.f32 %v8526_v60, %v1660_v1 }
 0x4e6   :  { %v6719_v53 = vadd.f32 %v1591_v42, %v8488_v29 }
 0x4e7   :  { %v4100_v12 = vmul.f32 -1.442695, %v6718_v34 }
 0x4e8   :  { %v4101_v28 = vmul.f32 -1.442695, %v6719_v53 }
 0x4e9   :  { %6793 = vpow2.f32 %v4100_v12 }
 0x4ea   :  { %6795 = vpow2.f32 %v4101_v28  ;;  %v4102_v28 = vld [vmem:[%s8257_s0 + $0x12] sm:$0x3f] }
 0x4f3   :  { %v6794_v4 = vpop.eup %6793 }
 0x4f4   :  { %v1672_v20 = vadd.f32 1.0, %v6794_v4  ;;  %v6796_v17 = vpop.eup %6795 }
 0x4f5   :  { %v1673_v39 = vadd.f32 1.0, %v6796_v17 }
 0x4f6   :  { %6797 = vrcp.f32 %v1672_v20  ;;  %v8528_v20 = vld [vmem:[#allocation46_spill] sm:$0xff] }
 0x4f7   :  { %6799 = vrcp.f32 %v1673_v39 }
 0x500   :  { %v6798_v45 = vpop.eup %6797 }
 0x501   :  { %v1679_v19 = vmul.f32 %v6798_v45, %v1678_v35  ;;  %v6800_v1 = vpop.eup %6799 }
 0x502   :  { %v1682_v59 = vsub.f32 1.0, %v6800_v1 }
 0x503   :  { %v1680_v57 = vadd.f32 %v1679_v19, %v1520_v7  ;;  %v1684_v19 = vmul.f32 %v6800_v1, %v7568_v50 }
 0x504   :  { %v1754_v55 = vpop.f32.mrb[12].mxu0  ;;  %v1825_v34 = vpop.f32.mrb[18].mxu1 }
 0x505   :  { %6801 = vtanh.f32 %v1680_v57  ;;  %v1756_v42 = vpop.f32.mrb[13].mxu0  ;;  %v4879_v12 = vpop.f32.mrb[19].mxu1 }
 0x506   :  { %v1831_v53 = vcombine.low %v1754_v55, %v1756_v42  ;;  %v7699_v55 = vld [vmem:[%s8259_s2] ss:$0 sm:$0xff]  ;;  %v1850_v12 = vrot.slane %v4102_v28, 4 }
 0x507   :  { %v1847_v42 = vadd.f32 %v7699_v55, %v1825_v34  ;;  %v8530_v34 = vld [vmem:[#allocation17_spill] sm:$0xff] }
 0x508   :  { %v1838_v17 = vrot.slane %v1831_v53, %v8528_v20 }
 0x50a   :  { %v1840_v4 = vadd.f32 %v4102_v28, %v1838_v17  ;;  %v8531_v28 = vld [vmem:[#allocation12_spill] sm:$0xff] }
 0x50c   :  { %v4103_v60 = vmul.f32 -1.442695, %v1840_v4 }
 0x50e   :  { %6803 = vpow2.f32 %v4103_v60 }
 0x50f   :  { %v6802_v35 = vpop.eup %6801 }
 0x510   :  { %v1683_v39 = vmul.f32 %v6802_v35, %v1682_v59 }
 0x512   :  { %v7694_v7 = vadd.f32 %v1684_v19, %v1683_v39  ;;  %v8532_v19 = vld [vmem:[#allocation13_spill] sm:$0xff] }
 0x518   :  { %v6804_v45 = vpop.eup %6803 }
 0x519   :  { %v1844_v57 = vadd.f32 1.0, %v6804_v45  ;;  %v8533_v45 = vld [vmem:[#allocation18_spill] sm:$0xff] }
 0x51b   :  { %6805 = vrcp.f32 %v1844_v57  ;;  %v8534_v57 = vld [vmem:[#allocation14_spill] sm:$0xff] }
 0x525   :  { %v6806_v53 = vpop.eup %6805 }
 0x526   :  { %v1848_v60 = vmul.f32 %v6806_v53, %v1847_v42  ;;  %v1855_v4 = vrot.slane %v6806_v53, 2  ;;  %v8535_v42 = vld [vmem:[#allocation16_spill] sm:$0xff] }
 0x527   :  { %v8537_v53 = vld [vmem:[#allocation20_spill] sm:$0xff] }
 0x528   :  { %v1852_v17 = vadd.f32 %v1850_v12, %v1848_v60  ;;  %v1857_v59 = vsub.f32 1.0, %v1855_v4  ;;  %v1859_v35 = vmul.f32 %v1855_v4, %v7572_v51  ;;  %v8529_v51 = vld [vmem:[#allocation11_spill] sm:$0xff]  ;;  %v8538_v60 = vld [vmem:[#allocation21_spill] sm:$0xff] }
 0x529   :  { %v8536_v12 = vld [vmem:[#allocation19_spill] sm:$0xff] }
 0x52a   :  { %6807 = vtanh.f32 %v1852_v17  ;;  %v8539_v17 = vld [vmem:[#allocation22_spill] sm:$0xff]  ;;  %v8540_v4 = vld [vmem:[#allocation23_spill] sm:$0xff] }
 0x534   :  { %v6808_v50 = vpop.eup %6807 }
 0x535   :  { %v1858_v1 = vmul.f32 %v6808_v50, %v1857_v59  ;;  %v8541_v59 = vld [vmem:[#allocation24_spill] sm:$0xff]  ;;  %v8542_v50 = vld [vmem:[#allocation25_spill] sm:$0xff] }
 0x537   :  { %v7703_v39 = vadd.f32 %v1859_v35, %v1858_v1  ;;  %v8543_v1 = vld [vmem:[#allocation26_spill] sm:$0xff]  ;;  %v8544_v35 = vld [vmem:[#allocation27_spill] sm:$0xff] }
 0x539   :  { %1926 = vmatmul.mubr.f32.vlgmr.msra.gmra.mrb[14].mxu0 %v7703_v39  ;;  %4913 = vmatmul.mubr.f32.vlgmr.msra.gmra.mrb[20].mxu1 %v7703_v39 }
 0x53a   :  { %5989 = vmatpush1.bf16.msra.mxu0 %v7252_v8  ;;  %6020 = vmatpush3.bf16.msra.mxu1 %v8455_v24 }
 0x53b   :  { %5991 = vmatprep.subr.bf16.mxu0 %v8456_v36  ;;  %6021 = vmatprep.subr.bf16.mxu1 %v8430_v25 }
 0x53c   :  { %2066 = vmatprep.mubr.f32.mxu0 %v8432_v2  ;;  %4947 = vmatprep.mubr.msk.f32.mxu1 %vm6963_vm0, %v8432_v2 }
 0x53e   :  { %5993 = vmatpush1.bf16.msra.mxu0 %v8457_v46  ;;  %6023 = vmatpush3.bf16.msra.mxu1 %v8458_v23 }
 0x53f   :  { %5995 = vmatprep.subr.bf16.mxu0 %v8459_v37  ;;  %6024 = vmatprep.subr.bf16.mxu1 %v8430_v25 }
 0x542   :  { %5997 = vmatpush1.bf16.msra.mxu0 %v8460_v62  ;;  %6026 = vmatpush3.bf16.msra.mxu1 %v8461_v48 }
 0x543   :  { %5999 = vmatprep.subr.bf16.mxu0 %v8462_v52  ;;  %6027 = vmatprep.subr.bf16.mxu1 %v8430_v25 }
 0x546   :  { %6001 = vmatpush1.bf16.msra.mxu0 %v8463_v40  ;;  %6029 = vmatpush3.bf16.msra.mxu1 %v8464_v32 }
 0x547   :  { %6003 = vmatprep.subr.bf16.mxu0 %v8465_v13  ;;  %6030 = vmatprep.subr.bf16.mxu1 %v8430_v25 }
 0x54a   :  { %6005 = vmatpush1.bf16.msra.mxu0 %v7297_v58  ;;  %6032 = vmatpush3.bf16.msra.mxu1 %v7299_v54 }
 0x54b   :  { %6007 = vmatprep.subr.bf16.mxu0 %v8466_v0  ;;  %6033 = vmatprep.subr.bf16.mxu1 %v8430_v25 }
 0x54e   :  { %6009 = vmatpush1.bf16.msra.mxu0 %v8467_v61  ;;  %6035 = vmatpush3.bf16.msra.mxu1 %v7309_v49 }
 0x54f   :  { %6011 = vmatprep.subr.bf16.mxu0 %v7313_v11  ;;  %6036 = vmatprep.subr.bf16.mxu1 %v8430_v25 }
 0x552   :  { %6013 = vmatpush1.bf16.msra.mxu0 %v7317_v18  ;;  %6038 = vmatpush3.bf16.msra.mxu1 %v7319_v14 }
 0x553   :  { %6015 = vmatprep.subr.bf16.mxu0 %v7323_v3  ;;  %6039 = vmatprep.subr.bf16.mxu1 %v8430_v25 }
 0x556   :  { %6017 = vmatpush1.bf16.msra.mxu0 %v7327_v43  ;;  %6041 = vmatpush3.bf16.msra.mxu1 %v7329_v44 }
 0x557   :  { %6043 = vmatprep.subr.bf16.mxu0 %v7066_v5  ;;  %6074 = vmatprep.subr.bf16.mxu1 %v8430_v25 }
 0x559   :  { %2067 = vmatmul.mubr.f32.vlgmr.msra.gmra.mrb[14].mxu0 %v7694_v7  ;;  %4948 = vmatmul.mubr.f32.vlgmr.msra.gmra.mrb[22].mxu1 %v7694_v7 }
 0x55a   :  { %6045 = vmatpush1.bf16.msra.mxu0 %v7068_v9  ;;  %6076 = vmatpush3.bf16.msra.mxu1 %v7088_v31 }
 0x55b   :  { %6047 = vmatprep.subr.bf16.mxu0 %v7070_v10  ;;  %6077 = vmatprep.subr.bf16.mxu1 %v8430_v25 }
 0x55c   :  { %2231 = vmatprep.mubr.f32.mxu0 %v8432_v2  ;;  %4982 = vmatprep.mubr.msk.f32.mxu1 %vm6963_vm0, %v8432_v2 }
 0x55e   :  { %6049 = vmatpush1.bf16.msra.mxu0 %v7074_v15  ;;  %6079 = vmatpush3.bf16.msra.mxu1 %v7094_v38 }
 0x55f   :  { %6051 = vmatprep.subr.bf16.mxu0 %v7077_v16  ;;  %6080 = vmatprep.subr.bf16.mxu1 %v8430_v25 }
 0x562   :  { %6053 = vmatpush1.bf16.msra.mxu0 %v7080_v21  ;;  %6082 = vmatpush3.bf16.msra.mxu1 %v7104_v47 }
 0x563   :  { %6055 = vmatprep.subr.bf16.mxu0 %v7083_v22  ;;  %6083 = vmatprep.subr.bf16.mxu1 %v8430_v25 }
 0x566   :  { %6057 = vmatpush1.bf16.msra.mxu0 %v7086_v30  ;;  %6085 = vmatpush3.bf16.msra.mxu1 %v7114_v56 }
 0x567   :  { %6059 = vmatprep.subr.bf16.mxu0 %v7091_v33  ;;  %6086 = vmatprep.subr.bf16.mxu1 %v8430_v25 }
 0x56a   :  { %6061 = vmatpush1.bf16.msra.mxu0 %v7098_v41  ;;  %6088 = vmatpush3.bf16.msra.mxu1 %v7124_v63 }
 0x56b   :  { %6063 = vmatprep.subr.bf16.mxu0 %v8492_v6  ;;  %6089 = vmatprep.subr.bf16.mxu1 %v8430_v25 }
 0x56e   :  { %6065 = vmatpush1.bf16.msra.mxu0 %v8529_v51  ;;  %6091 = vmatpush3.bf16.msra.mxu1 %v8530_v34  ;;  %v8562_v34 = vld [vmem:[#allocation62_spill] sm:$0xff] }
 0x56f   :  { %6067 = vmatprep.subr.bf16.mxu0 %v8531_v28  ;;  %6092 = vmatprep.subr.bf16.mxu1 %v8430_v25 }
 0x572   :  { %6069 = vmatpush1.bf16.msra.mxu0 %v8532_v19  ;;  %6094 = vmatpush3.bf16.msra.mxu1 %v8533_v45 }
 0x573   :  { %6071 = vmatprep.subr.bf16.mxu0 %v8534_v57  ;;  %6095 = vmatprep.subr.bf16.mxu1 %v8430_v25 }
 0x576   :  { %6073 = vmatpush1.bf16.msra.mxu0 %v8535_v42  ;;  %6097 = vmatpush3.bf16.msra.mxu1 %v8536_v12  ;;  %v8549_v12 = vld [vmem:[#allocation32_spill] sm:$0xff] }
 0x577   :  { %6099 = vmatprep.subr.bf16.mxu0 %v8537_v53  ;;  %6130 = vmatprep.subr.bf16.mxu1 %v8430_v25  ;;  %v8548_v53 = vld [vmem:[#allocation31_spill] sm:$0xff] }
 0x579   :  { %2232 = vmatmul.mubr.f32.vlgmr.msra.gmra.mrb[16].mxu0 %v7703_v39  ;;  %4983 = vmatmul.mubr.f32.vlgmr.msra.gmra.mrb[24].mxu1 %v7703_v39 }
 0x57a   :  { %6101 = vmatpush1.bf16.msra.mxu0 %v8538_v60  ;;  %6132 = vmatpush3.bf16.msra.mxu1 %v8539_v17  ;;  %v8545_v17 = vld [vmem:[#allocation28_spill] sm:$0xff]  ;;  %v8547_v60 = vld [vmem:[#allocation30_spill] sm:$0xff] }
 0x57b   :  { %6103 = vmatprep.subr.bf16.mxu0 %v8540_v4  ;;  %6133 = vmatprep.subr.bf16.mxu1 %v8430_v25  ;;  %v8546_v4 = vld [vmem:[#allocation29_spill] sm:$0xff] }
 0x57c   :  { %2404 = vmatprep.mubr.f32.mxu0 %v8432_v2  ;;  %5017 = vmatprep.mubr.msk.f32.mxu1 %vm6963_vm0, %v8432_v2 }
 0x57e   :  { %6105 = vmatpush1.bf16.msra.mxu0 %v8541_v59  ;;  %6135 = vmatpush3.bf16.msra.mxu1 %v8542_v50  ;;  %v8550_v50 = vld [vmem:[#allocation33_spill] sm:$0xff]  ;;  %v8552_v59 = vld [vmem:[#allocation35_spill] sm:$0xff] }
 0x57f   :  { %6107 = vmatprep.subr.bf16.mxu0 %v8543_v1  ;;  %6136 = vmatprep.subr.bf16.mxu1 %v8430_v25  ;;  %v8551_v1 = vld [vmem:[#allocation34_spill] sm:$0xff] }
 0x582   :  { %6109 = vmatpush1.bf16.msra.mxu0 %v8544_v35  ;;  %6138 = vmatpush3.bf16.msra.mxu1 %v8545_v17  ;;  %v8553_v17 = vld [vmem:[#allocation36_spill] sm:$0xff]  ;;  %v8555_v35 = vld [vmem:[#allocation38_spill] sm:$0xff] }
 0x583   :  { %6111 = vmatprep.subr.bf16.mxu0 %v8546_v4  ;;  %6139 = vmatprep.subr.bf16.mxu1 %v8430_v25  ;;  %v8554_v4 = vld [vmem:[#allocation37_spill] sm:$0xff] }
 0x586   :  { %6113 = vmatpush1.bf16.msra.mxu0 %v8547_v60  ;;  %6141 = vmatpush3.bf16.msra.mxu1 %v8548_v53  ;;  %v8556_v53 = vld [vmem:[#allocation39_spill] sm:$0xff]  ;;  %v8558_v60 = vld [vmem:[#allocation41_spill] sm:$0xff] }
 0x587   :  { %6115 = vmatprep.subr.bf16.mxu0 %v8549_v12  ;;  %6142 = vmatprep.subr.bf16.mxu1 %v8430_v25  ;;  %v8557_v12 = vld [vmem:[#allocation40_spill] sm:$0xff] }
 0x58a   :  { %6117 = vmatpush1.bf16.msra.mxu0 %v8550_v50  ;;  %6144 = vmatpush3.bf16.msra.mxu1 %v8551_v1  ;;  %v8559_v1 = vld [vmem:[#allocation42_spill] sm:$0xff]  ;;  %v8561_v50 = vld [vmem:[#allocation44_spill] sm:$0xff] }
 0x58b   :  { %6119 = vmatprep.subr.bf16.mxu0 %v8552_v59  ;;  %6145 = vmatprep.subr.bf16.mxu1 %v8430_v25  ;;  %v8560_v59 = vld [vmem:[#allocation43_spill] sm:$0xff] }
 0x58e   :  { %6121 = vmatpush1.bf16.msra.mxu0 %v8553_v17  ;;  %6147 = vmatpush3.bf16.msra.mxu1 %v8554_v4 }
 0x58f   :  { %6123 = vmatprep.subr.bf16.mxu0 %v8555_v35  ;;  %6148 = vmatprep.subr.bf16.mxu1 %v8430_v25 }
 0x592   :  { %6125 = vmatpush1.bf16.msra.mxu0 %v8556_v53  ;;  %6150 = vmatpush3.bf16.msra.mxu1 %v8557_v12 }
 0x593   :  { %6127 = vmatprep.subr.bf16.mxu0 %v8558_v60  ;;  %6151 = vmatprep.subr.bf16.mxu1 %v8430_v25 }
 0x596   :  { %6129 = vmatpush1.bf16.msra.mxu0 %v8559_v1  ;;  %6153 = vmatpush3.bf16.msra.mxu1 %v8560_v59 }
 0x597   :  { %6155 = vmatprep.subr.bf16.mxu0 %v8561_v50  ;;  %6186 = vmatprep.subr.bf16.mxu1 %v8430_v25 }
 0x60c   :  { %v1998_v4 = vpop.f32.mrb[20].mxu1 }
 0x60d   :  { %v4914_v35 = vpop.f32.mrb[21].mxu1  ;;  %v1999_v6 = vadd.f32 %v1998_v4, %v8527_v27 }
 0x62c   :  { %v2068_v17 = vpop.f32.mrb[14].mxu0  ;;  %v2139_v42 = vpop.f32.mrb[22].mxu1 }
 0x62d   :  { %v6720_v53 = vadd.f32 %v2068_v17, %v8487_v26  ;;  %v2070_v57 = vpop.f32.mrb[15].mxu0  ;;  %v4949_v12 = vpop.f32.mrb[23].mxu1  ;;  %v2157_v51 = vadd.f32 %v8562_v34, %v2139_v42 }
 0x62e   :  { %v6721_v60 = vadd.f32 %v2070_v57, %v8488_v29 }
 0x62f   :  { %v4104_v45 = vmul.f32 -1.442695, %v6720_v53 }
 0x630   :  { %v4105_v19 = vmul.f32 -1.442695, %v6721_v60 }
 0x631   :  { %6809 = vpow2.f32 %v4104_v45 }
 0x632   :  { %6811 = vpow2.f32 %v4105_v19  ;;  %v4106_v19 = vld [vmem:[%s8257_s0 + $0x18] sm:$0x3f] }
 0x63b   :  { %v6810_v1 = vpop.eup %6809 }
 0x63c   :  { %v2151_v59 = vadd.f32 1.0, %v6810_v1  ;;  %v6812_v50 = vpop.eup %6811 }
 0x63d   :  { %v2152_v28 = vadd.f32 1.0, %v6812_v50 }
 0x63e   :  { %6813 = vrcp.f32 %v2151_v59 }
 0x63f   :  { %6815 = vrcp.f32 %v2152_v28 }
 0x648   :  { %v6814_v35 = vpop.eup %6813 }
 0x649   :  { %v2158_v63 = vmul.f32 %v6814_v35, %v2157_v51  ;;  %v6816_v34 = vpop.eup %6815 }
 0x64a   :  { %v2161_v4 = vsub.f32 1.0, %v6816_v34 }
 0x64b   :  { %v2159_v17 = vadd.f32 %v2158_v63, %v1999_v6  ;;  %v2163_v63 = vmul.f32 %v6816_v34, %v7694_v7  ;;  %v8564_v7 = vld [vmem:[#allocation10_spill] sm:$0xff]  ;;  %v8568_v34 = vld [vmem:[#allocation13_spill] sm:$0xff] }
 0x64c   :  { %v2233_v12 = vpop.f32.mrb[16].mxu0  ;;  %v2304_v53 = vpop.f32.mrb[24].mxu1 }
 0x64d   :  { %6817 = vtanh.f32 %v2159_v17  ;;  %v2235_v57 = vpop.f32.mrb[17].mxu0  ;;  %v4984_v45 = vpop.f32.mrb[25].mxu1  ;;  %v2326_v17 = vadd.f32 %v7699_v55, %v2304_v53  ;;  %v8566_v53 = vld [vmem:[#allocation17_spill] sm:$0xff] }
 0x64e   :  { %v2310_v60 = vcombine.low %v2233_v12, %v2235_v57  ;;  %v2329_v12 = vrot.slane %v4106_v19, 4 }
 0x650   :  { %v2317_v59 = vrot.slane %v2310_v60, %v8528_v20 }
 0x652   :  { %v2319_v50 = vadd.f32 %v4106_v19, %v2317_v59  ;;  %v8567_v19 = vld [vmem:[#allocation12_spill] sm:$0xff] }
 0x654   :  { %v4107_v42 = vmul.f32 -1.442695, %v2319_v50 }
 0x656   :  { %6819 = vpow2.f32 %v4107_v42 }
 0x657   :  { %v6818_v51 = vpop.eup %6817 }
 0x658   :  { %v2162_v28 = vmul.f32 %v6818_v51, %v2161_v4 }
 0x65a   :  { %v7825_v6 = vadd.f32 %v2163_v63, %v2162_v28  ;;  %v8569_v28 = vld [vmem:[#allocation18_spill] sm:$0xff] }
 0x65b   :  { %v8570_v63 = vld [vmem:[#allocation14_spill] sm:$0xff] }
 0x660   :  { %v6820_v1 = vpop.eup %6819 }
 0x661   :  { %v2323_v35 = vadd.f32 1.0, %v6820_v1  ;;  %v8571_v1 = vld [vmem:[#allocation16_spill] sm:$0xff] }
 0x663   :  { %6821 = vrcp.f32 %v2323_v35  ;;  %v8572_v35 = vld [vmem:[#allocation19_spill] sm:$0xff] }
 0x66d   :  { %v6822_v57 = vpop.eup %6821 }
 0x66e   :  { %v2327_v45 = vmul.f32 %v6822_v57, %v2326_v17  ;;  %v2334_v59 = vrot.slane %v6822_v57, 2  ;;  %v8573_v17 = vld [vmem:[#allocation20_spill] sm:$0xff]  ;;  %v8575_v57 = vld [vmem:[#allocation22_spill] sm:$0xff] }
 0x670   :  { %v2331_v60 = vadd.f32 %v2329_v12, %v2327_v45  ;;  %v2336_v50 = vsub.f32 1.0, %v2334_v59  ;;  %v2338_v4 = vmul.f32 %v2334_v59, %v7703_v39  ;;  %v8565_v39 = vld [vmem:[#allocation11_spill] sm:$0xff]  ;;  %v8574_v12 = vld [vmem:[#allocation21_spill] sm:$0xff] }
 0x671   :  { %v8576_v45 = vld [vmem:[#allocation23_spill] sm:$0xff]  ;;  %v8578_v59 = vld [vmem:[#allocation25_spill] sm:$0xff] }
 0x672   :  { %6823 = vtanh.f32 %v2331_v60  ;;  %v8577_v60 = vld [vmem:[#allocation24_spill] sm:$0xff] }
 0x67c   :  { %v6824_v42 = vpop.eup %6823 }
 0x67d   :  { %v2337_v20 = vmul.f32 %v6824_v42, %v2336_v50  ;;  %v8579_v50 = vld [vmem:[#allocation26_spill] sm:$0xff]  ;;  %v8580_v42 = vld [vmem:[#allocation27_spill] sm:$0xff] }
 0x67f   :  { %v7829_v51 = vadd.f32 %v2338_v4, %v2337_v20  ;;  %v8563_v20 = vld [vmem:[#allocation15_spill] sm:$0xff]  ;;  %v8581_v4 = vld [vmem:[#allocation28_spill] sm:$0xff] }
 0x681   :  { %2405 = vmatmul.mubr.f32.vlgmr.msra.gmra.mrb[18].mxu0 %v7829_v51  ;;  %5018 = vmatmul.mubr.f32.vlgmr.msra.gmra.mrb[26].mxu1 %v7829_v51 }
 0x682   :  { %6157 = vmatpush1.bf16.msra.mxu0 %v7252_v8  ;;  %6188 = vmatpush3.bf16.msra.mxu1 %v8455_v24 }
 0x683   :  { %6159 = vmatprep.subr.bf16.mxu0 %v8456_v36  ;;  %6189 = vmatprep.subr.bf16.mxu1 %v8430_v25 }
 0x684   :  { %2545 = vmatprep.mubr.f32.mxu0 %v8432_v2  ;;  %5052 = vmatprep.mubr.msk.f32.mxu1 %vm6963_vm0, %v8432_v2 }
 0x686   :  { %6161 = vmatpush1.bf16.msra.mxu0 %v8457_v46  ;;  %6191 = vmatpush3.bf16.msra.mxu1 %v8458_v23 }
 0x687   :  { %6163 = vmatprep.subr.bf16.mxu0 %v8459_v37  ;;  %6192 = vmatprep.subr.bf16.mxu1 %v8430_v25 }
 0x68a   :  { %6165 = vmatpush1.bf16.msra.mxu0 %v8460_v62  ;;  %6194 = vmatpush3.bf16.msra.mxu1 %v8461_v48 }
 0x68b   :  { %6167 = vmatprep.subr.bf16.mxu0 %v8462_v52  ;;  %6195 = vmatprep.subr.bf16.mxu1 %v8430_v25 }
 0x68e   :  { %6169 = vmatpush1.bf16.msra.mxu0 %v8463_v40  ;;  %6197 = vmatpush3.bf16.msra.mxu1 %v8464_v32 }
 0x68f   :  { %6171 = vmatprep.subr.bf16.mxu0 %v8465_v13  ;;  %6198 = vmatprep.subr.bf16.mxu1 %v8430_v25 }
 0x692   :  { %6173 = vmatpush1.bf16.msra.mxu0 %v7297_v58  ;;  %6200 = vmatpush3.bf16.msra.mxu1 %v7299_v54 }
 0x693   :  { %6175 = vmatprep.subr.bf16.mxu0 %v8466_v0  ;;  %6201 = vmatprep.subr.bf16.mxu1 %v8430_v25 }
 0x696   :  { %6177 = vmatpush1.bf16.msra.mxu0 %v8467_v61  ;;  %6203 = vmatpush3.bf16.msra.mxu1 %v7309_v49 }
 0x697   :  { %6179 = vmatprep.subr.bf16.mxu0 %v7313_v11  ;;  %6204 = vmatprep.subr.bf16.mxu1 %v8430_v25 }
 0x69a   :  { %6181 = vmatpush1.bf16.msra.mxu0 %v7317_v18  ;;  %6206 = vmatpush3.bf16.msra.mxu1 %v7319_v14 }
 0x69b   :  { %6183 = vmatprep.subr.bf16.mxu0 %v7323_v3  ;;  %6207 = vmatprep.subr.bf16.mxu1 %v8430_v25 }
 0x69e   :  { %6185 = vmatpush1.bf16.msra.mxu0 %v7327_v43  ;;  %6209 = vmatpush3.bf16.msra.mxu1 %v7329_v44 }
 0x69f   :  { %6211 = vmatprep.subr.bf16.mxu0 %v7066_v5  ;;  %6242 = vmatprep.subr.bf16.mxu1 %v8430_v25 }
 0x6a1   :  { %2546 = vmatmul.mubr.f32.vlgmr.msra.gmra.mrb[18].mxu0 %v7825_v6  ;;  %5053 = vmatmul.mubr.f32.vlgmr.msra.gmra.mrb[28].mxu1 %v7825_v6 }
 0x6a2   :  { %6213 = vmatpush1.bf16.msra.mxu0 %v7068_v9  ;;  %6244 = vmatpush3.bf16.msra.mxu1 %v7088_v31 }
 0x6a3   :  { %6215 = vmatprep.subr.bf16.mxu0 %v7070_v10  ;;  %6245 = vmatprep.subr.bf16.mxu1 %v8430_v25 }
 0x6a4   :  { %2710 = vmatprep.mubr.f32.mxu0 %v8432_v2  ;;  %5087 = vmatprep.mubr.msk.f32.mxu1 %vm6963_vm0, %v8432_v2 }
 0x6a6   :  { %6217 = vmatpush1.bf16.msra.mxu0 %v7074_v15  ;;  %6247 = vmatpush3.bf16.msra.mxu1 %v7094_v38 }
 0x6a7   :  { %6219 = vmatprep.subr.bf16.mxu0 %v7077_v16  ;;  %6248 = vmatprep.subr.bf16.mxu1 %v8430_v25 }
 0x6aa   :  { %6221 = vmatpush1.bf16.msra.mxu0 %v7080_v21  ;;  %6250 = vmatpush3.bf16.msra.mxu1 %v7104_v47 }
 0x6ab   :  { %6223 = vmatprep.subr.bf16.mxu0 %v7083_v22  ;;  %6251 = vmatprep.subr.bf16.mxu1 %v8430_v25 }
 0x6ae   :  { %6225 = vmatpush1.bf16.msra.mxu0 %v7086_v30  ;;  %6253 = vmatpush3.bf16.msra.mxu1 %v7114_v56 }
 0x6af   :  { %6227 = vmatprep.subr.bf16.mxu0 %v7091_v33  ;;  %6254 = vmatprep.subr.bf16.mxu1 %v8430_v25 }
 0x6b2   :  { %6229 = vmatpush1.bf16.msra.mxu0 %v7098_v41  ;;  %6256 = vmatpush3.bf16.msra.mxu1 %v8563_v20 }
 0x6b3   :  { %6231 = vmatprep.subr.bf16.mxu0 %v8564_v7  ;;  %6257 = vmatprep.subr.bf16.mxu1 %v8430_v25 }
 0x6b6   :  { %6233 = vmatpush1.bf16.msra.mxu0 %v8565_v39  ;;  %6259 = vmatpush3.bf16.msra.mxu1 %v8566_v53 }
 0x6b7   :  { %6235 = vmatprep.subr.bf16.mxu0 %v8567_v19  ;;  %6260 = vmatprep.subr.bf16.mxu1 %v8430_v25 }
 0x6ba   :  { %6237 = vmatpush1.bf16.msra.mxu0 %v8568_v34  ;;  %6262 = vmatpush3.bf16.msra.mxu1 %v8569_v28 }
 0x6bb   :  { %6239 = vmatprep.subr.bf16.mxu0 %v8570_v63  ;;  %6263 = vmatprep.subr.bf16.mxu1 %v8430_v25 }
 0x6be   :  { %6241 = vmatpush1.bf16.msra.mxu0 %v8571_v1  ;;  %6265 = vmatpush3.bf16.msra.mxu1 %v8572_v35 }
 0x6bf   :  { %6267 = vmatprep.subr.bf16.mxu0 %v8573_v17  ;;  %6298 = vmatprep.subr.bf16.mxu1 %v8430_v25  ;;  %v8585_v17 = vld [vmem:[#allocation32_spill] sm:$0xff] }
 0x6c1   :  { %2711 = vmatmul.mubr.f32.vlgmr.msra.gmra.mrb[20].mxu0 %v7829_v51  ;;  %5088 = vmatmul.mubr.f32.vlgmr.msra.gmra.mrb[30].mxu1 %v7829_v51 }
 0x6c2   :  { %6269 = vmatpush1.bf16.msra.mxu0 %v8574_v12  ;;  %6300 = vmatpush3.bf16.msra.mxu1 %v8575_v57  ;;  %v8583_v57 = vld [vmem:[#allocation30_spill] sm:$0xff]  ;;  %v8584_v12 = vld [vmem:[#allocation31_spill] sm:$0xff] }
 0x6c3   :  { %6271 = vmatprep.subr.bf16.mxu0 %v8576_v45  ;;  %6301 = vmatprep.subr.bf16.mxu1 %v8430_v25  ;;  %v8582_v45 = vld [vmem:[#allocation29_spill] sm:$0xff] }
 0x6c4   :  { %2883 = vmatprep.mubr.f32.mxu0 %v8432_v2  ;;  %5122 = vmatprep.mubr.msk.f32.mxu1 %vm6963_vm0, %v8432_v2 }
 0x6c6   :  { %6273 = vmatpush1.bf16.msra.mxu0 %v8577_v60  ;;  %6303 = vmatpush3.bf16.msra.mxu1 %v8578_v59  ;;  %v8586_v59 = vld [vmem:[#allocation33_spill] sm:$0xff]  ;;  %v8588_v60 = vld [vmem:[#allocation35_spill] sm:$0xff] }
 0x6c7   :  { %6275 = vmatprep.subr.bf16.mxu0 %v8579_v50  ;;  %6304 = vmatprep.subr.bf16.mxu1 %v8430_v25  ;;  %v8587_v50 = vld [vmem:[#allocation34_spill] sm:$0xff] }
 0x6ca   :  { %6277 = vmatpush1.bf16.msra.mxu0 %v8580_v42  ;;  %6306 = vmatpush3.bf16.msra.mxu1 %v8581_v4  ;;  %v8589_v4 = vld [vmem:[#allocation36_spill] sm:$0xff]  ;;  %v8591_v42 = vld [vmem:[#allocation38_spill] sm:$0xff] }
 0x6cb   :  { %6279 = vmatprep.subr.bf16.mxu0 %v8582_v45  ;;  %6307 = vmatprep.subr.bf16.mxu1 %v8430_v25  ;;  %v8590_v45 = vld [vmem:[#allocation37_spill] sm:$0xff] }
 0x6ce   :  { %6281 = vmatpush1.bf16.msra.mxu0 %v8583_v57  ;;  %6309 = vmatpush3.bf16.msra.mxu1 %v8584_v12  ;;  %v8592_v12 = vld [vmem:[#allocation39_spill] sm:$0xff]  ;;  %v8594_v57 = vld [vmem:[#allocation41_spill] sm:$0xff] }
 0x6cf   :  { %6283 = vmatprep.subr.bf16.mxu0 %v8585_v17  ;;  %6310 = vmatprep.subr.bf16.mxu1 %v8430_v25  ;;  %v8593_v17 = vld [vmem:[#allocation40_spill] sm:$0xff] }
 0x6d2   :  { %6285 = vmatpush1.bf16.msra.mxu0 %v8586_v59  ;;  %6312 = vmatpush3.bf16.msra.mxu1 %v8587_v50  ;;  %v8595_v50 = vld [vmem:[#allocation42_spill] sm:$0xff]  ;;  %v8597_v59 = vld [vmem:[#allocation44_spill] sm:$0xff] }
 0x6d3   :  { %6287 = vmatprep.subr.bf16.mxu0 %v8588_v60  ;;  %6313 = vmatprep.subr.bf16.mxu1 %v8430_v25  ;;  %v8596_v60 = vld [vmem:[#allocation43_spill] sm:$0xff] }
 0x6d6   :  { %6289 = vmatpush1.bf16.msra.mxu0 %v8589_v4  ;;  %6315 = vmatpush3.bf16.msra.mxu1 %v8590_v45 }
 0x6d7   :  { %6291 = vmatprep.subr.bf16.mxu0 %v8591_v42  ;;  %6316 = vmatprep.subr.bf16.mxu1 %v8430_v25 }
 0x6da   :  { %6293 = vmatpush1.bf16.msra.mxu0 %v8592_v12  ;;  %6318 = vmatpush3.bf16.msra.mxu1 %v8593_v17 }
 0x6db   :  { %6295 = vmatprep.subr.bf16.mxu0 %v8594_v57  ;;  %6319 = vmatprep.subr.bf16.mxu1 %v8430_v25 }
 0x6de   :  { %6297 = vmatpush1.bf16.msra.mxu0 %v8595_v50  ;;  %6321 = vmatpush3.bf16.msra.mxu1 %v8596_v60 }
 0x6df   :  { %6323 = vmatprep.subr.bf16.mxu0 %v8597_v59  ;;  %6354 = vmatprep.subr.bf16.mxu1 %v8430_v25 }
 0x754   :  { %v2477_v45 = vpop.f32.mrb[26].mxu1 }
 0x755   :  { %v5019_v42 = vpop.f32.mrb[27].mxu1 }
 0x756   :  { %v7947_v42 = vld [vmem:[%s8263_s6] ss:$0 sm:$0xff] }
 0x757   :  { %8598 = vst [vmem:[#allocation47_spill] sm:$0xff] %v7947_v42 }
 0x774   :  { %v2547_v4 = vpop.f32.mrb[18].mxu0  ;;  %v2618_v35 = vpop.f32.mrb[28].mxu1 }
 0x775   :  { %v6722_v12 = vadd.f32 %v2547_v4, %v8487_v26  ;;  %v2549_v1 = vpop.f32.mrb[19].mxu0  ;;  %v5054_v17 = vpop.f32.mrb[29].mxu1  ;;  %v2636_v4 = vadd.f32 %v7947_v42, %v2618_v35 }
 0x776   :  { %v6723_v57 = vadd.f32 %v2549_v1, %v8488_v29  ;;  %v2478_v17 = vadd.f32 %v2477_v45, %v8527_v27  ;;  %v8599_v29 = vld [vmem:[#allocation46_spill] sm:$0xff] }
 0x777   :  { %v4108_v63 = vmul.f32 -1.442695, %v6722_v12 }
 0x778   :  { %v4109_v28 = vmul.f32 -1.442695, %v6723_v57 }
 0x779   :  { %6825 = vpow2.f32 %v4108_v63 }
 0x77a   :  { %6827 = vpow2.f32 %v4109_v28 }
 0x783   :  { %v6826_v50 = vpop.eup %6825 }
 0x784   :  { %v2630_v60 = vadd.f32 1.0, %v6826_v50  ;;  %v6828_v59 = vpop.eup %6827 }
 0x785   :  { %v2631_v34 = vadd.f32 1.0, %v6828_v59  ;;  %v4110_v59 = vld [vmem:[%s8257_s0 + $0x1e] sm:$0x3f] }
 0x786   :  { %6829 = vrcp.f32 %v2630_v60 }
 0x787   :  { %6831 = vrcp.f32 %v2631_v34 }
 0x790   :  { %v6830_v26 = vpop.eup %6829 }
 0x791   :  { %v2637_v12 = vmul.f32 %v6830_v26, %v2636_v4  ;;  %v6832_v35 = vpop.eup %6831 }
 0x792   :  { %v2640_v45 = vsub.f32 1.0, %v6832_v35  ;;  %v2642_v4 = vmul.f32 %v6832_v35, %v7825_v6  ;;  %v8602_v6 = vld [vmem:[#allocation13_spill] sm:$0xff]  ;;  %v8606_v35 = vld [vmem:[#allocation19_spill] sm:$0xff] }
 0x793   :  { %v2638_v63 = vadd.f32 %v2637_v12, %v2478_v17 }
 0x794   :  { %v2712_v1 = vpop.f32.mrb[20].mxu0  ;;  %v2783_v28 = vpop.f32.mrb[30].mxu1 }
 0x795   :  { %6833 = vtanh.f32 %v2638_v63  ;;  %v2714_v57 = vpop.f32.mrb[21].mxu0  ;;  %v5089_v60 = vpop.f32.mrb[31].mxu1 }
 0x796   :  { %v2789_v50 = vcombine.low %v2712_v1, %v2714_v57  ;;  %v2805_v1 = vadd.f32 %v7699_v55, %v2783_v28  ;;  %v2808_v57 = vrot.slane %v4110_v59, 4  ;;  %v8604_v28 = vld [vmem:[#allocation14_spill] sm:$0xff] }
 0x798   :  { %v2796_v19 = vrot.slane %v2789_v50, %v8599_v29 }
 0x79a   :  { %v2798_v53 = vadd.f32 %v4110_v59, %v2796_v19  ;;  %v8605_v59 = vld [vmem:[#allocation16_spill] sm:$0xff] }
 0x79c   :  { %v4111_v42 = vmul.f32 -1.442695, %v2798_v53 }
 0x79e   :  { %6835 = vpow2.f32 %v4111_v42 }
 0x79f   :  { %v6834_v26 = vpop.eup %6833 }
 0x7a0   :  { %v2641_v34 = vmul.f32 %v6834_v26, %v2640_v45 }
 0x7a2   :  { %v7956_v17 = vadd.f32 %v2642_v4, %v2641_v34  ;;  %v8607_v34 = vld [vmem:[#allocation20_spill] sm:$0xff]  ;;  %v8608_v4 = vld [vmem:[#allocation21_spill] sm:$0xff] }
 0x7a8   :  { %v6836_v12 = vpop.eup %6835 }
 0x7a9   :  { %v2802_v63 = vadd.f32 1.0, %v6836_v12  ;;  %v8609_v12 = vld [vmem:[#allocation22_spill] sm:$0xff] }
 0x7ab   :  { %6837 = vrcp.f32 %v2802_v63  ;;  %v8610_v63 = vld [vmem:[#allocation23_spill] sm:$0xff] }
 0x7b5   :  { %v6838_v60 = vpop.eup %6837 }
 0x7b6   :  { %v2806_v27 = vmul.f32 %v6838_v60, %v2805_v1  ;;  %v2813_v19 = vrot.slane %v6838_v60, 2  ;;  %v8611_v1 = vld [vmem:[#allocation24_spill] sm:$0xff]  ;;  %v8613_v60 = vld [vmem:[#allocation26_spill] sm:$0xff] }
 0x7b8   :  { %v2810_v50 = vadd.f32 %v2808_v57, %v2806_v27  ;;  %v2815_v53 = vsub.f32 1.0, %v2813_v19  ;;  %v2817_v45 = vmul.f32 %v2813_v19, %v7829_v51  ;;  %v8601_v27 = vld [vmem:[#allocation12_spill] sm:$0xff]  ;;  %v8603_v51 = vld [vmem:[#allocation18_spill] sm:$0xff]  ;;  %v8612_v57 = vld [vmem:[#allocation25_spill] sm:$0xff] }
 0x7b9   :  { %v8615_v19 = vld [vmem:[#allocation28_spill] sm:$0xff] }
 0x7ba   :  { %6839 = vtanh.f32 %v2810_v50  ;;  %v8614_v50 = vld [vmem:[#allocation27_spill] sm:$0xff] }
 0x7c4   :  { %v6840_v42 = vpop.eup %6839 }
 0x7c5   :  { %v2816_v29 = vmul.f32 %v6840_v42, %v2815_v53  ;;  %v8616_v53 = vld [vmem:[#allocation29_spill] sm:$0xff]  ;;  %v8617_v42 = vld [vmem:[#allocation30_spill] sm:$0xff] }
 0x7c7   :  { %v7960_v26 = vadd.f32 %v2817_v45, %v2816_v29  ;;  %v8600_v29 = vld [vmem:[#allocation17_spill] sm:$0xff]  ;;  %v8618_v45 = vld [vmem:[#allocation31_spill] sm:$0xff] }
 0x7c9   :  { %2884 = vmatmul.mubr.f32.vlgmr.msra.gmra.mrb[22].mxu0 %v7960_v26  ;;  %5123 = vmatmul.mubr.f32.vlgmr.msra.gmra.mrb[32].mxu1 %v7960_v26 }
 0x7ca   :  { %6325 = vmatpush1.bf16.msra.mxu0 %v7252_v8  ;;  %6356 = vmatpush3.bf16.msra.mxu1 %v8455_v24 }
 0x7cb   :  { %6327 = vmatprep.subr.bf16.mxu0 %v8456_v36  ;;  %6357 = vmatprep.subr.bf16.mxu1 %v8430_v25 }
 0x7cc   :  { %3024 = vmatprep.mubr.f32.mxu0 %v8432_v2  ;;  %5157 = vmatprep.mubr.msk.f32.mxu1 %vm6963_vm0, %v8432_v2 }
 0x7ce   :  { %6329 = vmatpush1.bf16.msra.mxu0 %v8457_v46  ;;  %6359 = vmatpush3.bf16.msra.mxu1 %v8458_v23 }
 0x7cf   :  { %6331 = vmatprep.subr.bf16.mxu0 %v8459_v37  ;;  %6360 = vmatprep.subr.bf16.mxu1 %v8430_v25 }
 0x7d2   :  { %6333 = vmatpush1.bf16.msra.mxu0 %v8460_v62  ;;  %6362 = vmatpush3.bf16.msra.mxu1 %v8461_v48 }
 0x7d3   :  { %6335 = vmatprep.subr.bf16.mxu0 %v8462_v52  ;;  %6363 = vmatprep.subr.bf16.mxu1 %v8430_v25 }
 0x7d6   :  { %6337 = vmatpush1.bf16.msra.mxu0 %v8463_v40  ;;  %6365 = vmatpush3.bf16.msra.mxu1 %v8464_v32 }
 0x7d7   :  { %6339 = vmatprep.subr.bf16.mxu0 %v8465_v13  ;;  %6366 = vmatprep.subr.bf16.mxu1 %v8430_v25 }
 0x7da   :  { %6341 = vmatpush1.bf16.msra.mxu0 %v7297_v58  ;;  %6368 = vmatpush3.bf16.msra.mxu1 %v7299_v54 }
 0x7db   :  { %6343 = vmatprep.subr.bf16.mxu0 %v8466_v0  ;;  %6369 = vmatprep.subr.bf16.mxu1 %v8430_v25 }
 0x7de   :  { %6345 = vmatpush1.bf16.msra.mxu0 %v8467_v61  ;;  %6371 = vmatpush3.bf16.msra.mxu1 %v7309_v49 }
 0x7df   :  { %6347 = vmatprep.subr.bf16.mxu0 %v7313_v11  ;;  %6372 = vmatprep.subr.bf16.mxu1 %v8430_v25 }
 0x7e2   :  { %6349 = vmatpush1.bf16.msra.mxu0 %v7317_v18  ;;  %6374 = vmatpush3.bf16.msra.mxu1 %v7319_v14 }
 0x7e3   :  { %6351 = vmatprep.subr.bf16.mxu0 %v7323_v3  ;;  %6375 = vmatprep.subr.bf16.mxu1 %v8430_v25 }
 0x7e6   :  { %6353 = vmatpush1.bf16.msra.mxu0 %v7327_v43  ;;  %6377 = vmatpush3.bf16.msra.mxu1 %v7329_v44 }
 0x7e7   :  { %6379 = vmatprep.subr.bf16.mxu0 %v7066_v5  ;;  %6410 = vmatprep.subr.bf16.mxu1 %v8430_v25 }
 0x7e9   :  { %3025 = vmatmul.mubr.f32.vlgmr.msra.gmra.mrb[22].mxu0 %v7956_v17  ;;  %5158 = vmatmul.mubr.f32.vlgmr.msra.gmra.mrb[34].mxu1 %v7956_v17 }
 0x7ea   :  { %6381 = vmatpush1.bf16.msra.mxu0 %v7068_v9  ;;  %6412 = vmatpush3.bf16.msra.mxu1 %v7088_v31 }
 0x7eb   :  { %6383 = vmatprep.subr.bf16.mxu0 %v7070_v10  ;;  %6413 = vmatprep.subr.bf16.mxu1 %v8430_v25 }
 0x7ec   :  { %3189 = vmatprep.mubr.f32.mxu0 %v8432_v2  ;;  %5192 = vmatprep.mubr.msk.f32.mxu1 %vm6963_vm0, %v8432_v2 }
 0x7ee   :  { %6385 = vmatpush1.bf16.msra.mxu0 %v7074_v15  ;;  %6415 = vmatpush3.bf16.msra.mxu1 %v7094_v38 }
 0x7ef   :  { %6387 = vmatprep.subr.bf16.mxu0 %v7077_v16  ;;  %6416 = vmatprep.subr.bf16.mxu1 %v8430_v25 }
 0x7f2   :  { %6389 = vmatpush1.bf16.msra.mxu0 %v7080_v21  ;;  %6418 = vmatpush3.bf16.msra.mxu1 %v7104_v47 }
 0x7f3   :  { %6391 = vmatprep.subr.bf16.mxu0 %v7083_v22  ;;  %6419 = vmatprep.subr.bf16.mxu1 %v8430_v25 }
 0x7f6   :  { %6393 = vmatpush1.bf16.msra.mxu0 %v7086_v30  ;;  %6421 = vmatpush3.bf16.msra.mxu1 %v7114_v56 }
 0x7f7   :  { %6395 = vmatprep.subr.bf16.mxu0 %v7091_v33  ;;  %6422 = vmatprep.subr.bf16.mxu1 %v8430_v25 }
 0x7fa   :  { %6397 = vmatpush1.bf16.msra.mxu0 %v7098_v41  ;;  %6424 = vmatpush3.bf16.msra.mxu1 %v8563_v20 }
 0x7fb   :  { %6399 = vmatprep.subr.bf16.mxu0 %v8564_v7  ;;  %6425 = vmatprep.subr.bf16.mxu1 %v8430_v25 }
 0x7fe   :  { %6401 = vmatpush1.bf16.msra.mxu0 %v8565_v39  ;;  %6427 = vmatpush3.bf16.msra.mxu1 %v8600_v29  ;;  %v8635_v29 = vld [vmem:[#allocation63_spill] sm:$0xff] }
 0x7ff   :  { %6403 = vmatprep.subr.bf16.mxu0 %v8601_v27  ;;  %6428 = vmatprep.subr.bf16.mxu1 %v8430_v25 }
 0x802   :  { %6405 = vmatpush1.bf16.msra.mxu0 %v8602_v6  ;;  %6430 = vmatpush3.bf16.msra.mxu1 %v8603_v51  ;;  %v8634_v6 = vld [vmem:[#allocation47_spill] sm:$0xff] }
 0x803   :  { %6407 = vmatprep.subr.bf16.mxu0 %v8604_v28  ;;  %6431 = vmatprep.subr.bf16.mxu1 %v8430_v25 }
 0x806   :  { %6409 = vmatpush1.bf16.msra.mxu0 %v8605_v59  ;;  %6433 = vmatpush3.bf16.msra.mxu1 %v8606_v35 }
 0x807   :  { %6435 = vmatprep.subr.bf16.mxu0 %v8607_v34  ;;  %6466 = vmatprep.subr.bf16.mxu1 %v8430_v25 }
 0x809   :  { %3190 = vmatmul.mubr.f32.vlgmr.msra.gmra.mrb[24].mxu0 %v7960_v26  ;;  %5193 = vmatmul.mubr.f32.vlgmr.msra.gmra.mrb[36].mxu1 %v7960_v26 }
 0x80a   :  { %6437 = vmatpush1.bf16.msra.mxu0 %v8608_v4  ;;  %6468 = vmatpush3.bf16.msra.mxu1 %v8609_v12  ;;  %v8632_v4 = vld [vmem:[#allocation45_spill] sm:$0xff] }
 0x80b   :  { %6439 = vmatprep.subr.bf16.mxu0 %v8610_v63  ;;  %6469 = vmatprep.subr.bf16.mxu1 %v8430_v25  ;;  %v8619_v63 = vld [vmem:[#allocation32_spill] sm:$0xff] }
 0x80c   :  { %3362 = vmatprep.mubr.f32.mxu0 %v8432_v2  ;;  %5227 = vmatprep.mubr.msk.f32.mxu1 %vm6963_vm0, %v8432_v2 }
 0x80e   :  { %6441 = vmatpush1.bf16.msra.mxu0 %v8611_v1  ;;  %6471 = vmatpush3.bf16.msra.mxu1 %v8612_v57  ;;  %v8620_v57 = vld [vmem:[#allocation33_spill] sm:$0xff]  ;;  %v8622_v1 = vld [vmem:[#allocation35_spill] sm:$0xff] }
 0x80f   :  { %6443 = vmatprep.subr.bf16.mxu0 %v8613_v60  ;;  %6472 = vmatprep.subr.bf16.mxu1 %v8430_v25  ;;  %v8621_v60 = vld [vmem:[#allocation34_spill] sm:$0xff] }
 0x812   :  { %6445 = vmatpush1.bf16.msra.mxu0 %v8614_v50  ;;  %6474 = vmatpush3.bf16.msra.mxu1 %v8615_v19  ;;  %v8623_v19 = vld [vmem:[#allocation36_spill] sm:$0xff]  ;;  %v8625_v50 = vld [vmem:[#allocation38_spill] sm:$0xff] }
 0x813   :  { %6447 = vmatprep.subr.bf16.mxu0 %v8616_v53  ;;  %6475 = vmatprep.subr.bf16.mxu1 %v8430_v25  ;;  %v8624_v53 = vld [vmem:[#allocation37_spill] sm:$0xff] }
 0x816   :  { %6449 = vmatpush1.bf16.msra.mxu0 %v8617_v42  ;;  %6477 = vmatpush3.bf16.msra.mxu1 %v8618_v45  ;;  %v8626_v45 = vld [vmem:[#allocation39_spill] sm:$0xff]  ;;  %v8628_v42 = vld [vmem:[#allocation41_spill] sm:$0xff] }
 0x817   :  { %6451 = vmatprep.subr.bf16.mxu0 %v8619_v63  ;;  %6478 = vmatprep.subr.bf16.mxu1 %v8430_v25  ;;  %v8627_v63 = vld [vmem:[#allocation40_spill] sm:$0xff] }
 0x81a   :  { %6453 = vmatpush1.bf16.msra.mxu0 %v8620_v57  ;;  %6480 = vmatpush3.bf16.msra.mxu1 %v8621_v60  ;;  %v8629_v60 = vld [vmem:[#allocation42_spill] sm:$0xff]  ;;  %v8631_v57 = vld [vmem:[#allocation44_spill] sm:$0xff] }
 0x81b   :  { %6455 = vmatprep.subr.bf16.mxu0 %v8622_v1  ;;  %6481 = vmatprep.subr.bf16.mxu1 %v8430_v25  ;;  %v8630_v1 = vld [vmem:[#allocation43_spill] sm:$0xff] }
 0x81e   :  { %6457 = vmatpush1.bf16.msra.mxu0 %v8623_v19  ;;  %6483 = vmatpush3.bf16.msra.mxu1 %v8624_v53 }
 0x81f   :  { %6459 = vmatprep.subr.bf16.mxu0 %v8625_v50  ;;  %6484 = vmatprep.subr.bf16.mxu1 %v8430_v25 }
 0x822   :  { %6461 = vmatpush1.bf16.msra.mxu0 %v8626_v45  ;;  %6486 = vmatpush3.bf16.msra.mxu1 %v8627_v63 }
 0x823   :  { %6463 = vmatprep.subr.bf16.mxu0 %v8628_v42  ;;  %6487 = vmatprep.subr.bf16.mxu1 %v8430_v25  ;;  %v8633_v42 = vld [vmem:[#allocation61_spill] sm:$0xff] }
 0x826   :  { %6465 = vmatpush1.bf16.msra.mxu0 %v8629_v60  ;;  %6489 = vmatpush3.bf16.msra.mxu1 %v8630_v1 }
 0x827   :  { %6491 = vmatprep.subr.bf16.mxu0 %v8631_v57  ;;  %6522 = vmatprep.subr.bf16.mxu1 %v8430_v25 }
 0x89c   :  { %v2956_v53 = vpop.f32.mrb[32].mxu1 }
 0x89d   :  { %v5124_v50 = vpop.f32.mrb[33].mxu1  ;;  %v2957_v39 = vadd.f32 %v2956_v53, %v8635_v29 }
 0x8bc   :  { %v3026_v19 = vpop.f32.mrb[22].mxu0  ;;  %v3097_v12 = vpop.f32.mrb[34].mxu1 }
 0x8bd   :  { %v6724_v45 = vadd.f32 %v3026_v19, %v8632_v4  ;;  %v3028_v34 = vpop.f32.mrb[23].mxu0  ;;  %v5159_v63 = vpop.f32.mrb[35].mxu1  ;;  %v3115_v27 = vadd.f32 %v8634_v6, %v3097_v12 }
 0x8be   :  { %v6725_v59 = vadd.f32 %v3028_v34, %v8633_v42 }
 0x8bf   :  { %v4112_v35 = vmul.f32 -1.442695, %v6724_v45 }
 0x8c0   :  { %v4113_v28 = vmul.f32 -1.442695, %v6725_v59 }
 0x8c1   :  { %6841 = vpow2.f32 %v4112_v35 }
 0x8c2   :  { %6843 = vpow2.f32 %v4113_v28  ;;  %v4114_v28 = vld [vmem:[%s8257_s0 + $0x24] sm:$0x3f] }
 0x8cb   :  { %v6842_v60 = vpop.eup %6841 }
 0x8cc   :  { %v3109_v1 = vadd.f32 1.0, %v6842_v60  ;;  %v6844_v57 = vpop.eup %6843 }
 0x8cd   :  { %v3110_v51 = vadd.f32 1.0, %v6844_v57 }
 0x8ce   :  { %6845 = vrcp.f32 %v3109_v1  ;;  %v8636_v1 = vld [vmem:[#allocation46_spill] sm:$0xff] }
 0x8cf   :  { %6847 = vrcp.f32 %v3110_v51 }
 0x8d8   :  { %v6846_v50 = vpop.eup %6845 }
 0x8d9   :  { %v3116_v7 = vmul.f32 %v6846_v50, %v3115_v27  ;;  %v6848_v12 = vpop.eup %6847 }
 0x8da   :  { %v3119_v53 = vsub.f32 1.0, %v6848_v12 }
 0x8db   :  { %v3117_v19 = vadd.f32 %v3116_v7, %v2957_v39  ;;  %v3121_v7 = vmul.f32 %v6848_v12, %v7956_v17  ;;  %v8653_v17 = vld [vmem:[#allocation27_spill] sm:$0xff]  ;;  %v8659_v12 = vld [vmem:[#allocation33_spill] sm:$0xff] }
 0x8dc   :  { %v3191_v63 = vpop.f32.mrb[24].mxu0  ;;  %v3262_v45 = vpop.f32.mrb[36].mxu1 }
 0x8dd   :  { %6849 = vtanh.f32 %v3117_v19  ;;  %v3193_v34 = vpop.f32.mrb[25].mxu0  ;;  %v5194_v35 = vpop.f32.mrb[37].mxu1 }
 0x8de   :  { %v3268_v59 = vcombine.low %v3191_v63, %v3193_v34  ;;  %v3284_v63 = vadd.f32 %v7699_v55, %v3262_v45  ;;  %v3287_v34 = vrot.slane %v4114_v28, 4  ;;  %v8651_v55 = vld [vmem:[#allocation25_spill] sm:$0xff]  ;;  %v8656_v45 = vld [vmem:[#allocation30_spill] sm:$0xff] }
 0x8e0   :  { %v3275_v57 = vrot.slane %v3268_v59, %v8636_v1 }
 0x8e2   :  { %v3277_v60 = vadd.f32 %v4114_v28, %v3275_v57  ;;  %v8657_v28 = vld [vmem:[#allocation31_spill] sm:$0xff] }
 0x8e4   :  { %v4115_v6 = vmul.f32 -1.442695, %v3277_v60 }
 0x8e6   :  { %6851 = vpow2.f32 %v4115_v6 }
 0x8e7   :  { %v6850_v27 = vpop.eup %6849 }
 0x8e8   :  { %v3120_v51 = vmul.f32 %v6850_v27, %v3119_v53 }
 0x8ea   :  { %v8082_v39 = vadd.f32 %v3121_v7, %v3120_v51  ;;  %v8660_v51 = vld [vmem:[#allocation34_spill] sm:$0xff]  ;;  %v8661_v7 = vld [vmem:[#allocation35_spill] sm:$0xff] }
 0x8f0   :  { %v6852_v50 = vpop.eup %6851 }
 0x8f1   :  { %v3281_v19 = vadd.f32 1.0, %v6852_v50  ;;  %v8662_v50 = vld [vmem:[#allocation36_spill] sm:$0xff] }
 0x8f3   :  { %6853 = vrcp.f32 %v3281_v19  ;;  %v8663_v19 = vld [vmem:[#allocation37_spill] sm:$0xff] }
 0x8fd   :  { %v6854_v35 = vpop.eup %6853 }
 0x8fe   :  { %v3285_v29 = vmul.f32 %v6854_v35, %v3284_v63  ;;  %v3292_v57 = vrot.slane %v6854_v35, 2  ;;  %v8664_v63 = vld [vmem:[#allocation38_spill] sm:$0xff]  ;;  %v8666_v35 = vld [vmem:[#allocation40_spill] sm:$0xff] }
 0x900   :  { %v3289_v59 = vadd.f32 %v3287_v34, %v3285_v29  ;;  %v3294_v60 = vsub.f32 1.0, %v3292_v57  ;;  %v3296_v53 = vmul.f32 %v3292_v57, %v7960_v26  ;;  %v8654_v26 = vld [vmem:[#allocation28_spill] sm:$0xff]  ;;  %v8655_v29 = vld [vmem:[#allocation29_spill] sm:$0xff]  ;;  %v8665_v34 = vld [vmem:[#allocation39_spill] sm:$0xff] }
 0x901   :  { %v8668_v57 = vld [vmem:[#allocation42_spill] sm:$0xff] }
 0x902   :  { %6855 = vtanh.f32 %v3289_v59  ;;  %v8667_v59 = vld [vmem:[#allocation41_spill] sm:$0xff] }
 0x90c   :  { %v6856_v6 = vpop.eup %6855 }
 0x90d   :  { %v3295_v1 = vmul.f32 %v6856_v6, %v3294_v60  ;;  %v8669_v60 = vld [vmem:[#allocation43_spill] sm:$0xff]  ;;  %v8670_v6 = vld [vmem:[#allocation44_spill] sm:$0xff] }
 0x90f   :  { %v8086_v27 = vadd.f32 %v3296_v53, %v3295_v1  ;;  %v8658_v1 = vld [vmem:[#allocation32_spill] sm:$0xff] }
 0x911   :  { %3363 = vmatmul.mubr.f32.vlgmr.msra.gmra.mrb[26].mxu0 %v8086_v27  ;;  %5228 = vmatmul.mubr.f32.vlgmr.msra.gmra.mrb[38].mxu1 %v8086_v27 }
 0x912   :  { %6493 = vmatpush1.bf16.msra.mxu0 %v7252_v8  ;;  %6524 = vmatpush3.bf16.msra.mxu1 %v8455_v24 }
 0x913   :  { %6495 = vmatprep.subr.bf16.mxu0 %v8456_v36  ;;  %6525 = vmatprep.subr.bf16.mxu1 %v8430_v25 }
 0x914   :  { %3503 = vmatprep.mubr.f32.mxu0 %v8432_v2  ;;  %5262 = vmatprep.mubr.msk.f32.mxu1 %vm6963_vm0, %v8432_v2 }
 0x916   :  { %6497 = vmatpush1.bf16.msra.mxu0 %v8457_v46  ;;  %6527 = vmatpush3.bf16.msra.mxu1 %v8458_v23 }
 0x917   :  { %6499 = vmatprep.subr.bf16.mxu0 %v8459_v37  ;;  %6528 = vmatprep.subr.bf16.mxu1 %v8430_v25 }
 0x91a   :  { %6501 = vmatpush1.bf16.msra.mxu0 %v8460_v62  ;;  %6530 = vmatpush3.bf16.msra.mxu1 %v8461_v48 }
 0x91b   :  { %6503 = vmatprep.subr.bf16.mxu0 %v8462_v52  ;;  %6531 = vmatprep.subr.bf16.mxu1 %v8430_v25 }
 0x91e   :  { %6505 = vmatpush1.bf16.msra.mxu0 %v8463_v40  ;;  %6533 = vmatpush3.bf16.msra.mxu1 %v8464_v32 }
 0x91f   :  { %6507 = vmatprep.subr.bf16.mxu0 %v8465_v13  ;;  %6534 = vmatprep.subr.bf16.mxu1 %v8430_v25 }
 0x922   :  { %6509 = vmatpush1.bf16.msra.mxu0 %v7297_v58  ;;  %6536 = vmatpush3.bf16.msra.mxu1 %v7299_v54 }
 0x923   :  { %6511 = vmatprep.subr.bf16.mxu0 %v8466_v0  ;;  %6537 = vmatprep.subr.bf16.mxu1 %v8430_v25 }
 0x926   :  { %6513 = vmatpush1.bf16.msra.mxu0 %v8467_v61  ;;  %6539 = vmatpush3.bf16.msra.mxu1 %v7309_v49 }
 0x927   :  { %6515 = vmatprep.subr.bf16.mxu0 %v7313_v11  ;;  %6540 = vmatprep.subr.bf16.mxu1 %v8430_v25 }
 0x92a   :  { %6517 = vmatpush1.bf16.msra.mxu0 %v7317_v18  ;;  %6542 = vmatpush3.bf16.msra.mxu1 %v7319_v14 }
 0x92b   :  { %6519 = vmatprep.subr.bf16.mxu0 %v7323_v3  ;;  %6543 = vmatprep.subr.bf16.mxu1 %v8430_v25 }
 0x92e   :  { %6521 = vmatpush1.bf16.msra.mxu0 %v7327_v43  ;;  %6545 = vmatpush3.bf16.msra.mxu1 %v7329_v44 }
 0x92f   :  { %6547 = vmatprep.subr.bf16.mxu0 %v7066_v5  ;;  %6578 = vmatprep.subr.bf16.mxu1 %v8430_v25  ;;  %v8637_v5 = vld [vmem:[#allocation10_spill] sm:$0xff] }
 0x931   :  { %3504 = vmatmul.mubr.f32.vlgmr.msra.gmra.mrb[26].mxu0 %v8082_v39  ;;  %5263 = vmatmul.mubr.f32.vlgmr.msra.gmra.mrb[40].mxu1 %v8082_v39 }
 0x932   :  { %6549 = vmatpush1.bf16.msra.mxu0 %v7068_v9  ;;  %6580 = vmatpush3.bf16.msra.mxu1 %v7088_v31  ;;  %v8638_v9 = vld [vmem:[#allocation11_spill] sm:$0xff] }
 0x933   :  { %6551 = vmatprep.subr.bf16.mxu0 %v7070_v10  ;;  %6581 = vmatprep.subr.bf16.mxu1 %v8430_v25  ;;  %v8639_v10 = vld [vmem:[#allocation17_spill] sm:$0xff]  ;;  %v8645_v31 = vld [vmem:[#allocation19_spill] sm:$0xff] }
 0x934   :  { %3668 = vmatprep.mubr.f32.mxu0 %v8432_v2  ;;  %5297 = vmatprep.mubr.msk.f32.mxu1 %vm6963_vm0, %v8432_v2 }
 0x936   :  { %6553 = vmatpush1.bf16.msra.mxu0 %v7074_v15  ;;  %6583 = vmatpush3.bf16.msra.mxu1 %v7094_v38  ;;  %v8640_v15 = vld [vmem:[#allocation12_spill] sm:$0xff]  ;;  %v8647_v38 = vld [vmem:[#allocation21_spill] sm:$0xff] }
 0x937   :  { %6555 = vmatprep.subr.bf16.mxu0 %v7077_v16  ;;  %6584 = vmatprep.subr.bf16.mxu1 %v8430_v25  ;;  %v8641_v16 = vld [vmem:[#allocation13_spill] sm:$0xff] }
 0x93a   :  { %6557 = vmatpush1.bf16.msra.mxu0 %v7080_v21  ;;  %6586 = vmatpush3.bf16.msra.mxu1 %v7104_v47  ;;  %v8642_v21 = vld [vmem:[#allocation18_spill] sm:$0xff]  ;;  %v8649_v47 = vld [vmem:[#allocation23_spill] sm:$0xff] }
 0x93b   :  { %6559 = vmatprep.subr.bf16.mxu0 %v7083_v22  ;;  %6587 = vmatprep.subr.bf16.mxu1 %v8430_v25  ;;  %v8643_v22 = vld [vmem:[#allocation14_spill] sm:$0xff] }
 0x93e   :  { %6561 = vmatpush1.bf16.msra.mxu0 %v7086_v30  ;;  %6589 = vmatpush3.bf16.msra.mxu1 %v7114_v56  ;;  %v8644_v30 = vld [vmem:[#allocation16_spill] sm:$0xff] }
 0x93f   :  { %6563 = vmatprep.subr.bf16.mxu0 %v7091_v33  ;;  %6590 = vmatprep.subr.bf16.mxu1 %v8430_v25  ;;  %v8646_v33 = vld [vmem:[#allocation20_spill] sm:$0xff] }
 0x940   :  { %v8650_v56 = vld [vmem:[#allocation24_spill] sm:$0xff] }
 0x942   :  { %6565 = vmatpush1.bf16.msra.mxu0 %v7098_v41  ;;  %6592 = vmatpush3.bf16.msra.mxu1 %v8563_v20  ;;  %v8648_v41 = vld [vmem:[#allocation22_spill] sm:$0xff] }
 0x943   :  { %6567 = vmatprep.subr.bf16.mxu0 %v8637_v5  ;;  %6593 = vmatprep.subr.bf16.mxu1 %v8430_v25  ;;  %v8652_v20 = vld [vmem:[#allocation26_spill] sm:$0xff] }
 0x946   :  { %6569 = vmatpush1.bf16.msra.mxu0 %v8638_v9  ;;  %6595 = vmatpush3.bf16.msra.mxu1 %v8639_v10 }
 0x947   :  { %6571 = vmatprep.subr.bf16.mxu0 %v8640_v15  ;;  %6596 = vmatprep.subr.bf16.mxu1 %v8430_v25 }
 0x94a   :  { %6573 = vmatpush1.bf16.msra.mxu0 %v8641_v16  ;;  %6598 = vmatpush3.bf16.msra.mxu1 %v8642_v21 }
 0x94b   :  { %6575 = vmatprep.subr.bf16.mxu0 %v8643_v22  ;;  %6599 = vmatprep.subr.bf16.mxu1 %v8430_v25 }
 0x94e   :  { %6577 = vmatpush1.bf16.msra.mxu0 %v8644_v30  ;;  %6601 = vmatpush3.bf16.msra.mxu1 %v8645_v31 }
 0x94f   :  { %6603 = vmatprep.subr.bf16.mxu0 %v8646_v33  ;;  %6634 = vmatprep.subr.bf16.mxu1 %v8430_v25 }
 0x951   :  { %3669 = vmatmul.mubr.f32.vlgmr.msra.gmra.mrb[28].mxu0 %v8086_v27  ;;  %5298 = vmatmul.mubr.f32.vlgmr.msra.gmra.mrb[42].mxu1 %v8086_v27 }
 0x952   :  { %6605 = vmatpush1.bf16.msra.mxu0 %v8647_v38  ;;  %6636 = vmatpush3.bf16.msra.mxu1 %v8648_v41 }
 0x953   :  { %6607 = vmatprep.subr.bf16.mxu0 %v8649_v47  ;;  %6637 = vmatprep.subr.bf16.mxu1 %v8430_v25 }
 0x954   :  { %3841 = vmatprep.mubr.f32.mxu0 %v8432_v2  ;;  %5332 = vmatprep.mubr.msk.f32.mxu1 %vm6963_vm0, %v8432_v2 }
 0x956   :  { %6609 = vmatpush1.bf16.msra.mxu0 %v8650_v56  ;;  %6639 = vmatpush3.bf16.msra.mxu1 %v8651_v55  ;;  %v8671_v56 = vld [vmem:[#allocation47_spill] sm:$0xff] }
 0x957   :  { %6611 = vmatprep.subr.bf16.mxu0 %v8652_v20  ;;  %6640 = vmatprep.subr.bf16.mxu1 %v8430_v25 }
 0x95a   :  { %6613 = vmatpush1.bf16.msra.mxu0 %v8653_v17  ;;  %6642 = vmatpush3.bf16.msra.mxu1 %v8654_v26  ;;  %v8672_v17 = vld [vmem:[#allocation63_spill] sm:$0xff] }
 0x95b   :  { %6615 = vmatprep.subr.bf16.mxu0 %v8655_v29  ;;  %6643 = vmatprep.subr.bf16.mxu1 %v8430_v25 }
 0x95e   :  { %6617 = vmatpush1.bf16.msra.mxu0 %v8656_v45  ;;  %6645 = vmatpush3.bf16.msra.mxu1 %v8657_v28 }
 0x95f   :  { %6619 = vmatprep.subr.bf16.mxu0 %v8658_v1  ;;  %6646 = vmatprep.subr.bf16.mxu1 %v8430_v25 }
 0x962   :  { %6621 = vmatpush1.bf16.msra.mxu0 %v8659_v12  ;;  %6648 = vmatpush3.bf16.msra.mxu1 %v8660_v51 }
 0x963   :  { %6623 = vmatprep.subr.bf16.mxu0 %v8661_v7  ;;  %6649 = vmatprep.subr.bf16.mxu1 %v8430_v25 }
 0x966   :  { %6625 = vmatpush1.bf16.msra.mxu0 %v8662_v50  ;;  %6651 = vmatpush3.bf16.msra.mxu1 %v8663_v19  ;;  %v4118_v50 = vld [vmem:[%s8257_s0 + $0x2a] sm:$0x3f]  ;;  %v8673_v19 = vld [vmem:[#allocation46_spill] sm:$0xff] }
 0x967   :  { %6627 = vmatprep.subr.bf16.mxu0 %v8664_v63  ;;  %6652 = vmatprep.subr.bf16.mxu1 %v8430_v25 }
 0x96a   :  { %6629 = vmatpush1.bf16.msra.mxu0 %v8665_v34  ;;  %6654 = vmatpush3.bf16.msra.mxu1 %v8666_v35 }
 0x96b   :  { %6631 = vmatprep.subr.bf16.mxu0 %v8667_v59  ;;  %6655 = vmatprep.subr.bf16.mxu1 %v8430_v25 }
 0x96e   :  { %6633 = vmatpush1.bf16.msra.mxu0 %v8668_v57  ;;  %6657 = vmatpush3.bf16.msra.mxu1 %v8669_v60 }
 0x96f   :  { %6659 = vmatprep.subr.bf16.mxu0 %v8670_v6  ;;  %6690 = vmatprep.subr.bf16.mxu1 %v8430_v25 }
 0x9e4   :  { %v3435_v53 = vpop.f32.mrb[38].mxu1 }
 0x9e5   :  { %v5229_v5 = vpop.f32.mrb[39].mxu1  ;;  %v3436_v26 = vadd.f32 %v3435_v53, %v8672_v17 }
 0xa04   :  { %v3505_v9 = vpop.f32.mrb[26].mxu0  ;;  %v3576_v10 = vpop.f32.mrb[40].mxu1 }
 0xa05   :  { %v6726_v15 = vadd.f32 %v3505_v9, %v8632_v4  ;;  %v3507_v16 = vpop.f32.mrb[27].mxu0  ;;  %v5264_v21 = vpop.f32.mrb[41].mxu1  ;;  %v3594_v55 = vadd.f32 %v8671_v56, %v3576_v10 }
 0xa06   :  { %v6727_v30 = vadd.f32 %v3507_v16, %v8633_v42  ;;  %v3766_v21 = vrot.slane %v4118_v50, 4 }
 0xa07   :  { %v4116_v22 = vmul.f32 -1.442695, %v6726_v15  ;;  %v6885_v15 = vld [vmem:[%s8259_s2] ss:$0 sm:$0xff] }
 0xa08   :  { %v4117_v31 = vmul.f32 -1.442695, %v6727_v30 }
 0xa09   :  { %6857 = vpow2.f32 %v4116_v22 }
 0xa0a   :  { %6859 = vpow2.f32 %v4117_v31 }
 0xa13   :  { %v6858_v33 = vpop.eup %6857 }
 0xa14   :  { %v3588_v38 = vadd.f32 1.0, %v6858_v33  ;;  %v6860_v41 = vpop.eup %6859 }
 0xa15   :  { %v3589_v47 = vadd.f32 1.0, %v6860_v41 }
 0xa16   :  { %6861 = vrcp.f32 %v3588_v38 }
 0xa17   :  { %6863 = vrcp.f32 %v3589_v47 }
 0xa20   :  { %v6862_v20 = vpop.eup %6861 }
 0xa21   :  { %v3595_v29 = vmul.f32 %v6862_v20, %v3594_v55  ;;  %v6864_v35 = vpop.eup %6863 }
 0xa22   :  { %v3598_v57 = vsub.f32 1.0, %v6864_v35  ;;  %v3600_v53 = vmul.f32 %v6864_v35, %v8082_v39 }
 0xa23   :  { %v3596_v45 = vadd.f32 %v3595_v29, %v3436_v26 }
 0xa24   :  { %v3670_v28 = vpop.f32.mrb[28].mxu0  ;;  %v3741_v1 = vpop.f32.mrb[42].mxu1 }
 0xa25   :  { %6865 = vtanh.f32 %v3596_v45  ;;  %v3672_v12 = vpop.f32.mrb[29].mxu0  ;;  %v5299_v51 = vpop.f32.mrb[43].mxu1  ;;  %v3763_v16 = vadd.f32 %v6885_v15, %v3741_v1 }
 0xa26   :  { %v3747_v7 = vcombine.low %v3670_v28, %v3672_v12 }
 0xa28   :  { %v3754_v63 = vrot.slane %v3747_v7, %v8673_v19 }
 0xa2a   :  { %v3756_v34 = vadd.f32 %v4118_v50, %v3754_v63 }
 0xa2c   :  { %v4119_v59 = vmul.f32 -1.442695, %v3756_v34 }
 0xa2e   :  { %6867 = vpow2.f32 %v4119_v59 }
 0xa2f   :  { %v6866_v60 = vpop.eup %6865 }
 0xa30   :  { %v3599_v6 = vmul.f32 %v6866_v60, %v3598_v57 }
 0xa32   :  { %v8208_v5 = vadd.f32 %v3600_v53, %v3599_v6 }
 0xa38   :  { %v6868_v9 = vpop.eup %6867 }
 0xa39   :  { %v3760_v10 = vadd.f32 1.0, %v6868_v9 }
 0xa3b   :  { %6869 = vrcp.f32 %v3760_v10 }
 0xa45   :  { %v6870_v22 = vpop.eup %6869 }
 0xa46   :  { %v3764_v30 = vmul.f32 %v6870_v22, %v3763_v16  ;;  %v3771_v33 = vrot.slane %v6870_v22, 2 }
 0xa48   :  { %v3768_v31 = vadd.f32 %v3766_v21, %v3764_v30  ;;  %v3773_v38 = vsub.f32 1.0, %v3771_v33  ;;  %v3775_v39 = vmul.f32 %v3771_v33, %v8086_v27 }
 0xa4a   :  { %6871 = vtanh.f32 %v3768_v31 }
 0xa54   :  { %v6872_v41 = vpop.eup %6871 }
 0xa55   :  { %v3774_v47 = vmul.f32 %v6872_v41, %v3773_v38 }
 0xa57   :  { %v3776_v55 = vadd.f32 %v3775_v39, %v3774_v47 }
 0xa59   :  { %3842 = vmatmul.mubr.f32.vlgmr.msra.gmra.mrb[30].mxu0 %v3776_v55  ;;  %4081 = vst [vmem:[#allocation2] sm:$0x3] %v3776_v55  ;;  %5333 = vmatmul.mubr.f32.vlgmr.msra.gmra.mrb[44].mxu1 %v3776_v55 }
 0xa5a   :  { %6661 = vmatpush1.bf16.msra.mxu0 %v7252_v8  ;;  %6692 = vmatpush3.bf16.msra.mxu1 %v8455_v24 }
 0xa5b   :  { %6663 = vmatprep.subr.bf16.mxu0 %v8456_v36  ;;  %6693 = vmatprep.subr.bf16.mxu1 %v8430_v25 }
 0xa5c   :  { %3982 = vmatprep.mubr.f32.mxu0 %v8432_v2  ;;  %5367 = vmatprep.mubr.msk.f32.mxu1 %vm6963_vm0, %v8432_v2 }
 0xa5e   :  { %6665 = vmatpush1.bf16.msra.mxu0 %v8457_v46  ;;  %6695 = vmatpush3.bf16.msra.mxu1 %v8458_v23 }
 0xa5f   :  { %6667 = vmatprep.subr.bf16.mxu0 %v8459_v37  ;;  %6696 = vmatprep.subr.bf16.mxu1 %v8430_v25 }
 0xa62   :  { %6669 = vmatpush1.bf16.msra.mxu0 %v8460_v62  ;;  %6698 = vmatpush3.bf16.msra.mxu1 %v8461_v48 }
 0xa63   :  { %6671 = vmatprep.subr.bf16.mxu0 %v8462_v52  ;;  %6699 = vmatprep.subr.bf16.mxu1 %v8430_v25 }
 0xa66   :  { %6673 = vmatpush1.bf16.msra.mxu0 %v8463_v40  ;;  %6701 = vmatpush3.bf16.msra.mxu1 %v8464_v32 }
 0xa67   :  { %6675 = vmatprep.subr.bf16.mxu0 %v8465_v13  ;;  %6702 = vmatprep.subr.bf16.mxu1 %v8430_v25 }
 0xa6a   :  { %6677 = vmatpush1.bf16.msra.mxu0 %v7297_v58  ;;  %6704 = vmatpush3.bf16.msra.mxu1 %v7299_v54 }
 0xa6b   :  { %6679 = vmatprep.subr.bf16.mxu0 %v8466_v0  ;;  %6705 = vmatprep.subr.bf16.mxu1 %v8430_v25 }
 0xa6e   :  { %6681 = vmatpush1.bf16.msra.mxu0 %v8467_v61  ;;  %6707 = vmatpush3.bf16.msra.mxu1 %v7309_v49 }
 0xa6f   :  { %6683 = vmatprep.subr.bf16.mxu0 %v7313_v11  ;;  %6708 = vmatprep.subr.bf16.mxu1 %v8430_v25 }
 0xa72   :  { %6685 = vmatpush1.bf16.msra.mxu0 %v7317_v18  ;;  %6710 = vmatpush3.bf16.msra.mxu1 %v7319_v14 }
 0xa73   :  { %6687 = vmatprep.subr.bf16.mxu0 %v7323_v3  ;;  %6711 = vmatprep.subr.bf16.mxu1 %v8430_v25 }
 0xa76   :  { %6689 = vmatpush1.bf16.msra.mxu0 %v7327_v43  ;;  %6713 = vmatpush3.bf16.msra.mxu1 %v7329_v44 }
 0xa79   :  { %3983 = vmatmul.mubr.f32.vlgmr.msra.gmra.mrb[30].mxu0 %v8208_v5  ;;  %5368 = vmatmul.mubr.f32.vlgmr.msra.gmra.mrb[46].mxu1 %v8208_v5 }
 0xb2c   :  { %v3914_v8 = vpop.f32.mrb[44].mxu1 }
 0xb2d   :  { %v5334_v2 = vpop.f32.mrb[45].mxu1  ;;  %v3915_v37 = vadd.f32 %v3914_v8, %v8672_v17 }
 0xb4c   :  { %v3984_v58 = vpop.f32.mrb[30].mxu0  ;;  %v4055_v54 = vpop.f32.mrb[46].mxu1 }
 0xb4d   :  { %v6728_v49 = vadd.f32 %v3984_v58, %v8632_v4  ;;  %v3986_v11 = vpop.f32.mrb[31].mxu0  ;;  %v5369_v18 = vpop.f32.mrb[47].mxu1  ;;  %v4073_v46 = vadd.f32 %v8671_v56, %v4055_v54 }
 0xb4e   :  { %v6729_v3 = vadd.f32 %v3986_v11, %v8633_v42 }
 0xb4f   :  { %v4120_v14 = vmul.f32 -1.442695, %v6728_v49 }
 0xb50   :  { %v4121_v25 = vmul.f32 -1.442695, %v6729_v3 }
 0xb51   :  { %6873 = vpow2.f32 %v4120_v14 }
 0xb52   :  { %6875 = vpow2.f32 %v4121_v25 }
 0xb5b   :  { %v6874_v43 = vpop.eup %6873 }
 0xb5c   :  { %v4067_v44 = vadd.f32 1.0, %v6874_v43  ;;  %v6876_v24 = vpop.eup %6875 }
 0xb5d   :  { %v4068_v36 = vadd.f32 1.0, %v6876_v24 }
 0xb5e   :  { %6877 = vrcp.f32 %v4067_v44 }
 0xb5f   :  { %6879 = vrcp.f32 %v4068_v36 }
 0xb68   :  { %v6878_v23 = vpop.eup %6877 }
 0xb69   :  { %v4074_v62 = vmul.f32 %v6878_v23, %v4073_v46  ;;  %v6880_v52 = vpop.eup %6879 }
 0xb6a   :  { %v4077_v40 = vsub.f32 1.0, %v6880_v52  ;;  %v4079_v0 = vmul.f32 %v6880_v52, %v8208_v5 }
 0xb6b   :  { %v4075_v48 = vadd.f32 %v4074_v62, %v3915_v37 }
 0xb6d   :  { %6881 = vtanh.f32 %v4075_v48 }
 0xb77   :  { %v6882_v32 = vpop.eup %6881 }
 0xb78   :  { %v4078_v13 = vmul.f32 %v6882_v32, %v4077_v40 }
 0xb7a   :  { %v4080_v61 = vadd.f32 %v4079_v0, %v4078_v13 }
 0xb7c   :  { %4082 = vst [vmem:[%s8264_s7] sm:$0x3] %v4080_v61 }
 0xb7d   :  { %4087 = vsyncpa [#allocation4], 1 }
 0xb7e   :  { %4088 = vsyncpa [#allocation6], 1 }

</bundles_post_ra>
